<compile_context>
chip_gen: v5e
topology: v5e:2x2
jax: 0.10.0
libtpu: 0.0.40
codegen_flags: <defaults>
</compile_context>

<pallas_src>
import functools

import jax
import jax.numpy as jnp
from jax.experimental import pallas as pl
from jax.experimental.pallas import tpu as pltpu


def _clstm_kernel(gx_ref, whh_ref, wfc_ref, bfc_ref,
                  logits_ref, hn_ref, cn_ref,
                  h_all, *, T, B, Hp):
    """Single invocation: full LSTM recurrence + deferred FC head.

    gx_ref:     (T, B, 4*Hp)  precomputed x_t @ W_ih^T + b (time-major, gate-padded)
    whh_ref:    (Hp, 4*Hp)    W_hh^T, gate-padded (padded rows/cols are zero)
    wfc_ref:    (Hp, O)       fc.weight^T, padded rows are zero
    bfc_ref:    (1, O)        fc.bias
    logits_ref: (T, B, O)     per-timestep fc output (time-major)
    hn_ref:     (B, Hp)       final hidden state (padded lanes are 0)
    cn_ref:     (B, Hp)       final cell state   (padded lanes are 0)
    h_all:      (T, B, Hp)    VMEM scratch holding every h_t for the deferred FC
    """
    whh = whh_ref[...]  # hoist weight load out of the serial loop

    def step(t, carry):
        h_prev, c_prev = carry                                   # (B, Hp) f32, in vregs
        gates = gx_ref[t] + jnp.dot(h_prev, whh,
                                    preferred_element_type=jnp.float32)  # (B, 4*Hp)
        # Lane-tile-aligned static gate slices (each gate owns a full 128-lane tile).
        i_g = jax.nn.sigmoid(gates[:, 0 * Hp:1 * Hp])
        f_g = jax.nn.sigmoid(gates[:, 1 * Hp:2 * Hp])
        g_g = jnp.tanh(gates[:, 2 * Hp:3 * Hp])
        o_g = jax.nn.sigmoid(gates[:, 3 * Hp:4 * Hp])

        c_new = f_g * c_prev + i_g * g_g
        h_new = o_g * jnp.tanh(c_new)
        h_all[t] = h_new                                         # for deferred FC
        return h_new, c_new

    h0 = jnp.zeros((B, Hp), jnp.float32)
    c0 = jnp.zeros((B, Hp), jnp.float32)
    h_last, c_last = jax.lax.fori_loop(0, T, step, (h0, c0), unroll=True)

    # Final states written exactly once.
    hn_ref[...] = h_last
    cn_ref[...] = c_last

    # Deferred per-timestep FC head: off the serial recurrence path.
    # (Small static T -> unrolled; the matmuls queue back-to-back through the MXU.)
    wfc = wfc_ref[...]
    bfc = bfc_ref[...]
    for t in range(T):
        logits_ref[t] = (jnp.dot(h_all[t], wfc,
                                 preferred_element_type=jnp.float32) + bfc)


def clstm_forward(x_m, x_a, params):
    """Pallas implementation of CLSTM.forward.

    x_m: (B, T, mass_input_size)
    x_a: (B, T, aux_input_size)
    returns (logits (B, T, out), (h_n (1, B, H), c_n (1, B, H)))
    """
    x = jnp.concatenate([x_m, x_a], axis=-1).astype(jnp.float32)  # (B, T, I)
    B, T, I = x.shape

    w_ih = params["w_ih"]        # (4H, I)   PyTorch lstm.weight_ih_l0 layout
    w_hh = params["w_hh"]        # (4H, H)   PyTorch lstm.weight_hh_l0 layout
    b_ih = params["b_ih"]        # (4H,)
    b_hh = params["b_hh"]        # (4H,)
    w_fc = params["w_fc"]        # (O, H)    PyTorch fc.weight layout
    b_fc = params["b_fc"]        # (O,)

    H = w_hh.shape[1]
    O = w_fc.shape[0]
    LANE = 128
    Hp = ((H + LANE - 1) // LANE) * LANE      # per-gate lane-padded width

    # One-time, gate-padded weight layouts (tiny XLA ops; fused / const-folded).
    # Column block k*Hp:(k+1)*Hp holds gate k; padded rows/cols are zero, so
    # padded lanes of h/c stay exactly 0 through the whole recurrence.
    w_ih_g = (jnp.zeros((I, 4, Hp), jnp.float32)
              .at[:, :, :H].set(jnp.transpose(w_ih.reshape(4, H, I), (2, 0, 1)))
              .reshape(I, 4 * Hp))
    w_hh_g = (jnp.zeros((Hp, 4, Hp), jnp.float32)
              .at[:H, :, :H].set(jnp.transpose(w_hh.reshape(4, H, H), (2, 0, 1)))
              .reshape(Hp, 4 * Hp))
    b_g = (jnp.zeros((4, Hp), jnp.float32)
           .at[:, :H].set((b_ih + b_hh).reshape(4, H))
           .reshape(1, 4 * Hp))
    w_fc_p = jnp.zeros((Hp, O), jnp.float32).at[:H, :].set(w_fc.T)
    b_fc2 = b_fc.reshape(1, O).astype(jnp.float32)

    # Hoisted input projection for ALL timesteps: one well-shaped matmul,
    # emitted time-major directly (no explicit transpose materialized).
    gx = jnp.einsum("bti,ik->tbk", x, w_ih_g,
                    preferred_element_type=jnp.float32) + b_g      # (T, B, 4*Hp)

    kernel = functools.partial(_clstm_kernel, T=T, B=B, Hp=Hp)

    logits_tm, hn_p, cn_p = pl.pallas_call(
        kernel,
        out_shape=(
            jax.ShapeDtypeStruct((T, B, O), jnp.float32),
            jax.ShapeDtypeStruct((B, Hp), jnp.float32),
            jax.ShapeDtypeStruct((B, Hp), jnp.float32),
        ),
        grid_spec=pltpu.PrefetchScalarGridSpec(
            num_scalar_prefetch=0,
            grid=(1,),                                             # single invocation
            in_specs=[
                pl.BlockSpec((T, B, 4 * Hp), lambda i: (0, 0, 0)),  # gates_x
                pl.BlockSpec((Hp, 4 * Hp), lambda i: (0, 0)),       # W_hh^T (padded)
                pl.BlockSpec((Hp, O), lambda i: (0, 0)),            # W_fc^T (padded)
                pl.BlockSpec((1, O), lambda i: (0, 0)),             # b_fc
            ],
            out_specs=[
                pl.BlockSpec((T, B, O), lambda i: (0, 0, 0)),       # logits (time-major)
                pl.BlockSpec((B, Hp), lambda i: (0, 0)),            # h_n
                pl.BlockSpec((B, Hp), lambda i: (0, 0)),            # c_n
            ],
            scratch_shapes=[
                pltpu.VMEM((T, B, Hp), jnp.float32),                # all h_t (deferred FC)
            ],
        ),
        compiler_params=pltpu.CompilerParams(
            dimension_semantics=("arbitrary",),
        ),
    )(gx, w_hh_g, w_fc_p, b_fc2)

    logits = jnp.transpose(logits_tm, (1, 0, 2))                    # (B, T, O)
    h_n = hn_p[None, :, :H]                                         # (1, B, H)
    c_n = cn_p[None, :, :H]
    return logits, (h_n, c_n)


def init_params(key, input_size, hidden_size, out_size, initial_forget_bias=0):
    """Deterministic synthetic parameters in PyTorch layout.

    lstm.weight_ih_l0: (4H, I)   lstm.weight_hh_l0: (4H, H)
    lstm.bias_ih_l0:   (4H,)     lstm.bias_hh_l0:   (4H,)
    fc.weight:         (O, H)    fc.bias:           (O,)
    """
    # TODO(synk): PyTorch's orthogonal_/kaiming init for w_ih/w_fc is not reproduced
    # exactly; synthetic uniform weights are used (w_hh keeps the eye_-per-gate init).
    k_ih, k_fc = jax.random.split(key, 2)
    H, I, O = hidden_size, input_size, out_size

    w_ih = jax.random.uniform(k_ih, (4 * H, I), jnp.float32, -0.5, 0.5)
    w_hh = jnp.tile(jnp.eye(H, dtype=jnp.float32), (4, 1))          # eye_ per gate
    b_ih = jnp.zeros((4 * H,), jnp.float32)
    if initial_forget_bias:
        b_ih = b_ih.at[H:2 * H].set(float(initial_forget_bias))
    b_hh = jnp.zeros((4 * H,), jnp.float32)
    bound = (3.0 / H) ** 0.5                                        # kaiming-ish uniform
    w_fc = jax.random.uniform(k_fc, (O, H), jnp.float32, -bound, bound)
    b_fc = jnp.zeros((O,), jnp.float32)

    return {"w_ih": w_ih, "w_hh": w_hh, "b_ih": b_ih, "b_hh": b_hh,
            "w_fc": w_fc, "b_fc": b_fc}


def _reference_forward(x_m, x_a, params):
    """Pure-JAX reference (mirrors PyTorch nn.LSTM + per-step Linear)."""
    x = jnp.concatenate([x_m, x_a], axis=-1).astype(jnp.float32)
    B, T, _ = x.shape
    w_ih, w_hh = params["w_ih"], params["w_hh"]
    b = params["b_ih"] + params["b_hh"]
    w_fc, b_fc = params["w_fc"], params["b_fc"]
    H = w_hh.shape[1]

    def step(carry, x_t):
        h, c = carry
        gates = x_t @ w_ih.T + h @ w_hh.T + b
        i = jax.nn.sigmoid(gates[:, 0 * H:1 * H])
        f = jax.nn.sigmoid(gates[:, 1 * H:2 * H])
        g = jnp.tanh(gates[:, 2 * H:3 * H])
        o = jax.nn.sigmoid(gates[:, 3 * H:4 * H])
        c = f * c + i * g
        h = o * jnp.tanh(c)
        return (h, c), h @ w_fc.T + b_fc

    h0 = jnp.zeros((B, H), jnp.float32)
    c0 = jnp.zeros((B, H), jnp.float32)
    (h, c), ys = jax.lax.scan(step, (h0, c0), jnp.transpose(x, (1, 0, 2)))
    return jnp.transpose(ys, (1, 0, 2)), (h[None], c[None])


if __name__ == "__main__":
    # cfg = {mass_input_size: 3, aux_input_size: 1, hidden_size: 32, out_size: 4}
    B, T = 2, 8
    mass_in, aux_in, hidden, out = 3, 1, 32, 4

    key = jax.random.PRNGKey(0)
    k_m, k_a, k_p = jax.random.split(key, 3)
    x_m = jax.random.normal(k_m, (B, T, mass_in), jnp.float32)
    x_a = jax.random.normal(k_a, (B, T, aux_in), jnp.float32)
    params = init_params(k_p, mass_in + aux_in, hidden, out, initial_forget_bias=0)

    logits, (h_n, c_n) = jax.block_until_ready(
        jax.jit(clstm_forward)(x_m, x_a, params))

    ref_logits, (ref_h, ref_c) = _reference_forward(x_m, x_a, params)
    assert logits.shape == (B, T, out)
    assert h_n.shape == (1, B, hidden) and c_n.shape == (1, B, hidden)
    assert jnp.allclose(logits, ref_logits, atol=1e-5, rtol=1e-5)
    assert jnp.allclose(h_n, ref_h, atol=1e-5, rtol=1e-5)
    assert jnp.allclose(c_n, ref_c, atol=1e-5, rtol=1e-5)

    print("KERNEL_OK")
</pallas_src>

<mosaic_0001>
module attributes {stable_mosaic.version = 11 : i64} {
  func.func @_clstm_kernel(%arg0: i32, %arg1: memref<8x2x512xf32, #tpu.memory_space<vmem>>, %arg2: memref<128x512xf32, #tpu.memory_space<vmem>>, %arg3: memref<128x4xf32, #tpu.memory_space<vmem>>, %arg4: memref<1x4xf32, #tpu.memory_space<vmem>>, %arg5: memref<8x2x4xf32, #tpu.memory_space<vmem>>, %arg6: memref<2x128xf32, #tpu.memory_space<vmem>>, %arg7: memref<2x128xf32, #tpu.memory_space<vmem>>, %arg8: memref<8x2x128xf32, #tpu.memory_space<vmem>>) attributes {dimension_semantics = [#tpu.dimension_semantics<arbitrary>], iteration_bounds = array<i64: 1>, scalar_prefetch = 0 : i64, scratch_operands = 1 : i64, tpu.core_type = #tpu.core_type<tc>, window_params = [{pipeline_mode = #tpu.pipeline_mode<synchronous>, transform_indices = @transform_0, window_bounds = array<i64: 8, 2, 512>}, {pipeline_mode = #tpu.pipeline_mode<synchronous>, transform_indices = @transform_1, window_bounds = array<i64: 128, 512>}, {pipeline_mode = #tpu.pipeline_mode<synchronous>, transform_indices = @transform_2, window_bounds = array<i64: 128, 4>}, {pipeline_mode = #tpu.pipeline_mode<synchronous>, transform_indices = @transform_3, window_bounds = array<i64: 1, 4>}, {pipeline_mode = #tpu.pipeline_mode<synchronous>, transform_indices = @transform_4, window_bounds = array<i64: 8, 2, 4>}, {pipeline_mode = #tpu.pipeline_mode<synchronous>, transform_indices = @transform_5, window_bounds = array<i64: 2, 128>}, {pipeline_mode = #tpu.pipeline_mode<synchronous>, transform_indices = @transform_6, window_bounds = array<i64: 2, 128>}]} {
    %c0 = arith.constant 0 : index
    %c0_0 = arith.constant 0 : index
    %0 = vector.load %arg2[%c0, %c0_0] : memref<128x512xf32, #tpu.memory_space<vmem>>, vector<128x512xf32>
    %cst = arith.constant 0.000000e+00 : f32
    %1 = vector.broadcast %cst : f32 to vector<2x128xf32>
    %cst_1 = arith.constant 0.000000e+00 : f32
    %2 = vector.broadcast %cst_1 : f32 to vector<2x128xf32>
    %c0_i32 = arith.constant 0 : i32
    %3 = arith.index_cast %c0_i32 : i32 to index
    %c0_2 = arith.constant 0 : index
    %c0_3 = arith.constant 0 : index
    %4 = vector.load %arg1[%3, %c0_2, %c0_3] : memref<8x2x512xf32, #tpu.memory_space<vmem>>, vector<1x2x512xf32>
    %5 = vector.shape_cast %4 : vector<1x2x512xf32> to vector<2x512xf32>
    %cst_4 = arith.constant dense<0.000000e+00> : vector<2x512xf32>
    %6 = tpu.matmul %1, %0, %cst_4 {dimension_numbers = #tpu.dot_dimension_numbers<[1], [0], [0], [1], [0, 0, 1, 1], [], []>} : vector<2x128xf32>, vector<128x512xf32>, vector<2x512xf32> -> vector<2x512xf32>
    %7 = arith.addf %5, %6 : vector<2x512xf32>
    %8 = vector.extract_strided_slice %7 {offsets = [0, 0], sizes = [2, 128], strides = [1, 1]} : vector<2x512xf32> to vector<2x128xf32>
    %9 = arith.negf %8 : vector<2x128xf32>
    %10 = math.exp %9 : vector<2x128xf32>
    %cst_5 = arith.constant 1.000000e+00 : f32
    %11 = vector.broadcast %cst_5 : f32 to vector<2x128xf32>
    %12 = arith.addf %11, %10 : vector<2x128xf32>
    %13 = arith.divf %11, %12 : vector<2x128xf32>
    %14 = vector.extract_strided_slice %7 {offsets = [0, 128], sizes = [2, 128], strides = [1, 1]} : vector<2x512xf32> to vector<2x128xf32>
    %15 = arith.negf %14 : vector<2x128xf32>
    %16 = math.exp %15 : vector<2x128xf32>
    %cst_6 = arith.constant 1.000000e+00 : f32
    %17 = vector.broadcast %cst_6 : f32 to vector<2x128xf32>
    %18 = arith.addf %17, %16 : vector<2x128xf32>
    %19 = arith.divf %17, %18 : vector<2x128xf32>
    %20 = vector.extract_strided_slice %7 {offsets = [0, 256], sizes = [2, 128], strides = [1, 1]} : vector<2x512xf32> to vector<2x128xf32>
    %21 = math.tanh %20 : vector<2x128xf32>
    %22 = vector.extract_strided_slice %7 {offsets = [0, 384], sizes = [2, 128], strides = [1, 1]} : vector<2x512xf32> to vector<2x128xf32>
    %23 = arith.negf %22 : vector<2x128xf32>
    %24 = math.exp %23 : vector<2x128xf32>
    %cst_7 = arith.constant 1.000000e+00 : f32
    %25 = vector.broadcast %cst_7 : f32 to vector<2x128xf32>
    %26 = arith.addf %25, %24 : vector<2x128xf32>
    %27 = arith.divf %25, %26 : vector<2x128xf32>
    %28 = arith.mulf %19, %2 : vector<2x128xf32>
    %29 = arith.mulf %13, %21 : vector<2x128xf32>
    %30 = arith.addf %28, %29 : vector<2x128xf32>
    %31 = math.tanh %30 : vector<2x128xf32>
    %32 = arith.mulf %27, %31 : vector<2x128xf32>
    %33 = arith.index_cast %c0_i32 : i32 to index
    %c0_8 = arith.constant 0 : index
    %c0_9 = arith.constant 0 : index
    %34 = vector.load %arg8[%33, %c0_8, %c0_9] : memref<8x2x128xf32, #tpu.memory_space<vmem>>, vector<1x2x128xf32>
    %35 = vector.shape_cast %34 : vector<1x2x128xf32> to vector<2x128xf32>
    %36 = vector.shape_cast %32 : vector<2x128xf32> to vector<1x2x128xf32>
    tpu.vector_store %arg8[%33, %c0_8, %c0_9], %36 {strides = array<i32>} : memref<8x2x128xf32, #tpu.memory_space<vmem>>, vector<1x2x128xf32>,
    %c1_i32 = arith.constant 1 : i32
    %37 = arith.index_cast %c1_i32 : i32 to index
    %c0_10 = arith.constant 0 : index
    %c0_11 = arith.constant 0 : index
    %38 = vector.load %arg1[%37, %c0_10, %c0_11] : memref<8x2x512xf32, #tpu.memory_space<vmem>>, vector<1x2x512xf32>
    %39 = vector.shape_cast %38 : vector<1x2x512xf32> to vector<2x512xf32>
    %cst_12 = arith.constant dense<0.000000e+00> : vector<2x512xf32>
    %40 = tpu.matmul %32, %0, %cst_12 {dimension_numbers = #tpu.dot_dimension_numbers<[1], [0], [0], [1], [0, 0, 1, 1], [], []>} : vector<2x128xf32>, vector<128x512xf32>, vector<2x512xf32> -> vector<2x512xf32>
    %41 = arith.addf %39, %40 : vector<2x512xf32>
    %42 = vector.extract_strided_slice %41 {offsets = [0, 0], sizes = [2, 128], strides = [1, 1]} : vector<2x512xf32> to vector<2x128xf32>
    %43 = arith.negf %42 : vector<2x128xf32>
    %44 = math.exp %43 : vector<2x128xf32>
    %cst_13 = arith.constant 1.000000e+00 : f32
    %45 = vector.broadcast %cst_13 : f32 to vector<2x128xf32>
    %46 = arith.addf %45, %44 : vector<2x128xf32>
    %47 = arith.divf %45, %46 : vector<2x128xf32>
    %48 = vector.extract_strided_slice %41 {offsets = [0, 128], sizes = [2, 128], strides = [1, 1]} : vector<2x512xf32> to vector<2x128xf32>
    %49 = arith.negf %48 : vector<2x128xf32>
    %50 = math.exp %49 : vector<2x128xf32>
    %cst_14 = arith.constant 1.000000e+00 : f32
    %51 = vector.broadcast %cst_14 : f32 to vector<2x128xf32>
    %52 = arith.addf %51, %50 : vector<2x128xf32>
    %53 = arith.divf %51, %52 : vector<2x128xf32>
    %54 = vector.extract_strided_slice %41 {offsets = [0, 256], sizes = [2, 128], strides = [1, 1]} : vector<2x512xf32> to vector<2x128xf32>
    %55 = math.tanh %54 : vector<2x128xf32>
    %56 = vector.extract_strided_slice %41 {offsets = [0, 384], sizes = [2, 128], strides = [1, 1]} : vector<2x512xf32> to vector<2x128xf32>
    %57 = arith.negf %56 : vector<2x128xf32>
    %58 = math.exp %57 : vector<2x128xf32>
    %cst_15 = arith.constant 1.000000e+00 : f32
    %59 = vector.broadcast %cst_15 : f32 to vector<2x128xf32>
    %60 = arith.addf %59, %58 : vector<2x128xf32>
    %61 = arith.divf %59, %60 : vector<2x128xf32>
    %62 = arith.mulf %53, %30 : vector<2x128xf32>
    %63 = arith.mulf %47, %55 : vector<2x128xf32>
    %64 = arith.addf %62, %63 : vector<2x128xf32>
    %65 = math.tanh %64 : vector<2x128xf32>
    %66 = arith.mulf %61, %65 : vector<2x128xf32>
    %67 = arith.index_cast %c1_i32 : i32 to index
    %c0_16 = arith.constant 0 : index
    %c0_17 = arith.constant 0 : index
    %68 = vector.load %arg8[%67, %c0_16, %c0_17] : memref<8x2x128xf32, #tpu.memory_space<vmem>>, vector<1x2x128xf32>
    %69 = vector.shape_cast %68 : vector<1x2x128xf32> to vector<2x128xf32>
    %70 = vector.shape_cast %66 : vector<2x128xf32> to vector<1x2x128xf32>
    tpu.vector_store %arg8[%67, %c0_16, %c0_17], %70 {strides = array<i32>} : memref<8x2x128xf32, #tpu.memory_space<vmem>>, vector<1x2x128xf32>,
    %c2_i32 = arith.constant 2 : i32
    %71 = arith.index_cast %c2_i32 : i32 to index
    %c0_18 = arith.constant 0 : index
    %c0_19 = arith.constant 0 : index
    %72 = vector.load %arg1[%71, %c0_18, %c0_19] : memref<8x2x512xf32, #tpu.memory_space<vmem>>, vector<1x2x512xf32>
    %73 = vector.shape_cast %72 : vector<1x2x512xf32> to vector<2x512xf32>
    %cst_20 = arith.constant dense<0.000000e+00> : vector<2x512xf32>
    %74 = tpu.matmul %66, %0, %cst_20 {dimension_numbers = #tpu.dot_dimension_numbers<[1], [0], [0], [1], [0, 0, 1, 1], [], []>} : vector<2x128xf32>, vector<128x512xf32>, vector<2x512xf32> -> vector<2x512xf32>
    %75 = arith.addf %73, %74 : vector<2x512xf32>
    %76 = vector.extract_strided_slice %75 {offsets = [0, 0], sizes = [2, 128], strides = [1, 1]} : vector<2x512xf32> to vector<2x128xf32>
    %77 = arith.negf %76 : vector<2x128xf32>
    %78 = math.exp %77 : vector<2x128xf32>
    %cst_21 = arith.constant 1.000000e+00 : f32
    %79 = vector.broadcast %cst_21 : f32 to vector<2x128xf32>
    %80 = arith.addf %79, %78 : vector<2x128xf32>
    %81 = arith.divf %79, %80 : vector<2x128xf32>
    %82 = vector.extract_strided_slice %75 {offsets = [0, 128], sizes = [2, 128], strides = [1, 1]} : vector<2x512xf32> to vector<2x128xf32>
    %83 = arith.negf %82 : vector<2x128xf32>
    %84 = math.exp %83 : vector<2x128xf32>
    %cst_22 = arith.constant 1.000000e+00 : f32
    %85 = vector.broadcast %cst_22 : f32 to vector<2x128xf32>
    %86 = arith.addf %85, %84 : vector<2x128xf32>
    %87 = arith.divf %85, %86 : vector<2x128xf32>
    %88 = vector.extract_strided_slice %75 {offsets = [0, 256], sizes = [2, 128], strides = [1, 1]} : vector<2x512xf32> to vector<2x128xf32>
    %89 = math.tanh %88 : vector<2x128xf32>
    %90 = vector.extract_strided_slice %75 {offsets = [0, 384], sizes = [2, 128], strides = [1, 1]} : vector<2x512xf32> to vector<2x128xf32>
    %91 = arith.negf %90 : vector<2x128xf32>
    %92 = math.exp %91 : vector<2x128xf32>
    %cst_23 = arith.constant 1.000000e+00 : f32
    %93 = vector.broadcast %cst_23 : f32 to vector<2x128xf32>
    %94 = arith.addf %93, %92 : vector<2x128xf32>
    %95 = arith.divf %93, %94 : vector<2x128xf32>
    %96 = arith.mulf %87, %64 : vector<2x128xf32>
    %97 = arith.mulf %81, %89 : vector<2x128xf32>
    %98 = arith.addf %96, %97 : vector<2x128xf32>
    %99 = math.tanh %98 : vector<2x128xf32>
    %100 = arith.mulf %95, %99 : vector<2x128xf32>
    %101 = arith.index_cast %c2_i32 : i32 to index
    %c0_24 = arith.constant 0 : index
    %c0_25 = arith.constant 0 : index
    %102 = vector.load %arg8[%101, %c0_24, %c0_25] : memref<8x2x128xf32, #tpu.memory_space<vmem>>, vector<1x2x128xf32>
    %103 = vector.shape_cast %102 : vector<1x2x128xf32> to vector<2x128xf32>
    %104 = vector.shape_cast %100 : vector<2x128xf32> to vector<1x2x128xf32>
    tpu.vector_store %arg8[%101, %c0_24, %c0_25], %104 {strides = array<i32>} : memref<8x2x128xf32, #tpu.memory_space<vmem>>, vector<1x2x128xf32>,
    %c3_i32 = arith.constant 3 : i32
    %105 = arith.index_cast %c3_i32 : i32 to index
    %c0_26 = arith.constant 0 : index
    %c0_27 = arith.constant 0 : index
    %106 = vector.load %arg1[%105, %c0_26, %c0_27] : memref<8x2x512xf32, #tpu.memory_space<vmem>>, vector<1x2x512xf32>
    %107 = vector.shape_cast %106 : vector<1x2x512xf32> to vector<2x512xf32>
    %cst_28 = arith.constant dense<0.000000e+00> : vector<2x512xf32>
    %108 = tpu.matmul %100, %0, %cst_28 {dimension_numbers = #tpu.dot_dimension_numbers<[1], [0], [0], [1], [0, 0, 1, 1], [], []>} : vector<2x128xf32>, vector<128x512xf32>, vector<2x512xf32> -> vector<2x512xf32>
    %109 = arith.addf %107, %108 : vector<2x512xf32>
    %110 = vector.extract_strided_slice %109 {offsets = [0, 0], sizes = [2, 128], strides = [1, 1]} : vector<2x512xf32> to vector<2x128xf32>
    %111 = arith.negf %110 : vector<2x128xf32>
    %112 = math.exp %111 : vector<2x128xf32>
    %cst_29 = arith.constant 1.000000e+00 : f32
    %113 = vector.broadcast %cst_29 : f32 to vector<2x128xf32>
    %114 = arith.addf %113, %112 : vector<2x128xf32>
    %115 = arith.divf %113, %114 : vector<2x128xf32>
    %116 = vector.extract_strided_slice %109 {offsets = [0, 128], sizes = [2, 128], strides = [1, 1]} : vector<2x512xf32> to vector<2x128xf32>
    %117 = arith.negf %116 : vector<2x128xf32>
    %118 = math.exp %117 : vector<2x128xf32>
    %cst_30 = arith.constant 1.000000e+00 : f32
    %119 = vector.broadcast %cst_30 : f32 to vector<2x128xf32>
    %120 = arith.addf %119, %118 : vector<2x128xf32>
    %121 = arith.divf %119, %120 : vector<2x128xf32>
    %122 = vector.extract_strided_slice %109 {offsets = [0, 256], sizes = [2, 128], strides = [1, 1]} : vector<2x512xf32> to vector<2x128xf32>
    %123 = math.tanh %122 : vector<2x128xf32>
    %124 = vector.extract_strided_slice %109 {offsets = [0, 384], sizes = [2, 128], strides = [1, 1]} : vector<2x512xf32> to vector<2x128xf32>
    %125 = arith.negf %124 : vector<2x128xf32>
    %126 = math.exp %125 : vector<2x128xf32>
    %cst_31 = arith.constant 1.000000e+00 : f32
    %127 = vector.broadcast %cst_31 : f32 to vector<2x128xf32>
    %128 = arith.addf %127, %126 : vector<2x128xf32>
    %129 = arith.divf %127, %128 : vector<2x128xf32>
    %130 = arith.mulf %121, %98 : vector<2x128xf32>
    %131 = arith.mulf %115, %123 : vector<2x128xf32>
    %132 = arith.addf %130, %131 : vector<2x128xf32>
    %133 = math.tanh %132 : vector<2x128xf32>
    %134 = arith.mulf %129, %133 : vector<2x128xf32>
    %135 = arith.index_cast %c3_i32 : i32 to index
    %c0_32 = arith.constant 0 : index
    %c0_33 = arith.constant 0 : index
    %136 = vector.load %arg8[%135, %c0_32, %c0_33] : memref<8x2x128xf32, #tpu.memory_space<vmem>>, vector<1x2x128xf32>
    %137 = vector.shape_cast %136 : vector<1x2x128xf32> to vector<2x128xf32>
    %138 = vector.shape_cast %134 : vector<2x128xf32> to vector<1x2x128xf32>
    tpu.vector_store %arg8[%135, %c0_32, %c0_33], %138 {strides = array<i32>} : memref<8x2x128xf32, #tpu.memory_space<vmem>>, vector<1x2x128xf32>,
    %c4_i32 = arith.constant 4 : i32
    %139 = arith.index_cast %c4_i32 : i32 to index
    %c0_34 = arith.constant 0 : index
    %c0_35 = arith.constant 0 : index
    %140 = vector.load %arg1[%139, %c0_34, %c0_35] : memref<8x2x512xf32, #tpu.memory_space<vmem>>, vector<1x2x512xf32>
    %141 = vector.shape_cast %140 : vector<1x2x512xf32> to vector<2x512xf32>
    %cst_36 = arith.constant dense<0.000000e+00> : vector<2x512xf32>
    %142 = tpu.matmul %134, %0, %cst_36 {dimension_numbers = #tpu.dot_dimension_numbers<[1], [0], [0], [1], [0, 0, 1, 1], [], []>} : vector<2x128xf32>, vector<128x512xf32>, vector<2x512xf32> -> vector<2x512xf32>
    %143 = arith.addf %141, %142 : vector<2x512xf32>
    %144 = vector.extract_strided_slice %143 {offsets = [0, 0], sizes = [2, 128], strides = [1, 1]} : vector<2x512xf32> to vector<2x128xf32>
    %145 = arith.negf %144 : vector<2x128xf32>
    %146 = math.exp %145 : vector<2x128xf32>
    %cst_37 = arith.constant 1.000000e+00 : f32
    %147 = vector.broadcast %cst_37 : f32 to vector<2x128xf32>
    %148 = arith.addf %147, %146 : vector<2x128xf32>
    %149 = arith.divf %147, %148 : vector<2x128xf32>
    %150 = vector.extract_strided_slice %143 {offsets = [0, 128], sizes = [2, 128], strides = [1, 1]} : vector<2x512xf32> to vector<2x128xf32>
    %151 = arith.negf %150 : vector<2x128xf32>
    %152 = math.exp %151 : vector<2x128xf32>
    %cst_38 = arith.constant 1.000000e+00 : f32
    %153 = vector.broadcast %cst_38 : f32 to vector<2x128xf32>
    %154 = arith.addf %153, %152 : vector<2x128xf32>
    %155 = arith.divf %153, %154 : vector<2x128xf32>
    %156 = vector.extract_strided_slice %143 {offsets = [0, 256], sizes = [2, 128], strides = [1, 1]} : vector<2x512xf32> to vector<2x128xf32>
    %157 = math.tanh %156 : vector<2x128xf32>
    %158 = vector.extract_strided_slice %143 {offsets = [0, 384], sizes = [2, 128], strides = [1, 1]} : vector<2x512xf32> to vector<2x128xf32>
    %159 = arith.negf %158 : vector<2x128xf32>
    %160 = math.exp %159 : vector<2x128xf32>
    %cst_39 = arith.constant 1.000000e+00 : f32
    %161 = vector.broadcast %cst_39 : f32 to vector<2x128xf32>
    %162 = arith.addf %161, %160 : vector<2x128xf32>
    %163 = arith.divf %161, %162 : vector<2x128xf32>
    %164 = arith.mulf %155, %132 : vector<2x128xf32>
    %165 = arith.mulf %149, %157 : vector<2x128xf32>
    %166 = arith.addf %164, %165 : vector<2x128xf32>
    %167 = math.tanh %166 : vector<2x128xf32>
    %168 = arith.mulf %163, %167 : vector<2x128xf32>
    %169 = arith.index_cast %c4_i32 : i32 to index
    %c0_40 = arith.constant 0 : index
    %c0_41 = arith.constant 0 : index
    %170 = vector.load %arg8[%169, %c0_40, %c0_41] : memref<8x2x128xf32, #tpu.memory_space<vmem>>, vector<1x2x128xf32>
    %171 = vector.shape_cast %170 : vector<1x2x128xf32> to vector<2x128xf32>
    %172 = vector.shape_cast %168 : vector<2x128xf32> to vector<1x2x128xf32>
    tpu.vector_store %arg8[%169, %c0_40, %c0_41], %172 {strides = array<i32>} : memref<8x2x128xf32, #tpu.memory_space<vmem>>, vector<1x2x128xf32>,
    %c5_i32 = arith.constant 5 : i32
    %173 = arith.index_cast %c5_i32 : i32 to index
    %c0_42 = arith.constant 0 : index
    %c0_43 = arith.constant 0 : index
    %174 = vector.load %arg1[%173, %c0_42, %c0_43] : memref<8x2x512xf32, #tpu.memory_space<vmem>>, vector<1x2x512xf32>
    %175 = vector.shape_cast %174 : vector<1x2x512xf32> to vector<2x512xf32>
    %cst_44 = arith.constant dense<0.000000e+00> : vector<2x512xf32>
    %176 = tpu.matmul %168, %0, %cst_44 {dimension_numbers = #tpu.dot_dimension_numbers<[1], [0], [0], [1], [0, 0, 1, 1], [], []>} : vector<2x128xf32>, vector<128x512xf32>, vector<2x512xf32> -> vector<2x512xf32>
    %177 = arith.addf %175, %176 : vector<2x512xf32>
    %178 = vector.extract_strided_slice %177 {offsets = [0, 0], sizes = [2, 128], strides = [1, 1]} : vector<2x512xf32> to vector<2x128xf32>
    %179 = arith.negf %178 : vector<2x128xf32>
    %180 = math.exp %179 : vector<2x128xf32>
    %cst_45 = arith.constant 1.000000e+00 : f32
    %181 = vector.broadcast %cst_45 : f32 to vector<2x128xf32>
    %182 = arith.addf %181, %180 : vector<2x128xf32>
    %183 = arith.divf %181, %182 : vector<2x128xf32>
    %184 = vector.extract_strided_slice %177 {offsets = [0, 128], sizes = [2, 128], strides = [1, 1]} : vector<2x512xf32> to vector<2x128xf32>
    %185 = arith.negf %184 : vector<2x128xf32>
    %186 = math.exp %185 : vector<2x128xf32>
    %cst_46 = arith.constant 1.000000e+00 : f32
    %187 = vector.broadcast %cst_46 : f32 to vector<2x128xf32>
    %188 = arith.addf %187, %186 : vector<2x128xf32>
    %189 = arith.divf %187, %188 : vector<2x128xf32>
    %190 = vector.extract_strided_slice %177 {offsets = [0, 256], sizes = [2, 128], strides = [1, 1]} : vector<2x512xf32> to vector<2x128xf32>
    %191 = math.tanh %190 : vector<2x128xf32>
    %192 = vector.extract_strided_slice %177 {offsets = [0, 384], sizes = [2, 128], strides = [1, 1]} : vector<2x512xf32> to vector<2x128xf32>
    %193 = arith.negf %192 : vector<2x128xf32>
    %194 = math.exp %193 : vector<2x128xf32>
    %cst_47 = arith.constant 1.000000e+00 : f32
    %195 = vector.broadcast %cst_47 : f32 to vector<2x128xf32>
    %196 = arith.addf %195, %194 : vector<2x128xf32>
    %197 = arith.divf %195, %196 : vector<2x128xf32>
    %198 = arith.mulf %189, %166 : vector<2x128xf32>
    %199 = arith.mulf %183, %191 : vector<2x128xf32>
    %200 = arith.addf %198, %199 : vector<2x128xf32>
    %201 = math.tanh %200 : vector<2x128xf32>
    %202 = arith.mulf %197, %201 : vector<2x128xf32>
    %203 = arith.index_cast %c5_i32 : i32 to index
    %c0_48 = arith.constant 0 : index
    %c0_49 = arith.constant 0 : index
    %204 = vector.load %arg8[%203, %c0_48, %c0_49] : memref<8x2x128xf32, #tpu.memory_space<vmem>>, vector<1x2x128xf32>
    %205 = vector.shape_cast %204 : vector<1x2x128xf32> to vector<2x128xf32>
    %206 = vector.shape_cast %202 : vector<2x128xf32> to vector<1x2x128xf32>
    tpu.vector_store %arg8[%203, %c0_48, %c0_49], %206 {strides = array<i32>} : memref<8x2x128xf32, #tpu.memory_space<vmem>>, vector<1x2x128xf32>,
    %c6_i32 = arith.constant 6 : i32
    %207 = arith.index_cast %c6_i32 : i32 to index
    %c0_50 = arith.constant 0 : index
    %c0_51 = arith.constant 0 : index
    %208 = vector.load %arg1[%207, %c0_50, %c0_51] : memref<8x2x512xf32, #tpu.memory_space<vmem>>, vector<1x2x512xf32>
    %209 = vector.shape_cast %208 : vector<1x2x512xf32> to vector<2x512xf32>
    %cst_52 = arith.constant dense<0.000000e+00> : vector<2x512xf32>
    %210 = tpu.matmul %202, %0, %cst_52 {dimension_numbers = #tpu.dot_dimension_numbers<[1], [0], [0], [1], [0, 0, 1, 1], [], []>} : vector<2x128xf32>, vector<128x512xf32>, vector<2x512xf32> -> vector<2x512xf32>
    %211 = arith.addf %209, %210 : vector<2x512xf32>
    %212 = vector.extract_strided_slice %211 {offsets = [0, 0], sizes = [2, 128], strides = [1, 1]} : vector<2x512xf32> to vector<2x128xf32>
    %213 = arith.negf %212 : vector<2x128xf32>
    %214 = math.exp %213 : vector<2x128xf32>
    %cst_53 = arith.constant 1.000000e+00 : f32
    %215 = vector.broadcast %cst_53 : f32 to vector<2x128xf32>
    %216 = arith.addf %215, %214 : vector<2x128xf32>
    %217 = arith.divf %215, %216 : vector<2x128xf32>
    %218 = vector.extract_strided_slice %211 {offsets = [0, 128], sizes = [2, 128], strides = [1, 1]} : vector<2x512xf32> to vector<2x128xf32>
    %219 = arith.negf %218 : vector<2x128xf32>
    %220 = math.exp %219 : vector<2x128xf32>
    %cst_54 = arith.constant 1.000000e+00 : f32
    %221 = vector.broadcast %cst_54 : f32 to vector<2x128xf32>
    %222 = arith.addf %221, %220 : vector<2x128xf32>
    %223 = arith.divf %221, %222 : vector<2x128xf32>
    %224 = vector.extract_strided_slice %211 {offsets = [0, 256], sizes = [2, 128], strides = [1, 1]} : vector<2x512xf32> to vector<2x128xf32>
    %225 = math.tanh %224 : vector<2x128xf32>
    %226 = vector.extract_strided_slice %211 {offsets = [0, 384], sizes = [2, 128], strides = [1, 1]} : vector<2x512xf32> to vector<2x128xf32>
    %227 = arith.negf %226 : vector<2x128xf32>
    %228 = math.exp %227 : vector<2x128xf32>
    %cst_55 = arith.constant 1.000000e+00 : f32
    %229 = vector.broadcast %cst_55 : f32 to vector<2x128xf32>
    %230 = arith.addf %229, %228 : vector<2x128xf32>
    %231 = arith.divf %229, %230 : vector<2x128xf32>
    %232 = arith.mulf %223, %200 : vector<2x128xf32>
    %233 = arith.mulf %217, %225 : vector<2x128xf32>
    %234 = arith.addf %232, %233 : vector<2x128xf32>
    %235 = math.tanh %234 : vector<2x128xf32>
    %236 = arith.mulf %231, %235 : vector<2x128xf32>
    %237 = arith.index_cast %c6_i32 : i32 to index
    %c0_56 = arith.constant 0 : index
    %c0_57 = arith.constant 0 : index
    %238 = vector.load %arg8[%237, %c0_56, %c0_57] : memref<8x2x128xf32, #tpu.memory_space<vmem>>, vector<1x2x128xf32>
    %239 = vector.shape_cast %238 : vector<1x2x128xf32> to vector<2x128xf32>
    %240 = vector.shape_cast %236 : vector<2x128xf32> to vector<1x2x128xf32>
    tpu.vector_store %arg8[%237, %c0_56, %c0_57], %240 {strides = array<i32>} : memref<8x2x128xf32, #tpu.memory_space<vmem>>, vector<1x2x128xf32>,
    %c7_i32 = arith.constant 7 : i32
    %241 = arith.index_cast %c7_i32 : i32 to index
    %c0_58 = arith.constant 0 : index
    %c0_59 = arith.constant 0 : index
    %242 = vector.load %arg1[%241, %c0_58, %c0_59] : memref<8x2x512xf32, #tpu.memory_space<vmem>>, vector<1x2x512xf32>
    %243 = vector.shape_cast %242 : vector<1x2x512xf32> to vector<2x512xf32>
    %cst_60 = arith.constant dense<0.000000e+00> : vector<2x512xf32>
    %244 = tpu.matmul %236, %0, %cst_60 {dimension_numbers = #tpu.dot_dimension_numbers<[1], [0], [0], [1], [0, 0, 1, 1], [], []>} : vector<2x128xf32>, vector<128x512xf32>, vector<2x512xf32> -> vector<2x512xf32>
    %245 = arith.addf %243, %244 : vector<2x512xf32>
    %246 = vector.extract_strided_slice %245 {offsets = [0, 0], sizes = [2, 128], strides = [1, 1]} : vector<2x512xf32> to vector<2x128xf32>
    %247 = arith.negf %246 : vector<2x128xf32>
    %248 = math.exp %247 : vector<2x128xf32>
    %cst_61 = arith.constant 1.000000e+00 : f32
    %249 = vector.broadcast %cst_61 : f32 to vector<2x128xf32>
    %250 = arith.addf %249, %248 : vector<2x128xf32>
    %251 = arith.divf %249, %250 : vector<2x128xf32>
    %252 = vector.extract_strided_slice %245 {offsets = [0, 128], sizes = [2, 128], strides = [1, 1]} : vector<2x512xf32> to vector<2x128xf32>
    %253 = arith.negf %252 : vector<2x128xf32>
    %254 = math.exp %253 : vector<2x128xf32>
    %cst_62 = arith.constant 1.000000e+00 : f32
    %255 = vector.broadcast %cst_62 : f32 to vector<2x128xf32>
    %256 = arith.addf %255, %254 : vector<2x128xf32>
    %257 = arith.divf %255, %256 : vector<2x128xf32>
    %258 = vector.extract_strided_slice %245 {offsets = [0, 256], sizes = [2, 128], strides = [1, 1]} : vector<2x512xf32> to vector<2x128xf32>
    %259 = math.tanh %258 : vector<2x128xf32>
    %260 = vector.extract_strided_slice %245 {offsets = [0, 384], sizes = [2, 128], strides = [1, 1]} : vector<2x512xf32> to vector<2x128xf32>
    %261 = arith.negf %260 : vector<2x128xf32>
    %262 = math.exp %261 : vector<2x128xf32>
    %cst_63 = arith.constant 1.000000e+00 : f32
    %263 = vector.broadcast %cst_63 : f32 to vector<2x128xf32>
    %264 = arith.addf %263, %262 : vector<2x128xf32>
    %265 = arith.divf %263, %264 : vector<2x128xf32>
    %266 = arith.mulf %257, %234 : vector<2x128xf32>
    %267 = arith.mulf %251, %259 : vector<2x128xf32>
    %268 = arith.addf %266, %267 : vector<2x128xf32>
    %269 = math.tanh %268 : vector<2x128xf32>
    %270 = arith.mulf %265, %269 : vector<2x128xf32>
    %271 = arith.index_cast %c7_i32 : i32 to index
    %c0_64 = arith.constant 0 : index
    %c0_65 = arith.constant 0 : index
    %272 = vector.load %arg8[%271, %c0_64, %c0_65] : memref<8x2x128xf32, #tpu.memory_space<vmem>>, vector<1x2x128xf32>
    %273 = vector.shape_cast %272 : vector<1x2x128xf32> to vector<2x128xf32>
    %274 = vector.shape_cast %270 : vector<2x128xf32> to vector<1x2x128xf32>
    tpu.vector_store %arg8[%271, %c0_64, %c0_65], %274 {strides = array<i32>} : memref<8x2x128xf32, #tpu.memory_space<vmem>>, vector<1x2x128xf32>,
    %c8_i32 = arith.constant 8 : i32
    %c0_66 = arith.constant 0 : index
    %c0_67 = arith.constant 0 : index
    %275 = vector.load %arg6[%c0_66, %c0_67] : memref<2x128xf32, #tpu.memory_space<vmem>>, vector<2x128xf32>
    tpu.vector_store %arg6[%c0_66, %c0_67], %270 {strides = array<i32>} : memref<2x128xf32, #tpu.memory_space<vmem>>, vector<2x128xf32>,
    %c0_68 = arith.constant 0 : index
    %c0_69 = arith.constant 0 : index
    %276 = vector.load %arg7[%c0_68, %c0_69] : memref<2x128xf32, #tpu.memory_space<vmem>>, vector<2x128xf32>
    tpu.vector_store %arg7[%c0_68, %c0_69], %268 {strides = array<i32>} : memref<2x128xf32, #tpu.memory_space<vmem>>, vector<2x128xf32>,
    %c0_70 = arith.constant 0 : index
    %c0_71 = arith.constant 0 : index
    %277 = vector.load %arg3[%c0_70, %c0_71] : memref<128x4xf32, #tpu.memory_space<vmem>>, vector<128x4xf32>
    %c0_72 = arith.constant 0 : index
    %c0_73 = arith.constant 0 : index
    %278 = vector.load %arg4[%c0_72, %c0_73] : memref<1x4xf32, #tpu.memory_space<vmem>>, vector<1x4xf32>
    %c0_74 = arith.constant 0 : index
    %c0_75 = arith.constant 0 : index
    %c0_76 = arith.constant 0 : index
    %279 = vector.load %arg8[%c0_74, %c0_75, %c0_76] : memref<8x2x128xf32, #tpu.memory_space<vmem>>, vector<1x2x128xf32>
    %280 = vector.shape_cast %279 : vector<1x2x128xf32> to vector<2x128xf32>
    %cst_77 = arith.constant dense<0.000000e+00> : vector<2x4xf32>
    %281 = tpu.matmul %280, %277, %cst_77 {dimension_numbers = #tpu.dot_dimension_numbers<[1], [0], [0], [1], [0, 0, 1, 1], [], []>} : vector<2x128xf32>, vector<128x4xf32>, vector<2x4xf32> -> vector<2x4xf32>
    %282 = vector.broadcast %278 : vector<1x4xf32> to vector<2x4xf32>
    %283 = arith.addf %281, %282 : vector<2x4xf32>
    %c0_78 = arith.constant 0 : index
    %c0_79 = arith.constant 0 : index
    %c0_80 = arith.constant 0 : index
    %284 = vector.load %arg5[%c0_78, %c0_79, %c0_80] : memref<8x2x4xf32, #tpu.memory_space<vmem>>, vector<1x2x4xf32>
    %285 = vector.shape_cast %284 : vector<1x2x4xf32> to vector<2x4xf32>
    %286 = vector.shape_cast %283 : vector<2x4xf32> to vector<1x2x4xf32>
    tpu.vector_store %arg5[%c0_78, %c0_79, %c0_80], %286 {strides = array<i32>} : memref<8x2x4xf32, #tpu.memory_space<vmem>>, vector<1x2x4xf32>,
    %c1 = arith.constant 1 : index
    %c0_81 = arith.constant 0 : index
    %c0_82 = arith.constant 0 : index
    %287 = vector.load %arg8[%c1, %c0_81, %c0_82] : memref<8x2x128xf32, #tpu.memory_space<vmem>>, vector<1x2x128xf32>
    %288 = vector.shape_cast %287 : vector<1x2x128xf32> to vector<2x128xf32>
    %cst_83 = arith.constant dense<0.000000e+00> : vector<2x4xf32>
    %289 = tpu.matmul %288, %277, %cst_83 {dimension_numbers = #tpu.dot_dimension_numbers<[1], [0], [0], [1], [0, 0, 1, 1], [], []>} : vector<2x128xf32>, vector<128x4xf32>, vector<2x4xf32> -> vector<2x4xf32>
    %290 = vector.broadcast %278 : vector<1x4xf32> to vector<2x4xf32>
    %291 = arith.addf %289, %290 : vector<2x4xf32>
    %c1_84 = arith.constant 1 : index
    %c0_85 = arith.constant 0 : index
    %c0_86 = arith.constant 0 : index
    %292 = vector.load %arg5[%c1_84, %c0_85, %c0_86] : memref<8x2x4xf32, #tpu.memory_space<vmem>>, vector<1x2x4xf32>
    %293 = vector.shape_cast %292 : vector<1x2x4xf32> to vector<2x4xf32>
    %294 = vector.shape_cast %291 : vector<2x4xf32> to vector<1x2x4xf32>
    tpu.vector_store %arg5[%c1_84, %c0_85, %c0_86], %294 {strides = array<i32>} : memref<8x2x4xf32, #tpu.memory_space<vmem>>, vector<1x2x4xf32>,
    %c2 = arith.constant 2 : index
    %c0_87 = arith.constant 0 : index
    %c0_88 = arith.constant 0 : index
    %295 = vector.load %arg8[%c2, %c0_87, %c0_88] : memref<8x2x128xf32, #tpu.memory_space<vmem>>, vector<1x2x128xf32>
    %296 = vector.shape_cast %295 : vector<1x2x128xf32> to vector<2x128xf32>
    %cst_89 = arith.constant dense<0.000000e+00> : vector<2x4xf32>
    %297 = tpu.matmul %296, %277, %cst_89 {dimension_numbers = #tpu.dot_dimension_numbers<[1], [0], [0], [1], [0, 0, 1, 1], [], []>} : vector<2x128xf32>, vector<128x4xf32>, vector<2x4xf32> -> vector<2x4xf32>
    %298 = vector.broadcast %278 : vector<1x4xf32> to vector<2x4xf32>
    %299 = arith.addf %297, %298 : vector<2x4xf32>
    %c2_90 = arith.constant 2 : index
    %c0_91 = arith.constant 0 : index
    %c0_92 = arith.constant 0 : index
    %300 = vector.load %arg5[%c2_90, %c0_91, %c0_92] : memref<8x2x4xf32, #tpu.memory_space<vmem>>, vector<1x2x4xf32>
    %301 = vector.shape_cast %300 : vector<1x2x4xf32> to vector<2x4xf32>
    %302 = vector.shape_cast %299 : vector<2x4xf32> to vector<1x2x4xf32>
    tpu.vector_store %arg5[%c2_90, %c0_91, %c0_92], %302 {strides = array<i32>} : memref<8x2x4xf32, #tpu.memory_space<vmem>>, vector<1x2x4xf32>,
    %c3 = arith.constant 3 : index
    %c0_93 = arith.constant 0 : index
    %c0_94 = arith.constant 0 : index
    %303 = vector.load %arg8[%c3, %c0_93, %c0_94] : memref<8x2x128xf32, #tpu.memory_space<vmem>>, vector<1x2x128xf32>
    %304 = vector.shape_cast %303 : vector<1x2x128xf32> to vector<2x128xf32>
    %cst_95 = arith.constant dense<0.000000e+00> : vector<2x4xf32>
    %305 = tpu.matmul %304, %277, %cst_95 {dimension_numbers = #tpu.dot_dimension_numbers<[1], [0], [0], [1], [0, 0, 1, 1], [], []>} : vector<2x128xf32>, vector<128x4xf32>, vector<2x4xf32> -> vector<2x4xf32>
    %306 = vector.broadcast %278 : vector<1x4xf32> to vector<2x4xf32>
    %307 = arith.addf %305, %306 : vector<2x4xf32>
    %c3_96 = arith.constant 3 : index
    %c0_97 = arith.constant 0 : index
    %c0_98 = arith.constant 0 : index
    %308 = vector.load %arg5[%c3_96, %c0_97, %c0_98] : memref<8x2x4xf32, #tpu.memory_space<vmem>>, vector<1x2x4xf32>
    %309 = vector.shape_cast %308 : vector<1x2x4xf32> to vector<2x4xf32>
    %310 = vector.shape_cast %307 : vector<2x4xf32> to vector<1x2x4xf32>
    tpu.vector_store %arg5[%c3_96, %c0_97, %c0_98], %310 {strides = array<i32>} : memref<8x2x4xf32, #tpu.memory_space<vmem>>, vector<1x2x4xf32>,
    %c4 = arith.constant 4 : index
    %c0_99 = arith.constant 0 : index
    %c0_100 = arith.constant 0 : index
    %311 = vector.load %arg8[%c4, %c0_99, %c0_100] : memref<8x2x128xf32, #tpu.memory_space<vmem>>, vector<1x2x128xf32>
    %312 = vector.shape_cast %311 : vector<1x2x128xf32> to vector<2x128xf32>
    %cst_101 = arith.constant dense<0.000000e+00> : vector<2x4xf32>
    %313 = tpu.matmul %312, %277, %cst_101 {dimension_numbers = #tpu.dot_dimension_numbers<[1], [0], [0], [1], [0, 0, 1, 1], [], []>} : vector<2x128xf32>, vector<128x4xf32>, vector<2x4xf32> -> vector<2x4xf32>
    %314 = vector.broadcast %278 : vector<1x4xf32> to vector<2x4xf32>
    %315 = arith.addf %313, %314 : vector<2x4xf32>
    %c4_102 = arith.constant 4 : index
    %c0_103 = arith.constant 0 : index
    %c0_104 = arith.constant 0 : index
    %316 = vector.load %arg5[%c4_102, %c0_103, %c0_104] : memref<8x2x4xf32, #tpu.memory_space<vmem>>, vector<1x2x4xf32>
    %317 = vector.shape_cast %316 : vector<1x2x4xf32> to vector<2x4xf32>
    %318 = vector.shape_cast %315 : vector<2x4xf32> to vector<1x2x4xf32>
    tpu.vector_store %arg5[%c4_102, %c0_103, %c0_104], %318 {strides = array<i32>} : memref<8x2x4xf32, #tpu.memory_space<vmem>>, vector<1x2x4xf32>,
    %c5 = arith.constant 5 : index
    %c0_105 = arith.constant 0 : index
    %c0_106 = arith.constant 0 : index
    %319 = vector.load %arg8[%c5, %c0_105, %c0_106] : memref<8x2x128xf32, #tpu.memory_space<vmem>>, vector<1x2x128xf32>
    %320 = vector.shape_cast %319 : vector<1x2x128xf32> to vector<2x128xf32>
    %cst_107 = arith.constant dense<0.000000e+00> : vector<2x4xf32>
    %321 = tpu.matmul %320, %277, %cst_107 {dimension_numbers = #tpu.dot_dimension_numbers<[1], [0], [0], [1], [0, 0, 1, 1], [], []>} : vector<2x128xf32>, vector<128x4xf32>, vector<2x4xf32> -> vector<2x4xf32>
    %322 = vector.broadcast %278 : vector<1x4xf32> to vector<2x4xf32>
    %323 = arith.addf %321, %322 : vector<2x4xf32>
    %c5_108 = arith.constant 5 : index
    %c0_109 = arith.constant 0 : index
    %c0_110 = arith.constant 0 : index
    %324 = vector.load %arg5[%c5_108, %c0_109, %c0_110] : memref<8x2x4xf32, #tpu.memory_space<vmem>>, vector<1x2x4xf32>
    %325 = vector.shape_cast %324 : vector<1x2x4xf32> to vector<2x4xf32>
    %326 = vector.shape_cast %323 : vector<2x4xf32> to vector<1x2x4xf32>
    tpu.vector_store %arg5[%c5_108, %c0_109, %c0_110], %326 {strides = array<i32>} : memref<8x2x4xf32, #tpu.memory_space<vmem>>, vector<1x2x4xf32>,
    %c6 = arith.constant 6 : index
    %c0_111 = arith.constant 0 : index
    %c0_112 = arith.constant 0 : index
    %327 = vector.load %arg8[%c6, %c0_111, %c0_112] : memref<8x2x128xf32, #tpu.memory_space<vmem>>, vector<1x2x128xf32>
    %328 = vector.shape_cast %327 : vector<1x2x128xf32> to vector<2x128xf32>
    %cst_113 = arith.constant dense<0.000000e+00> : vector<2x4xf32>
    %329 = tpu.matmul %328, %277, %cst_113 {dimension_numbers = #tpu.dot_dimension_numbers<[1], [0], [0], [1], [0, 0, 1, 1], [], []>} : vector<2x128xf32>, vector<128x4xf32>, vector<2x4xf32> -> vector<2x4xf32>
    %330 = vector.broadcast %278 : vector<1x4xf32> to vector<2x4xf32>
    %331 = arith.addf %329, %330 : vector<2x4xf32>
    %c6_114 = arith.constant 6 : index
    %c0_115 = arith.constant 0 : index
    %c0_116 = arith.constant 0 : index
    %332 = vector.load %arg5[%c6_114, %c0_115, %c0_116] : memref<8x2x4xf32, #tpu.memory_space<vmem>>, vector<1x2x4xf32>
    %333 = vector.shape_cast %332 : vector<1x2x4xf32> to vector<2x4xf32>
    %334 = vector.shape_cast %331 : vector<2x4xf32> to vector<1x2x4xf32>
    tpu.vector_store %arg5[%c6_114, %c0_115, %c0_116], %334 {strides = array<i32>} : memref<8x2x4xf32, #tpu.memory_space<vmem>>, vector<1x2x4xf32>,
    %c7 = arith.constant 7 : index
    %c0_117 = arith.constant 0 : index
    %c0_118 = arith.constant 0 : index
    %335 = vector.load %arg8[%c7, %c0_117, %c0_118] : memref<8x2x128xf32, #tpu.memory_space<vmem>>, vector<1x2x128xf32>
    %336 = vector.shape_cast %335 : vector<1x2x128xf32> to vector<2x128xf32>
    %cst_119 = arith.constant dense<0.000000e+00> : vector<2x4xf32>
    %337 = tpu.matmul %336, %277, %cst_119 {dimension_numbers = #tpu.dot_dimension_numbers<[1], [0], [0], [1], [0, 0, 1, 1], [], []>} : vector<2x128xf32>, vector<128x4xf32>, vector<2x4xf32> -> vector<2x4xf32>
    %338 = vector.broadcast %278 : vector<1x4xf32> to vector<2x4xf32>
    %339 = arith.addf %337, %338 : vector<2x4xf32>
    %c7_120 = arith.constant 7 : index
    %c0_121 = arith.constant 0 : index
    %c0_122 = arith.constant 0 : index
    %340 = vector.load %arg5[%c7_120, %c0_121, %c0_122] : memref<8x2x4xf32, #tpu.memory_space<vmem>>, vector<1x2x4xf32>
    %341 = vector.shape_cast %340 : vector<1x2x4xf32> to vector<2x4xf32>
    %342 = vector.shape_cast %339 : vector<2x4xf32> to vector<1x2x4xf32>
    tpu.vector_store %arg5[%c7_120, %c0_121, %c0_122], %342 {strides = array<i32>} : memref<8x2x4xf32, #tpu.memory_space<vmem>>, vector<1x2x4xf32>,
    return
  }
  func.func @transform_0(%arg0: i32) -> (i32, i32, i32) {
    %c0_i32 = arith.constant 0 : i32
    %c0_i32_0 = arith.constant 0 : i32
    %c0_i32_1 = arith.constant 0 : i32
    %c0_i32_2 = arith.constant 0 : i32
    return %c0_i32, %c0_i32_0, %c0_i32_1 : i32, i32, i32
  }
  func.func @transform_1(%arg0: i32) -> (i32, i32) {
    %c0_i32 = arith.constant 0 : i32
    %c0_i32_0 = arith.constant 0 : i32
    %c0_i32_1 = arith.constant 0 : i32
    return %c0_i32, %c0_i32_0 : i32, i32
  }
  func.func @transform_2(%arg0: i32) -> (i32, i32) {
    %c0_i32 = arith.constant 0 : i32
    %c0_i32_0 = arith.constant 0 : i32
    %c0_i32_1 = arith.constant 0 : i32
    return %c0_i32, %c0_i32_0 : i32, i32
  }
  func.func @transform_3(%arg0: i32) -> (i32, i32) {
    %c0_i32 = arith.constant 0 : i32
    %c0_i32_0 = arith.constant 0 : i32
    %c0_i32_1 = arith.constant 0 : i32
    return %c0_i32, %c0_i32_0 : i32, i32
  }
  func.func @transform_4(%arg0: i32) -> (i32, i32, i32) {
    %c0_i32 = arith.constant 0 : i32
    %c0_i32_0 = arith.constant 0 : i32
    %c0_i32_1 = arith.constant 0 : i32
    %c0_i32_2 = arith.constant 0 : i32
    return %c0_i32, %c0_i32_0, %c0_i32_1 : i32, i32, i32
  }
  func.func @transform_5(%arg0: i32) -> (i32, i32) {
    %c0_i32 = arith.constant 0 : i32
    %c0_i32_0 = arith.constant 0 : i32
    %c0_i32_1 = arith.constant 0 : i32
    return %c0_i32, %c0_i32_0 : i32, i32
  }
  func.func @transform_6(%arg0: i32) -> (i32, i32) {
    %c0_i32 = arith.constant 0 : i32
    %c0_i32_0 = arith.constant 0 : i32
    %c0_i32_1 = arith.constant 0 : i32
    return %c0_i32, %c0_i32_0 : i32, i32
  }
}

</mosaic_0001>

<bundles_post_ra>
// kernel: clstm_forward.1
= control target key start
LH: loop header
LB: loop body
LE: loop exit
PB: predicated region body
PF: predicated region fallthrough
CT: control target
= control target key end

     0   :  { %v1863_v62 = vmov 0.0   ;;  %vm172_vm0 = vcmask 1041408   ;;  %vm174_vm1 = vcmask 1045508   ;;  %vm176_vm2 = vcmask 1043456   ;;  %s3392_s1 = inlined_call_operand.vmem [shape: f32[128,512], index: 1, kind: input, shape index: {}]   ;;  %s3393_s0 = inlined_call_operand.vmem [shape: f32[8,2,512], index: 0, kind: input, shape index: {}]   ;;  %s3394_s2 = inlined_call_operand.vmem [shape: f32[128,4], index: 2, kind: input, shape index: {}]   ;;  %s3395_s3 = inlined_call_operand.vmem [shape: f32[1,4], index: 3, kind: input, shape index: {}]   ;;  %s3396_s4 = inlined_call_operand.vmem [shape: f32[8,2,4], index: 4, kind: output, shape index: {0}]   ;;  %s3397_s6 = inlined_call_operand.vmem [shape: f32[2,128], index: 6, kind: output, shape index: {2}]   ;;  %s3398_s5 = inlined_call_operand.vmem [shape: f32[2,128], index: 5, kind: output, shape index: {1}]  }
   0x1   :  { %v1902_v0 = vld [vmem:[%s3392_s1 + $0x1f0] sm:$0xff]  ;;  %v1907_v1 = vld [vmem:[%s3392_s1 + $0x1f8] sm:$0xff]  ;;  %v1934_v6 = vld [vmem:[%s3392_s1 + $0x1e8] sm:$0xff] }
   0x2   :  { %v1912_v2 = vld [vmem:[%s3392_s1 + $0x1d0] sm:$0xff]  ;;  %125 = vmatpush.msra.mxu2 %v1902_v0  ;;  %145 = vmatpush.msra.mxu3 %v1907_v1  ;;  %v1919_v3 = vld [vmem:[%s3392_s1 + $0x1d8] sm:$0xff]  ;;  %v1941_v7 = vld [vmem:[%s3392_s1 + $0x1e0] sm:$0xff] }
   0x3   :  { %v1924_v4 = vld [vmem:[%s3392_s1 + $0x1b0] sm:$0xff]  ;;  %v1929_v5 = vld [vmem:[%s3392_s1 + $0x1b8] sm:$0xff]  ;;  %v1946_v8 = vld [vmem:[%s3392_s1 + $0x1c8] sm:$0xff]  ;;  %105 = vmatpush.msra.mxu1 %v1934_v6  ;;  %85 = vmatpush.msra.mxu0 %v1941_v7 }
   0x4   :  { %126 = vmatpush.msra.mxu2 %v1912_v2  ;;  %146 = vmatpush.msra.mxu3 %v1919_v3  ;;  %v1952_v9 = vld [vmem:[%s3392_s1 + $0x190] sm:$0xff]  ;;  %v1957_v10 = vld [vmem:[%s3392_s1 + $0x198] sm:$0xff]  ;;  %v1963_v11 = vld [vmem:[%s3392_s1 + $0x1c0] sm:$0xff] }
   0x5   :  { %v1970_v12 = vld [vmem:[%s3392_s1 + $0x1a8] sm:$0xff]  ;;  %v1975_v13 = vld [vmem:[%s3392_s1 + $0x1a0] sm:$0xff]  ;;  %106 = vmatpush.msra.mxu1 %v1946_v8  ;;  %v1981_v14 = vld [vmem:[%s3392_s1 + $0x170] sm:$0xff]  ;;  %86 = vmatpush.msra.mxu0 %v1963_v11 }
   0x6   :  { %127 = vmatpush.msra.mxu2 %v1924_v4  ;;  %147 = vmatpush.msra.mxu3 %v1929_v5  ;;  %v1986_v15 = vld [vmem:[%s3392_s1 + $0x178] sm:$0xff]  ;;  %v1994_v16 = vld [vmem:[%s3392_s1 + $0x188] sm:$0xff]  ;;  %v1999_v17 = vld [vmem:[%s3392_s1 + $0x180] sm:$0xff] }
   0x7   :  { %107 = vmatpush.msra.mxu1 %v1970_v12  ;;  %v2005_v18 = vld [vmem:[%s3392_s1 + $0x150] sm:$0xff]  ;;  %v2010_v19 = vld [vmem:[%s3392_s1 + $0x158] sm:$0xff]  ;;  %87 = vmatpush.msra.mxu0 %v1975_v13  ;;  %v2018_v20 = vld [vmem:[%s3392_s1 + $0x168] sm:$0xff] }
   0x8   :  { %128 = vmatpush.msra.mxu2 %v1952_v9  ;;  %148 = vmatpush.msra.mxu3 %v1957_v10  ;;  %v2023_v21 = vld [vmem:[%s3392_s1 + $0x160] sm:$0xff]  ;;  %v2029_v22 = vld [vmem:[%s3392_s1 + $0x130] sm:$0xff]  ;;  %v2034_v23 = vld [vmem:[%s3392_s1 + $0x138] sm:$0xff] }
   0x9   :  { %108 = vmatpush.msra.mxu1 %v1994_v16  ;;  %88 = vmatpush.msra.mxu0 %v1999_v17  ;;  %v2042_v24 = vld [vmem:[%s3392_s1 + $0x148] sm:$0xff]  ;;  %v2047_v25 = vld [vmem:[%s3392_s1 + $0x140] sm:$0xff]  ;;  %v2053_v26 = vld [vmem:[%s3392_s1 + $0x110] sm:$0xff] }
   0xa   :  { %129 = vmatpush.msra.mxu2 %v1981_v14  ;;  %149 = vmatpush.msra.mxu3 %v1986_v15  ;;  %v2058_v27 = vld [vmem:[%s3392_s1 + $0x118] sm:$0xff]  ;;  %v2066_v28 = vld [vmem:[%s3392_s1 + $0x128] sm:$0xff]  ;;  %v2071_v29 = vld [vmem:[%s3392_s1 + $0x120] sm:$0xff] }
   0xb   :  { %109 = vmatpush.msra.mxu1 %v2018_v20  ;;  %89 = vmatpush.msra.mxu0 %v2023_v21  ;;  %v2077_v30 = vld [vmem:[%s3392_s1 + $0xf0] sm:$0xff]  ;;  %v2082_v31 = vld [vmem:[%s3392_s1 + $0xf8] sm:$0xff]  ;;  %v2090_v32 = vld [vmem:[%s3392_s1 + $0x108] sm:$0xff] }
   0xc   :  { %130 = vmatpush.msra.mxu2 %v2005_v18  ;;  %150 = vmatpush.msra.mxu3 %v2010_v19  ;;  %v2095_v33 = vld [vmem:[%s3392_s1 + $0x100] sm:$0xff]  ;;  %v2101_v34 = vld [vmem:[%s3392_s1 + $0xd0] sm:$0xff]  ;;  %v2106_v35 = vld [vmem:[%s3392_s1 + $0xd8] sm:$0xff] }
   0xd   :  { %110 = vmatpush.msra.mxu1 %v2042_v24  ;;  %90 = vmatpush.msra.mxu0 %v2047_v25  ;;  %3507 = vst [vmem:[#allocation3_spill] sm:$0xff] %v2101_v34  ;;  %v2114_v36 = vld [vmem:[%s3392_s1 + $0xe8] sm:$0xff]  ;;  %v2119_v37 = vld [vmem:[%s3392_s1 + $0xe0] sm:$0xff]  ;;  %v2125_v38 = vld [vmem:[%s3392_s1 + $0xb0] sm:$0xff] }
   0xe   :  { %131 = vmatpush.msra.mxu2 %v2029_v22  ;;  %151 = vmatpush.msra.mxu3 %v2034_v23  ;;  %3508 = vst [vmem:[#allocation4_spill] sm:$0xff] %v2106_v35  ;;  %v2130_v39 = vld [vmem:[%s3392_s1 + $0xb8] sm:$0xff]  ;;  %v2138_v40 = vld [vmem:[%s3392_s1 + $0xc8] sm:$0xff]  ;;  %v2143_v41 = vld [vmem:[%s3392_s1 + $0xc0] sm:$0xff] }
   0xf   :  { %111 = vmatpush.msra.mxu1 %v2066_v28  ;;  %91 = vmatpush.msra.mxu0 %v2071_v29  ;;  %3509 = vst [vmem:[#allocation5_spill] sm:$0xff] %v2125_v38  ;;  %v2149_v42 = vld [vmem:[%s3392_s1 + $0x90] sm:$0xff]  ;;  %v2154_v43 = vld [vmem:[%s3392_s1 + $0x98] sm:$0xff]  ;;  %v2162_v44 = vld [vmem:[%s3392_s1 + $0xa8] sm:$0xff] }
  0x10   :  { %132 = vmatpush.msra.mxu2 %v2053_v26  ;;  %152 = vmatpush.msra.mxu3 %v2058_v27  ;;  %3510 = vst [vmem:[#allocation6_spill] sm:$0xff] %v2130_v39  ;;  %v2167_v45 = vld [vmem:[%s3392_s1 + $0xa0] sm:$0xff]  ;;  %v2173_v46 = vld [vmem:[%s3392_s1 + $0x70] sm:$0xff]  ;;  %v2178_v47 = vld [vmem:[%s3392_s1 + $0x78] sm:$0xff] }
  0x11   :  { %112 = vmatpush.msra.mxu1 %v2090_v32  ;;  %92 = vmatpush.msra.mxu0 %v2095_v33  ;;  %3511 = vst [vmem:[#allocation7_spill] sm:$0xff] %v2138_v40  ;;  %v2186_v48 = vld [vmem:[%s3392_s1 + $0x88] sm:$0xff]  ;;  %v2191_v49 = vld [vmem:[%s3392_s1 + $0x80] sm:$0xff]  ;;  %v2197_v50 = vld [vmem:[%s3392_s1 + $0x50] sm:$0xff] }
  0x12   :  { %133 = vmatpush.msra.mxu2 %v2077_v30  ;;  %153 = vmatpush.msra.mxu3 %v2082_v31  ;;  %3512 = vst [vmem:[#allocation8_spill] sm:$0xff] %v2149_v42  ;;  %v2202_v51 = vld [vmem:[%s3392_s1 + $0x58] sm:$0xff]  ;;  %v2210_v52 = vld [vmem:[%s3392_s1 + $0x68] sm:$0xff]  ;;  %v2215_v53 = vld [vmem:[%s3392_s1 + $0x60] sm:$0xff] }
  0x13   :  { %113 = vmatpush.msra.mxu1 %v2114_v36  ;;  %3513 = vst [vmem:[#allocation9_spill] sm:$0xff] %v2154_v43  ;;  %93 = vmatpush.msra.mxu0 %v2119_v37  ;;  %v2221_v54 = vld [vmem:[%s3392_s1 + $0x30] sm:$0xff]  ;;  %v2226_v55 = vld [vmem:[%s3392_s1 + $0x38] sm:$0xff]  ;;  %v2234_v56 = vld [vmem:[%s3392_s1 + $0x48] sm:$0xff] }
  0x14   :  { %134 = vmatpush.msra.mxu2 %v2101_v34  ;;  %154 = vmatpush.msra.mxu3 %v2106_v35  ;;  %3514 = vst [vmem:[#allocation10_spill] sm:$0xff] %v2162_v44  ;;  %v2239_v57 = vld [vmem:[%s3392_s1 + $0x40] sm:$0xff]  ;;  %v2245_v58 = vld [vmem:[%s3392_s1 + $0x10] sm:$0xff]  ;;  %v2250_v59 = vld [vmem:[%s3392_s1 + $0x18] sm:$0xff] }
  0x15   :  { %3515 = vst [vmem:[#allocation11_spill] sm:$0xff] %v2167_v45  ;;  %114 = vmatpush.msra.mxu1 %v2138_v40  ;;  %94 = vmatpush.msra.mxu0 %v2143_v41  ;;  %v2260_v60 = vld [vmem:[%s3392_s1 + $0x28] sm:$0xff]  ;;  %v2265_v61 = vld [vmem:[%s3392_s1 + $0x20] sm:$0xff] }
  0x16   :  { %135 = vmatpush.msra.mxu2 %v2125_v38  ;;  %155 = vmatpush.msra.mxu3 %v2130_v39  ;;  %3516 = vst [vmem:[#allocation12_spill] sm:$0xff] %v2173_v46  ;;  %v2272_v63 = vld [vmem:[%s3392_s1 + $0x8] sm:$0xff] }
  0x17   :  { %3517 = vst [vmem:[#allocation13_spill] sm:$0xff] %v2178_v47  ;;  %115 = vmatpush.msra.mxu1 %v2162_v44  ;;  %95 = vmatpush.msra.mxu0 %v2167_v45 }
  0x18   :  { %136 = vmatpush.msra.mxu2 %v2149_v42  ;;  %156 = vmatpush.msra.mxu3 %v2154_v43  ;;  %3518 = vst [vmem:[#allocation14_spill] sm:$0xff] %v2186_v48 }
  0x19   :  { %3519 = vst [vmem:[#allocation15_spill] sm:$0xff] %v2191_v49  ;;  %116 = vmatpush.msra.mxu1 %v2186_v48  ;;  %96 = vmatpush.msra.mxu0 %v2191_v49 }
  0x1a   :  { %3520 = vst [vmem:[#allocation16_spill] sm:$0xff] %v2197_v50  ;;  %137 = vmatpush.msra.mxu2 %v2173_v46  ;;  %157 = vmatpush.msra.mxu3 %v2178_v47 }
  0x1b   :  { %3521 = vst [vmem:[#allocation17_spill] sm:$0xff] %v2202_v51  ;;  %117 = vmatpush.msra.mxu1 %v2210_v52  ;;  %97 = vmatpush.msra.mxu0 %v2215_v53 }
  0x1c   :  { %3522 = vst [vmem:[#allocation18_spill] sm:$0xff] %v2210_v52  ;;  %138 = vmatpush.msra.mxu2 %v2197_v50  ;;  %158 = vmatpush.msra.mxu3 %v2202_v51 }
  0x1d   :  { %3523 = vst [vmem:[#allocation19_spill] sm:$0xff] %v2215_v53  ;;  %118 = vmatpush.msra.mxu1 %v2234_v56  ;;  %98 = vmatpush.msra.mxu0 %v2239_v57 }
  0x1e   :  { %3524 = vst [vmem:[#allocation20_spill] sm:$0xff] %v2221_v54  ;;  %139 = vmatpush.msra.mxu2 %v2221_v54  ;;  %159 = vmatpush.msra.mxu3 %v2226_v55 }
  0x1f   :  { %3525 = vst [vmem:[#allocation21_spill] sm:$0xff] %v2226_v55  ;;  %v2277_v55 = vld [vmem:[%s3392_s1] sm:$0xff]  ;;  %119 = vmatpush.msra.mxu1 %v2260_v60  ;;  %99 = vmatpush.msra.mxu0 %v2265_v61 }
  0x20   :  { %3526 = vst [vmem:[#allocation22_spill] sm:$0xff] %v2234_v56  ;;  %140 = vmatpush.msra.mxu2 %v2245_v58  ;;  %160 = vmatpush.msra.mxu3 %v2250_v59 }
  0x21   :  { %3527 = vst [vmem:[#allocation23_spill] sm:$0xff] %v2239_v57  ;;  %141 = vmatmul.f32.vlgmr.msra.gmra.mxu2 %v1863_v62  ;;  %161 = vmatmul.f32.vlgmr.msra.gmra.mxu3 %v1863_v62 }
  0x22   :  { %3528 = vst [vmem:[#allocation24_spill] sm:$0xff] %v2245_v58  ;;  %293 = vmatpush.msrb.mxu2 %v1902_v0  ;;  %313 = vmatpush.msrb.mxu3 %v1907_v1 }
  0x23   :  { %3529 = vst [vmem:[#allocation25_spill] sm:$0xff] %v2250_v59  ;;  %120 = vmatpush.msra.mxu1 %v2272_v63  ;;  %100 = vmatpush.msra.mxu0 %v2277_v55 }
  0x24   :  { %3530 = vst [vmem:[#allocation26_spill] sm:$0xff] %v2260_v60  ;;  %121 = vmatmul.f32.vlgmr.msra.gmra.mxu1 %v1863_v62  ;;  %101 = vmatmul.f32.vlgmr.msra.gmra.mxu0 %v1863_v62 }
  0x25   :  { %3531 = vst [vmem:[#allocation27_spill] sm:$0xff] %v2265_v61  ;;  %253 = vmatpush.msrb.mxu0 %v1941_v7  ;;  %273 = vmatpush.msrb.mxu1 %v1934_v6 }
  0x26   :  { %3532 = vst [vmem:[#allocation28_spill] sm:$0xff] %v2272_v63  ;;  %294 = vmatpush.msrb.mxu2 %v1912_v2  ;;  %314 = vmatpush.msrb.mxu3 %v1919_v3  ;;  %v3534_v62 = vld [vmem:[#allocation21_spill] sm:$0xff] }
  0x27   :  { %3533 = vst [vmem:[#allocation29_spill] sm:$0xff] %v2277_v55  ;;  %254 = vmatpush.msrb.mxu0 %v1963_v11  ;;  %274 = vmatpush.msrb.mxu1 %v1946_v8 }
  0x28   :  { %295 = vmatpush.msrb.mxu2 %v1924_v4  ;;  %315 = vmatpush.msrb.mxu3 %v1929_v5 }
  0x29   :  { %255 = vmatpush.msrb.mxu0 %v1975_v13  ;;  %275 = vmatpush.msrb.mxu1 %v1970_v12 }
  0x2a   :  { %296 = vmatpush.msrb.mxu2 %v1952_v9  ;;  %316 = vmatpush.msrb.mxu3 %v1957_v10 }
  0x2b   :  { %256 = vmatpush.msrb.mxu0 %v1999_v17  ;;  %276 = vmatpush.msrb.mxu1 %v1994_v16 }
  0x2c   :  { %297 = vmatpush.msrb.mxu2 %v1981_v14  ;;  %317 = vmatpush.msrb.mxu3 %v1986_v15 }
  0x2d   :  { %257 = vmatpush.msrb.mxu0 %v2023_v21  ;;  %277 = vmatpush.msrb.mxu1 %v2018_v20 }
  0x2e   :  { %298 = vmatpush.msrb.mxu2 %v2005_v18  ;;  %318 = vmatpush.msrb.mxu3 %v2010_v19 }
  0x2f   :  { %258 = vmatpush.msrb.mxu0 %v2047_v25  ;;  %278 = vmatpush.msrb.mxu1 %v2042_v24 }
  0x30   :  { %299 = vmatpush.msrb.mxu2 %v2029_v22  ;;  %319 = vmatpush.msrb.mxu3 %v2034_v23 }
  0x31   :  { %259 = vmatpush.msrb.mxu0 %v2071_v29  ;;  %279 = vmatpush.msrb.mxu1 %v2066_v28 }
  0x32   :  { %300 = vmatpush.msrb.mxu2 %v2053_v26  ;;  %320 = vmatpush.msrb.mxu3 %v2058_v27 }
  0x33   :  { %260 = vmatpush.msrb.mxu0 %v2095_v33  ;;  %280 = vmatpush.msrb.mxu1 %v2090_v32 }
  0x34   :  { %301 = vmatpush.msrb.mxu2 %v2077_v30  ;;  %321 = vmatpush.msrb.mxu3 %v2082_v31 }
  0x35   :  { %261 = vmatpush.msrb.mxu0 %v2119_v37  ;;  %281 = vmatpush.msrb.mxu1 %v2114_v36 }
  0x36   :  { %302 = vmatpush.msrb.mxu2 %v2101_v34  ;;  %322 = vmatpush.msrb.mxu3 %v2106_v35 }
  0x37   :  { %262 = vmatpush.msrb.mxu0 %v2143_v41  ;;  %282 = vmatpush.msrb.mxu1 %v2138_v40 }
  0x38   :  { %303 = vmatpush.msrb.mxu2 %v2125_v38  ;;  %323 = vmatpush.msrb.mxu3 %v2130_v39 }
  0x39   :  { %263 = vmatpush.msrb.mxu0 %v2167_v45  ;;  %283 = vmatpush.msrb.mxu1 %v2162_v44 }
  0x3a   :  { %304 = vmatpush.msrb.mxu2 %v2149_v42  ;;  %324 = vmatpush.msrb.mxu3 %v2154_v43 }
  0x3b   :  { %264 = vmatpush.msrb.mxu0 %v2191_v49  ;;  %284 = vmatpush.msrb.mxu1 %v2186_v48 }
  0x3c   :  { %305 = vmatpush.msrb.mxu2 %v2173_v46  ;;  %325 = vmatpush.msrb.mxu3 %v2178_v47 }
  0x3d   :  { %265 = vmatpush.msrb.mxu0 %v2215_v53  ;;  %285 = vmatpush.msrb.mxu1 %v2210_v52 }
  0x3e   :  { %306 = vmatpush.msrb.mxu2 %v2197_v50  ;;  %326 = vmatpush.msrb.mxu3 %v2202_v51 }
  0x3f   :  { %266 = vmatpush.msrb.mxu0 %v2239_v57  ;;  %286 = vmatpush.msrb.mxu1 %v2234_v56 }
  0x40   :  { %307 = vmatpush.msrb.mxu2 %v2221_v54  ;;  %327 = vmatpush.msrb.mxu3 %v3534_v62 }
  0x41   :  { %267 = vmatpush.msrb.mxu0 %v2265_v61  ;;  %287 = vmatpush.msrb.mxu1 %v2260_v60 }
  0x42   :  { %308 = vmatpush.msrb.mxu2 %v2245_v58  ;;  %328 = vmatpush.msrb.mxu3 %v2250_v59 }
  0x43   :  { %268 = vmatpush.msrb.mxu0 %v2277_v55  ;;  %288 = vmatpush.msrb.mxu1 %v2272_v63 }
  0x44   :  { %459 = vmatpush.msra.mxu2 %v1902_v0  ;;  %479 = vmatpush.msra.mxu3 %v1907_v1 }
  0x45   :  { %419 = vmatpush.msra.mxu0 %v1941_v7  ;;  %439 = vmatpush.msra.mxu1 %v1934_v6 }
  0x46   :  { %460 = vmatpush.msra.mxu2 %v1912_v2  ;;  %480 = vmatpush.msra.mxu3 %v1919_v3 }
  0x47   :  { %420 = vmatpush.msra.mxu0 %v1963_v11  ;;  %440 = vmatpush.msra.mxu1 %v1946_v8 }
  0x48   :  { %461 = vmatpush.msra.mxu2 %v1924_v4  ;;  %481 = vmatpush.msra.mxu3 %v1929_v5 }
  0x49   :  { %421 = vmatpush.msra.mxu0 %v1975_v13  ;;  %441 = vmatpush.msra.mxu1 %v1970_v12 }
  0x4a   :  { %462 = vmatpush.msra.mxu2 %v1952_v9  ;;  %482 = vmatpush.msra.mxu3 %v1957_v10 }
  0x4b   :  { %422 = vmatpush.msra.mxu0 %v1999_v17  ;;  %442 = vmatpush.msra.mxu1 %v1994_v16 }
  0x4c   :  { %463 = vmatpush.msra.mxu2 %v1981_v14  ;;  %483 = vmatpush.msra.mxu3 %v1986_v15 }
  0x4d   :  { %423 = vmatpush.msra.mxu0 %v2023_v21  ;;  %443 = vmatpush.msra.mxu1 %v2018_v20 }
  0x4e   :  { %464 = vmatpush.msra.mxu2 %v2005_v18  ;;  %484 = vmatpush.msra.mxu3 %v2010_v19 }
  0x4f   :  { %424 = vmatpush.msra.mxu0 %v2047_v25  ;;  %444 = vmatpush.msra.mxu1 %v2042_v24 }
  0x50   :  { %465 = vmatpush.msra.mxu2 %v2029_v22  ;;  %485 = vmatpush.msra.mxu3 %v2034_v23 }
  0x51   :  { %425 = vmatpush.msra.mxu0 %v2071_v29  ;;  %445 = vmatpush.msra.mxu1 %v2066_v28 }
  0x52   :  { %466 = vmatpush.msra.mxu2 %v2053_v26  ;;  %486 = vmatpush.msra.mxu3 %v2058_v27 }
  0x53   :  { %426 = vmatpush.msra.mxu0 %v2095_v33  ;;  %446 = vmatpush.msra.mxu1 %v2090_v32 }
  0x54   :  { %467 = vmatpush.msra.mxu2 %v2077_v30  ;;  %487 = vmatpush.msra.mxu3 %v2082_v31 }
  0x55   :  { %427 = vmatpush.msra.mxu0 %v2119_v37  ;;  %447 = vmatpush.msra.mxu1 %v2114_v36 }
  0x56   :  { %468 = vmatpush.msra.mxu2 %v2101_v34  ;;  %488 = vmatpush.msra.mxu3 %v2106_v35 }
  0x57   :  { %428 = vmatpush.msra.mxu0 %v2143_v41  ;;  %448 = vmatpush.msra.mxu1 %v2138_v40 }
  0x58   :  { %469 = vmatpush.msra.mxu2 %v2125_v38  ;;  %489 = vmatpush.msra.mxu3 %v2130_v39 }
  0x59   :  { %429 = vmatpush.msra.mxu0 %v2167_v45  ;;  %449 = vmatpush.msra.mxu1 %v2162_v44 }
  0x5a   :  { %470 = vmatpush.msra.mxu2 %v2149_v42  ;;  %490 = vmatpush.msra.mxu3 %v2154_v43 }
  0x5b   :  { %430 = vmatpush.msra.mxu0 %v2191_v49  ;;  %450 = vmatpush.msra.mxu1 %v2186_v48 }
  0x5c   :  { %471 = vmatpush.msra.mxu2 %v2173_v46  ;;  %491 = vmatpush.msra.mxu3 %v2178_v47 }
  0x5d   :  { %431 = vmatpush.msra.mxu0 %v2215_v53  ;;  %451 = vmatpush.msra.mxu1 %v2210_v52 }
  0x5e   :  { %472 = vmatpush.msra.mxu2 %v2197_v50  ;;  %492 = vmatpush.msra.mxu3 %v2202_v51 }
  0x5f   :  { %432 = vmatpush.msra.mxu0 %v2239_v57  ;;  %452 = vmatpush.msra.mxu1 %v2234_v56 }
  0x60   :  { %473 = vmatpush.msra.mxu2 %v2221_v54  ;;  %493 = vmatpush.msra.mxu3 %v3534_v62 }
  0x61   :  { %433 = vmatpush.msra.mxu0 %v2265_v61  ;;  %453 = vmatpush.msra.mxu1 %v2260_v60 }
  0x62   :  { %474 = vmatpush.msra.mxu2 %v2245_v58  ;;  %494 = vmatpush.msra.mxu3 %v2250_v59 }
  0x63   :  { %434 = vmatpush.msra.mxu0 %v2277_v55  ;;  %454 = vmatpush.msra.mxu1 %v2272_v63  ;;  %v84_v63 = vld [vmem:[%s3393_s0] sm:$0xff] }
  0xa1   :  { %v122_v56 = vpop.f32.mrf.mxu1  ;;  %v102_v50 = vpop.f32.mrf.mxu0 }
  0xa2   :  { %v169_v51 = vrot.slane %v122_v56, 6 }
  0xa4   :  { %v142_v57 = vpop.f32.mrf.mxu2  ;;  %v162_v61 = vpop.f32.mrf.mxu3  ;;  %v173_v54 = vsel %vm172_vm0, %v102_v50, %v169_v51 }
  0xa5   :  { %v170_v60 = vrot.slane %v142_v57, 4  ;;  %v171_v47 = vrot.slane %v162_v61, 2 }
  0xa7   :  { %v175_v58 = vsel %vm174_vm1, %v170_v60, %v171_v47 }
  0xa8   :  { %v177_v59 = vsel %vm176_vm2, %v173_v54, %v175_v58 }
  0xa9   :  { %v179_v55 = vadd.f32 %v177_v59, %v84_v63 }
  0xab   :  { %v1631_v62 = vmul.f32 -1.442695, %v179_v55  ;;  %v200_v46 = vrot.slane %v179_v55, 2  ;;  %v224_v56 = vrot.slane %v179_v55, 6  ;;  %v221_v60 = vrot.slane %v179_v55, 4 }
  0xad   :  { %1671 = vpow2.f32 %v1631_v62  ;;  %v1632_v52 = vmul.f32 -1.442695, %v200_v46  ;;  %v1633_v53 = vmul.f32 -1.442695, %v224_v56 }
  0xaf   :  { %1673 = vpow2.f32 %v1632_v52 }
  0xb0   :  { %1675 = vpow2.f32 %v1633_v53 }
  0xb3   :  { %v1672_v57 = vpop.eup %1671 }
  0xb4   :  { %v183_v50 = vadd.f32 1.0, %v1672_v57 }
  0xb5   :  { %v1674_v51 = vpop.eup %1673 }
  0xb6   :  { %v1676_v61 = vpop.eup %1675  ;;  %1677 = vrcp.f32 %v183_v50  ;;  %v205_v43 = vadd.f32 1.0, %v1674_v51  ;;  %v195_v52 = vand.u32 2147483648, %v183_v50  ;;  %v193_v56 = vand.u32 2147483647, %v183_v50 }
  0xb7   :  { %v229_v42 = vadd.f32 1.0, %v1676_v61  ;;  %vm189_vm4 = vweird.f32 %v183_v50 }
  0xb8   :  { %1679 = vrcp.f32 %v205_v43  ;;  %v217_v51 = vand.u32 2147483648, %v205_v43  ;;  %v215_v49 = vand.u32 2147483647, %v205_v43  ;;  %v196_v38 = vor.u32 1.1754944e-38, %v195_v52  ;;  %v3540_v52 = vld [vmem:[#allocation6_spill] sm:$0xff] }
  0xb9   :  { %1681 = vrcp.f32 %v229_v42  ;;  %vm194_vm7 = vcmp.eq.f32.partialorder %v193_v56, 8.507059e+37  ;;  %vm211_vm8 = vweird.f32 %v205_v43  ;;  %vm235_vm12 = vweird.f32 %v229_v42  ;;  %v3542_v56 = vld [vmem:[#allocation14_spill] sm:$0xff] }
  0xba   :  { %1683 = vtanh.f32 %v221_v60  ;;  %v218_v44 = vor.u32 1.1754944e-38, %v217_v51  ;;  %vm216_vm10 = vcmp.eq.f32.partialorder %v215_v49, 8.507059e+37  ;;  %v3543_v51 = vld [vmem:[#allocation8_spill] sm:$0xff] }
  0xbc   :  { %v1678_v47 = vpop.eup %1677 }
  0xbd   :  { %v185_v54 = vmul.f32 %v1678_v47, %v183_v50  ;;  %vm190_vm3 = vweird.f32 %v1678_v47 }
  0xbe   :  { %v1680_v58 = vpop.eup %1679  ;;  %vm191_vm5 = vmor %vm189_vm4, %vm190_vm3 }
  0xbf   :  { %v186_v59 = vsub.f32 1.0, %v185_v54  ;;  %v1682_v63 = vpop.eup %1681  ;;  %v207_v62 = vmul.f32 %v1680_v58, %v205_v43  ;;  %vm212_vm6 = vweird.f32 %v1680_v58  ;;  %v239_v43 = vand.u32 2147483647, %v229_v42 }
  0xc0   :  { %v231_v53 = vmul.f32 %v1682_v63, %v229_v42  ;;  %vm213_vm9 = vmor %vm211_vm8, %vm212_vm6  ;;  %vm236_vm11 = vweird.f32 %v1682_v63 }
  0xc1   :  { %v187_v46 = vmul.f32 %v1678_v47, %v186_v59  ;;  %v208_v57 = vsub.f32 1.0, %v207_v62  ;;  %v1684_v62 = vpop.eup %1683  ;;  %vm237_vm13 = vmor %vm235_vm12, %vm236_vm11  ;;  %vm240_vm14 = vcmp.eq.f32.partialorder %v239_v43, 8.507059e+37  ;;  %v3554_v43 = vld [vmem:[#allocation26_spill] sm:$0xff] }
  0xc2   :  { %v232_v54 = vsub.f32 1.0, %v231_v53  ;;  %v3541_v53 = vld [vmem:[#allocation15_spill] sm:$0xff] }
  0xc3   :  { %v188_v48 = vadd.f32 %v1678_v47, %v187_v46  ;;  %v209_v61 = vmul.f32 %v1680_v58, %v208_v57 }
  0xc4   :  { %v233_v50 = vmul.f32 %v1682_v63, %v232_v54  ;;  %v3545_v54 = vld [vmem:[#allocation19_spill] sm:$0xff] }
  0xc5   :  { %v192_v39 = vsel %vm191_vm5, %v1678_v47, %v188_v48  ;;  %v210_v55 = vadd.f32 %v1680_v58, %v209_v61  ;;  %v241_v48 = vand.u32 2147483648, %v229_v42  ;;  %v3536_v42 = vld [vmem:[#allocation4_spill] sm:$0xff]  ;;  %v3544_v61 = vld [vmem:[#allocation9_spill] sm:$0xff] }
  0xc6   :  { %v197_v59 = vsel %vm194_vm7, %v196_v38, %v192_v39  ;;  %v234_v57 = vadd.f32 %v1682_v63, %v233_v50  ;;  %v3550_v50 = vld [vmem:[#allocation22_spill] sm:$0xff] }
  0xc7   :  { %v214_v45 = vsel %vm213_vm9, %v1680_v58, %v210_v55  ;;  %v246_v60 = vmul.f32 %v1684_v62, %v197_v59  ;;  %v242_v39 = vor.u32 1.1754944e-38, %v241_v48  ;;  %v3546_v55 = vld [vmem:[#allocation18_spill] sm:$0xff]  ;;  %v3547_v59 = vld [vmem:[#allocation12_spill] sm:$0xff]  ;;  %v3548_v62 = vld [vmem:[#allocation13_spill] sm:$0xff] }
  0xc8   :  { %v219_v46 = vsel %vm216_vm10, %v218_v44, %v214_v45  ;;  %v238_v38 = vsel %vm237_vm13, %v1682_v63, %v234_v57  ;;  %v3537_v44 = vld [vmem:[#allocation11_spill] sm:$0xff]  ;;  %v3538_v45 = vld [vmem:[#allocation10_spill] sm:$0xff]  ;;  %v3539_v63 = vld [vmem:[#allocation5_spill] sm:$0xff] }
  0xc9   :  { %v245_v35 = vmul.f32 0.0, %v219_v46  ;;  %v243_v49 = vsel %vm240_vm14, %v242_v39, %v238_v38  ;;  %v3549_v46 = vld [vmem:[#allocation23_spill] sm:$0xff]  ;;  %v3552_v57 = vld [vmem:[#allocation17_spill] sm:$0xff]  ;;  %v3555_v38 = vld [vmem:[#allocation20_spill] sm:$0xff] }
  0xca   :  { %v3553_v48 = vld [vmem:[#allocation27_spill] sm:$0xff]  ;;  %v3556_v39 = vld [vmem:[#allocation21_spill] sm:$0xff] }
  0xcb   :  { %v2417_v34 = vadd.f32 %v246_v60, %v245_v35  ;;  %v3535_v35 = vld [vmem:[#allocation3_spill] sm:$0xff]  ;;  %v3551_v60 = vld [vmem:[#allocation16_spill] sm:$0xff] }
  0xcd   :  { %1685 = vtanh.f32 %v2417_v34 }
  0xd3   :  { %v1686_v47 = vpop.eup %1685 }
  0xd4   :  { %v249_v58 = vmul.f32 %v1686_v47, %v243_v49  ;;  %v3557_v47 = vld [vmem:[#allocation29_spill] sm:$0xff]  ;;  %v3558_v49 = vld [vmem:[#allocation28_spill] sm:$0xff] }
  0xd6   :  { %250 = vst [vmem:[#allocation2] sm:$0x3] %v249_v58  ;;  %269 = vmatmul.f32.vlgmr.msrb.gmra.mxu0 %v249_v58  ;;  %289 = vmatmul.f32.vlgmr.msrb.gmra.mxu1 %v249_v58 }
  0xd7   :  { %309 = vmatmul.f32.vlgmr.msrb.gmra.mxu2 %v249_v58  ;;  %329 = vmatmul.f32.vlgmr.msrb.gmra.mxu3 %v249_v58  ;;  %v3559_v58 = vld [vmem:[#allocation24_spill] sm:$0xff] }
  0xd8   :  { %585 = vmatpush.msrb.mxu0 %v1941_v7  ;;  %605 = vmatpush.msrb.mxu1 %v1934_v6 }
  0xd9   :  { %625 = vmatpush.msrb.mxu2 %v1902_v0  ;;  %645 = vmatpush.msrb.mxu3 %v1907_v1 }
  0xda   :  { %586 = vmatpush.msrb.mxu0 %v1963_v11  ;;  %606 = vmatpush.msrb.mxu1 %v1946_v8 }
  0xdb   :  { %626 = vmatpush.msrb.mxu2 %v1912_v2  ;;  %646 = vmatpush.msrb.mxu3 %v1919_v3 }
  0xdc   :  { %587 = vmatpush.msrb.mxu0 %v1975_v13  ;;  %607 = vmatpush.msrb.mxu1 %v1970_v12 }
  0xdd   :  { %627 = vmatpush.msrb.mxu2 %v1924_v4  ;;  %647 = vmatpush.msrb.mxu3 %v1929_v5 }
  0xde   :  { %588 = vmatpush.msrb.mxu0 %v1999_v17  ;;  %608 = vmatpush.msrb.mxu1 %v1994_v16 }
  0xdf   :  { %628 = vmatpush.msrb.mxu2 %v1952_v9  ;;  %648 = vmatpush.msrb.mxu3 %v1957_v10 }
  0xe0   :  { %589 = vmatpush.msrb.mxu0 %v2023_v21  ;;  %609 = vmatpush.msrb.mxu1 %v2018_v20 }
  0xe1   :  { %629 = vmatpush.msrb.mxu2 %v1981_v14  ;;  %649 = vmatpush.msrb.mxu3 %v1986_v15 }
  0xe2   :  { %590 = vmatpush.msrb.mxu0 %v2047_v25  ;;  %610 = vmatpush.msrb.mxu1 %v2042_v24 }
  0xe3   :  { %630 = vmatpush.msrb.mxu2 %v2005_v18  ;;  %650 = vmatpush.msrb.mxu3 %v2010_v19 }
  0xe4   :  { %591 = vmatpush.msrb.mxu0 %v2071_v29  ;;  %611 = vmatpush.msrb.mxu1 %v2066_v28 }
  0xe5   :  { %631 = vmatpush.msrb.mxu2 %v2029_v22  ;;  %651 = vmatpush.msrb.mxu3 %v2034_v23 }
  0xe6   :  { %592 = vmatpush.msrb.mxu0 %v2095_v33  ;;  %612 = vmatpush.msrb.mxu1 %v2090_v32 }
  0xe7   :  { %632 = vmatpush.msrb.mxu2 %v2053_v26  ;;  %652 = vmatpush.msrb.mxu3 %v2058_v27 }
  0xe8   :  { %593 = vmatpush.msrb.mxu0 %v2119_v37  ;;  %613 = vmatpush.msrb.mxu1 %v2114_v36 }
  0xe9   :  { %633 = vmatpush.msrb.mxu2 %v2077_v30  ;;  %653 = vmatpush.msrb.mxu3 %v2082_v31 }
  0xea   :  { %594 = vmatpush.msrb.mxu0 %v2143_v41  ;;  %614 = vmatpush.msrb.mxu1 %v2138_v40 }
  0xeb   :  { %634 = vmatpush.msrb.mxu2 %v3535_v35  ;;  %654 = vmatpush.msrb.mxu3 %v3536_v42 }
  0xec   :  { %595 = vmatpush.msrb.mxu0 %v3537_v44  ;;  %615 = vmatpush.msrb.mxu1 %v3538_v45 }
  0xed   :  { %635 = vmatpush.msrb.mxu2 %v3539_v63  ;;  %655 = vmatpush.msrb.mxu3 %v3540_v52 }
  0xee   :  { %596 = vmatpush.msrb.mxu0 %v3541_v53  ;;  %616 = vmatpush.msrb.mxu1 %v3542_v56 }
  0xef   :  { %636 = vmatpush.msrb.mxu2 %v3543_v51  ;;  %656 = vmatpush.msrb.mxu3 %v3544_v61 }
  0xf0   :  { %597 = vmatpush.msrb.mxu0 %v3545_v54  ;;  %617 = vmatpush.msrb.mxu1 %v3546_v55 }
  0xf1   :  { %637 = vmatpush.msrb.mxu2 %v3547_v59  ;;  %657 = vmatpush.msrb.mxu3 %v3548_v62 }
  0xf2   :  { %598 = vmatpush.msrb.mxu0 %v3549_v46  ;;  %618 = vmatpush.msrb.mxu1 %v3550_v50  ;;  %v3560_v46 = vld [vmem:[#allocation25_spill] sm:$0xff] }
  0xf3   :  { %638 = vmatpush.msrb.mxu2 %v3551_v60  ;;  %658 = vmatpush.msrb.mxu3 %v3552_v57 }
  0xf4   :  { %599 = vmatpush.msrb.mxu0 %v3553_v48  ;;  %619 = vmatpush.msrb.mxu1 %v3554_v43 }
  0xf5   :  { %639 = vmatpush.msrb.mxu2 %v3555_v38  ;;  %659 = vmatpush.msrb.mxu3 %v3556_v39  ;;  %v1634_v38 = vld [vmem:[%s3393_s0 + $0x8] sm:$0xff] }
  0xf6   :  { %600 = vmatpush.msrb.mxu0 %v3557_v47  ;;  %620 = vmatpush.msrb.mxu1 %v3558_v49 }
  0xf7   :  { %640 = vmatpush.msrb.mxu2 %v3559_v58  ;;  %660 = vmatpush.msrb.mxu3 %v3560_v46 }
 0x153   :  { %v290_v50 = vpop.f32.mrf.mxu1  ;;  %v270_v55 = vpop.f32.mrf.mxu0 }
 0x154   :  { %v337_v60 = vrot.slane %v290_v50, 6 }
 0x156   :  { %v340_v39 = vsel %vm172_vm0, %v270_v55, %v337_v60 }
 0x15a   :  { %v310_v62 = vpop.f32.mrf.mxu2  ;;  %v330_v57 = vpop.f32.mrf.mxu3 }
 0x15b   :  { %v338_v59 = vrot.slane %v310_v62, 4  ;;  %v339_v48 = vrot.slane %v330_v57, 2 }
 0x15d   :  { %v341_v47 = vsel %vm174_vm1, %v338_v59, %v339_v48 }
 0x15e   :  { %v342_v49 = vsel %vm176_vm2, %v340_v39, %v341_v47 }
 0x15f   :  { %v344_v58 = vadd.f32 %v1634_v38, %v342_v49 }
 0x161   :  { %v1635_v43 = vmul.f32 -1.442695, %v344_v58  ;;  %v365_v46 = vrot.slane %v344_v58, 2  ;;  %v389_v54 = vrot.slane %v344_v58, 6  ;;  %v386_v38 = vrot.slane %v344_v58, 4 }
 0x163   :  { %1687 = vpow2.f32 %v1635_v43  ;;  %v1636_v50 = vmul.f32 -1.442695, %v365_v46  ;;  %v1637_v61 = vmul.f32 -1.442695, %v389_v54 }
 0x165   :  { %1689 = vpow2.f32 %v1636_v50 }
 0x166   :  { %1691 = vpow2.f32 %v1637_v61 }
 0x169   :  { %v1688_v62 = vpop.eup %1687 }
 0x16a   :  { %v348_v57 = vadd.f32 1.0, %v1688_v62 }
 0x16b   :  { %v1690_v51 = vpop.eup %1689 }
 0x16c   :  { %v1692_v56 = vpop.eup %1691  ;;  %1693 = vrcp.f32 %v348_v57  ;;  %v370_v53 = vadd.f32 1.0, %v1690_v51  ;;  %v360_v46 = vand.u32 2147483648, %v348_v57  ;;  %v358_v50 = vand.u32 2147483647, %v348_v57 }
 0x16d   :  { %v394_v55 = vadd.f32 1.0, %v1692_v56  ;;  %vm354_vm3 = vweird.f32 %v348_v57 }
 0x16e   :  { %1695 = vrcp.f32 %v370_v53  ;;  %v382_v62 = vand.u32 2147483648, %v370_v53  ;;  %v380_v52 = vand.u32 2147483647, %v370_v53  ;;  %v361_v63 = vor.u32 1.1754944e-38, %v360_v46 }
 0x16f   :  { %1697 = vrcp.f32 %v394_v55  ;;  %vm359_vm6 = vcmp.eq.f32.partialorder %v358_v50, 8.507059e+37  ;;  %vm376_vm7 = vweird.f32 %v370_v53  ;;  %v406_v46 = vand.u32 2147483648, %v394_v55 }
 0x170   :  { %1699 = vtanh.f32 %v386_v38  ;;  %vm381_vm9 = vcmp.eq.f32.partialorder %v380_v52, 8.507059e+37  ;;  %vm400_vm11 = vweird.f32 %v394_v55 }
 0x172   :  { %v1694_v59 = vpop.eup %1693 }
 0x173   :  { %v350_v60 = vmul.f32 %v1694_v59, %v348_v57  ;;  %vm355_vm15 = vweird.f32 %v1694_v59 }
 0x174   :  { %v1696_v48 = vpop.eup %1695  ;;  %vm356_vm5 = vmor %vm354_vm3, %vm355_vm15 }
 0x175   :  { %v1698_v39 = vpop.eup %1697  ;;  %v351_v47 = vsub.f32 1.0, %v350_v60  ;;  %v372_v43 = vmul.f32 %v1696_v48, %v370_v53  ;;  %vm377_vm4 = vweird.f32 %v1696_v48  ;;  %v404_v53 = vand.u32 2147483647, %v394_v55 }
 0x176   :  { %v396_v54 = vmul.f32 %v1698_v39, %v394_v55  ;;  %vm378_vm8 = vmor %vm376_vm7, %vm377_vm4  ;;  %v1700_v42 = vpop.eup %1699  ;;  %vm401_vm10 = vweird.f32 %v1698_v39 }
 0x177   :  { %v373_v49 = vsub.f32 1.0, %v372_v43  ;;  %v352_v61 = vmul.f32 %v1694_v59, %v351_v47  ;;  %v383_v43 = vor.u32 1.1754944e-38, %v382_v62  ;;  %vm402_vm12 = vmor %vm400_vm11, %vm401_vm10  ;;  %vm405_vm13 = vcmp.eq.f32.partialorder %v404_v53, 8.507059e+37 }
 0x178   :  { %v397_v45 = vsub.f32 1.0, %v396_v54 }
 0x179   :  { %v353_v51 = vadd.f32 %v1694_v59, %v352_v61  ;;  %v374_v56 = vmul.f32 %v1696_v48, %v373_v49 }
 0x17a   :  { %v398_v57 = vmul.f32 %v1698_v39, %v397_v45 }
 0x17b   :  { %v357_v58 = vsel %vm356_vm5, %v1694_v59, %v353_v51  ;;  %v375_v60 = vadd.f32 %v1696_v48, %v374_v56  ;;  %v407_v59 = vor.u32 1.1754944e-38, %v406_v46 }
 0x17c   :  { %v362_v44 = vsel %vm359_vm6, %v361_v63, %v357_v58  ;;  %v399_v40 = vadd.f32 %v1698_v39, %v398_v57 }
 0x17d   :  { %v379_v47 = vsel %vm378_vm8, %v1696_v48, %v375_v60  ;;  %v411_v49 = vmul.f32 %v1700_v42, %v362_v44 }
 0x17e   :  { %v384_v38 = vsel %vm381_vm9, %v383_v43, %v379_v47  ;;  %v403_v63 = vsel %vm402_vm12, %v1698_v39, %v399_v40 }
 0x17f   :  { %v410_v61 = vmul.f32 %v384_v38, %v2417_v34  ;;  %v408_v48 = vsel %vm405_vm13, %v407_v59, %v403_v63  ;;  %v1638_v34 = vld [vmem:[%s3393_s0 + $0x10] sm:$0xff] }
 0x181   :  { %v2491_v35 = vadd.f32 %v411_v49, %v410_v61 }
 0x183   :  { %1701 = vtanh.f32 %v2491_v35 }
 0x189   :  { %v1702_v52 = vpop.eup %1701 }
 0x18a   :  { %v414_v54 = vmul.f32 %v1702_v52, %v408_v48 }
 0x18c   :  { %416 = vst [vmem:[#allocation2 + $0x2] sm:$0x3] %v414_v54  ;;  %435 = vmatmul.f32.vlgmr.msra.gmra.mxu0 %v414_v54  ;;  %455 = vmatmul.f32.vlgmr.msra.gmra.mxu1 %v414_v54 }
 0x18d   :  { %475 = vmatmul.f32.vlgmr.msra.gmra.mxu2 %v414_v54  ;;  %495 = vmatmul.f32.vlgmr.msra.gmra.mxu3 %v414_v54 }
 0x18e   :  { %751 = vmatpush.msra.mxu0 %v1941_v7  ;;  %771 = vmatpush.msra.mxu1 %v1934_v6  ;;  %v3567_v6 = vld [vmem:[#allocation6_spill] sm:$0xff]  ;;  %v3568_v7 = vld [vmem:[#allocation15_spill] sm:$0xff] }
 0x18f   :  { %791 = vmatpush.msra.mxu2 %v1902_v0  ;;  %811 = vmatpush.msra.mxu3 %v1907_v1  ;;  %v3561_v0 = vld [vmem:[#allocation7_spill] sm:$0xff] }
 0x190   :  { %752 = vmatpush.msra.mxu0 %v1963_v11  ;;  %772 = vmatpush.msra.mxu1 %v1946_v8  ;;  %v3562_v1 = vld [vmem:[#allocation3_spill] sm:$0xff]  ;;  %v3569_v8 = vld [vmem:[#allocation14_spill] sm:$0xff] }
 0x191   :  { %792 = vmatpush.msra.mxu2 %v1912_v2  ;;  %812 = vmatpush.msra.mxu3 %v1919_v3  ;;  %v3563_v2 = vld [vmem:[#allocation4_spill] sm:$0xff]  ;;  %v3564_v3 = vld [vmem:[#allocation11_spill] sm:$0xff] }
 0x192   :  { %753 = vmatpush.msra.mxu0 %v1975_v13  ;;  %773 = vmatpush.msra.mxu1 %v1970_v12  ;;  %v3572_v11 = vld [vmem:[#allocation19_spill] sm:$0xff]  ;;  %v3573_v12 = vld [vmem:[#allocation18_spill] sm:$0xff]  ;;  %v3574_v13 = vld [vmem:[#allocation12_spill] sm:$0xff] }
 0x193   :  { %793 = vmatpush.msra.mxu2 %v1924_v4  ;;  %813 = vmatpush.msra.mxu3 %v1929_v5  ;;  %v3565_v4 = vld [vmem:[#allocation10_spill] sm:$0xff]  ;;  %v3566_v5 = vld [vmem:[#allocation5_spill] sm:$0xff] }
 0x194   :  { %754 = vmatpush.msra.mxu0 %v1999_v17  ;;  %774 = vmatpush.msra.mxu1 %v1994_v16  ;;  %v3577_v16 = vld [vmem:[#allocation22_spill] sm:$0xff]  ;;  %v3578_v17 = vld [vmem:[#allocation16_spill] sm:$0xff] }
 0x195   :  { %794 = vmatpush.msra.mxu2 %v1952_v9  ;;  %814 = vmatpush.msra.mxu3 %v1957_v10  ;;  %v3570_v9 = vld [vmem:[#allocation8_spill] sm:$0xff]  ;;  %v3571_v10 = vld [vmem:[#allocation9_spill] sm:$0xff] }
 0x196   :  { %755 = vmatpush.msra.mxu0 %v2023_v21  ;;  %775 = vmatpush.msra.mxu1 %v2018_v20  ;;  %v3581_v20 = vld [vmem:[#allocation26_spill] sm:$0xff]  ;;  %v3582_v21 = vld [vmem:[#allocation20_spill] sm:$0xff] }
 0x197   :  { %795 = vmatpush.msra.mxu2 %v1981_v14  ;;  %815 = vmatpush.msra.mxu3 %v1986_v15  ;;  %v3575_v14 = vld [vmem:[#allocation13_spill] sm:$0xff]  ;;  %v3576_v15 = vld [vmem:[#allocation23_spill] sm:$0xff] }
 0x198   :  { %756 = vmatpush.msra.mxu0 %v2047_v25  ;;  %776 = vmatpush.msra.mxu1 %v2042_v24  ;;  %v3585_v24 = vld [vmem:[#allocation28_spill] sm:$0xff] }
 0x199   :  { %796 = vmatpush.msra.mxu2 %v2005_v18  ;;  %816 = vmatpush.msra.mxu3 %v2010_v19  ;;  %v3579_v18 = vld [vmem:[#allocation17_spill] sm:$0xff]  ;;  %v3580_v19 = vld [vmem:[#allocation27_spill] sm:$0xff]  ;;  %v3586_v25 = vld [vmem:[#allocation24_spill] sm:$0xff] }
 0x19a   :  { %757 = vmatpush.msra.mxu0 %v2071_v29  ;;  %777 = vmatpush.msra.mxu1 %v2066_v28 }
 0x19b   :  { %797 = vmatpush.msra.mxu2 %v2029_v22  ;;  %817 = vmatpush.msra.mxu3 %v2034_v23  ;;  %v3583_v22 = vld [vmem:[#allocation21_spill] sm:$0xff] }
 0x19c   :  { %758 = vmatpush.msra.mxu0 %v2095_v33  ;;  %778 = vmatpush.msra.mxu1 %v2090_v32  ;;  %v3584_v23 = vld [vmem:[#allocation29_spill] sm:$0xff] }
 0x19d   :  { %798 = vmatpush.msra.mxu2 %v2053_v26  ;;  %818 = vmatpush.msra.mxu3 %v2058_v27  ;;  %v3587_v26 = vld [vmem:[#allocation25_spill] sm:$0xff] }
 0x19e   :  { %759 = vmatpush.msra.mxu0 %v2119_v37  ;;  %779 = vmatpush.msra.mxu1 %v2114_v36 }
 0x19f   :  { %799 = vmatpush.msra.mxu2 %v2077_v30  ;;  %819 = vmatpush.msra.mxu3 %v2082_v31 }
 0x1a0   :  { %760 = vmatpush.msra.mxu0 %v2143_v41  ;;  %780 = vmatpush.msra.mxu1 %v3561_v0 }
 0x1a1   :  { %800 = vmatpush.msra.mxu2 %v3562_v1  ;;  %820 = vmatpush.msra.mxu3 %v3563_v2 }
 0x1a2   :  { %761 = vmatpush.msra.mxu0 %v3564_v3  ;;  %781 = vmatpush.msra.mxu1 %v3565_v4 }
 0x1a3   :  { %801 = vmatpush.msra.mxu2 %v3566_v5  ;;  %821 = vmatpush.msra.mxu3 %v3567_v6 }
 0x1a4   :  { %762 = vmatpush.msra.mxu0 %v3568_v7  ;;  %782 = vmatpush.msra.mxu1 %v3569_v8 }
 0x1a5   :  { %802 = vmatpush.msra.mxu2 %v3570_v9  ;;  %822 = vmatpush.msra.mxu3 %v3571_v10 }
 0x1a6   :  { %763 = vmatpush.msra.mxu0 %v3572_v11  ;;  %783 = vmatpush.msra.mxu1 %v3573_v12 }
 0x1a7   :  { %803 = vmatpush.msra.mxu2 %v3574_v13  ;;  %823 = vmatpush.msra.mxu3 %v3575_v14 }
 0x1a8   :  { %764 = vmatpush.msra.mxu0 %v3576_v15  ;;  %784 = vmatpush.msra.mxu1 %v3577_v16 }
 0x1a9   :  { %804 = vmatpush.msra.mxu2 %v3578_v17  ;;  %824 = vmatpush.msra.mxu3 %v3579_v18 }
 0x1aa   :  { %765 = vmatpush.msra.mxu0 %v3580_v19  ;;  %785 = vmatpush.msra.mxu1 %v3581_v20 }
 0x1ab   :  { %805 = vmatpush.msra.mxu2 %v3582_v21  ;;  %825 = vmatpush.msra.mxu3 %v3583_v22 }
 0x1ac   :  { %766 = vmatpush.msra.mxu0 %v3584_v23  ;;  %786 = vmatpush.msra.mxu1 %v3585_v24  ;;  %v2577_v24 = vld [vmem:[%s3392_s1 + $0x1e8] sm:$0xff] }
 0x1ad   :  { %806 = vmatpush.msra.mxu2 %v3586_v25  ;;  %826 = vmatpush.msra.mxu3 %v3587_v26  ;;  %v2583_v25 = vld [vmem:[%s3392_s1 + $0x1f0] sm:$0xff]  ;;  %v2589_v26 = vld [vmem:[%s3392_s1 + $0x1f8] sm:$0xff] }
 0x209   :  { %v456_v27 = vpop.f32.mrf.mxu1  ;;  %v436_v33 = vpop.f32.mrf.mxu0 }
 0x20a   :  { %v503_v28 = vrot.slane %v456_v27, 6  ;;  %v2595_v27 = vld [vmem:[%s3392_s1 + $0x1c0] sm:$0xff] }
 0x20c   :  { %v506_v36 = vsel %vm172_vm0, %v436_v33, %v503_v28  ;;  %v2601_v28 = vld [vmem:[%s3392_s1 + $0x1c8] sm:$0xff]  ;;  %v2631_v33 = vld [vmem:[%s3392_s1 + $0x1b0] sm:$0xff] }
 0x210   :  { %v476_v29 = vpop.f32.mrf.mxu2  ;;  %v496_v30 = vpop.f32.mrf.mxu3 }
 0x211   :  { %v504_v31 = vrot.slane %v476_v29, 4  ;;  %v505_v32 = vrot.slane %v496_v30, 2  ;;  %v2607_v29 = vld [vmem:[%s3392_s1 + $0x1d0] sm:$0xff]  ;;  %v2613_v30 = vld [vmem:[%s3392_s1 + $0x1d8] sm:$0xff] }
 0x213   :  { %v507_v37 = vsel %vm174_vm1, %v504_v31, %v505_v32  ;;  %v2619_v31 = vld [vmem:[%s3392_s1 + $0x1a0] sm:$0xff]  ;;  %v2625_v32 = vld [vmem:[%s3392_s1 + $0x1a8] sm:$0xff] }
 0x214   :  { %v508_v40 = vsel %vm176_vm2, %v506_v36, %v507_v37  ;;  %v2643_v36 = vld [vmem:[%s3392_s1 + $0x180] sm:$0xff]  ;;  %v2649_v37 = vld [vmem:[%s3392_s1 + $0x188] sm:$0xff] }
 0x215   :  { %v510_v41 = vadd.f32 %v1638_v34, %v508_v40  ;;  %v2637_v34 = vld [vmem:[%s3392_s1 + $0x1b8] sm:$0xff]  ;;  %v2655_v40 = vld [vmem:[%s3392_s1 + $0x190] sm:$0xff] }
 0x217   :  { %v1639_v42 = vmul.f32 -1.442695, %v510_v41  ;;  %v531_v44 = vrot.slane %v510_v41, 2  ;;  %v555_v45 = vrot.slane %v510_v41, 6  ;;  %v552_v57 = vrot.slane %v510_v41, 4  ;;  %v2661_v41 = vld [vmem:[%s3392_s1 + $0x198] sm:$0xff] }
 0x219   :  { %1703 = vpow2.f32 %v1639_v42  ;;  %v1640_v55 = vmul.f32 -1.442695, %v531_v44  ;;  %v1641_v39 = vmul.f32 -1.442695, %v555_v45  ;;  %v2667_v42 = vld [vmem:[%s3392_s1 + $0x160] sm:$0xff]  ;;  %v2673_v44 = vld [vmem:[%s3392_s1 + $0x168] sm:$0xff] }
 0x21a   :  { %v2679_v45 = vld [vmem:[%s3392_s1 + $0x170] sm:$0xff] }
 0x21b   :  { %1705 = vpow2.f32 %v1640_v55  ;;  %v2685_v55 = vld [vmem:[%s3392_s1 + $0x178] sm:$0xff] }
 0x21c   :  { %1707 = vpow2.f32 %v1641_v39  ;;  %v2691_v39 = vld [vmem:[%s3392_s1 + $0x140] sm:$0xff] }
 0x21f   :  { %v1704_v50 = vpop.eup %1703 }
 0x220   :  { %v514_v62 = vadd.f32 1.0, %v1704_v50  ;;  %v2697_v50 = vld [vmem:[%s3392_s1 + $0x148] sm:$0xff] }
 0x221   :  { %v1706_v51 = vpop.eup %1705 }
 0x222   :  { %v1708_v56 = vpop.eup %1707  ;;  %1709 = vrcp.f32 %v514_v62  ;;  %v536_v58 = vadd.f32 1.0, %v1706_v51  ;;  %v526_v53 = vand.u32 2147483648, %v514_v62  ;;  %v524_v48 = vand.u32 2147483647, %v514_v62  ;;  %v2709_v51 = vld [vmem:[%s3392_s1 + $0x158] sm:$0xff] }
 0x223   :  { %v560_v60 = vadd.f32 1.0, %v1708_v56  ;;  %vm520_vm15 = vweird.f32 %v514_v62  ;;  %v2715_v56 = vld [vmem:[%s3392_s1 + $0x120] sm:$0xff] }
 0x224   :  { %1711 = vrcp.f32 %v536_v58  ;;  %v548_v54 = vand.u32 2147483648, %v536_v58  ;;  %v546_v2 = vand.u32 2147483647, %v536_v58  ;;  %v527_v3 = vor.u32 1.1754944e-38, %v526_v53  ;;  %v2775_v53 = vld [vmem:[%s3392_s1 + $0xf0] sm:$0xff] }
 0x225   :  { %1713 = vrcp.f32 %v560_v60  ;;  %vm525_vm5 = vcmp.eq.f32.partialorder %v524_v48, 8.507059e+37  ;;  %vm542_vm6 = vweird.f32 %v536_v58  ;;  %v572_v17 = vand.u32 2147483648, %v560_v60  ;;  %v2799_v48 = vld [vmem:[%s3392_s1 + $0xd0] sm:$0xff] }
 0x226   :  { %1715 = vtanh.f32 %v552_v57  ;;  %v549_v8 = vor.u32 1.1754944e-38, %v548_v54  ;;  %vm547_vm8 = vcmp.eq.f32.partialorder %v546_v2, 8.507059e+37  ;;  %vm566_vm10 = vweird.f32 %v560_v60  ;;  %v2751_v57 = vld [vmem:[%s3392_s1 + $0x110] sm:$0xff]  ;;  %3589 = vst [vmem:[#allocation3_spill] sm:$0xff] %v2799_v48  ;;  %v2805_v54 = vld [vmem:[%s3392_s1 + $0xd8] sm:$0xff] }
 0x227   :  { %v570_v18 = vand.u32 2147483647, %v560_v60  ;;  %v573_v20 = vor.u32 1.1754944e-38, %v572_v17  ;;  %3590 = vst [vmem:[#allocation4_spill] sm:$0xff] %v2805_v54  ;;  %v2823_v2 = vld [vmem:[%s3392_s1 + $0xb0] sm:$0xff]  ;;  %v2907_v17 = vld [vmem:[%s3392_s1 + $0x20] sm:$0xff] }
 0x228   :  { %v1710_v43 = vpop.eup %1709  ;;  %3593 = vst [vmem:[#allocation5_spill] sm:$0xff] %v2823_v2 }
 0x229   :  { %v516_v47 = vmul.f32 %v1710_v43, %v514_v62  ;;  %vm521_vm14 = vweird.f32 %v1710_v43  ;;  %vm571_vm12 = vcmp.eq.f32.partialorder %v570_v18, 8.507059e+37  ;;  %v2703_v62 = vld [vmem:[%s3392_s1 + $0x150] sm:$0xff]  ;;  %3607 = vst [vmem:[#allocation27_spill] sm:$0xff] %v2907_v17  ;;  %v2913_v18 = vld [vmem:[%s3392_s1 + $0x28] sm:$0xff] }
 0x22a   :  { %v1712_v38 = vpop.eup %1711  ;;  %vm522_vm4 = vmor %vm520_vm15, %vm521_vm14  ;;  %3608 = vst [vmem:[#allocation26_spill] sm:$0xff] %v2913_v18 }
 0x22b   :  { %v1714_v61 = vpop.eup %1713  ;;  %v517_v49 = vsub.f32 1.0, %v516_v47  ;;  %v538_v46 = vmul.f32 %v1712_v38, %v536_v58  ;;  %vm543_vm3 = vweird.f32 %v1712_v38  ;;  %v2721_v58 = vld [vmem:[%s3392_s1 + $0x128] sm:$0xff]  ;;  %v2739_v47 = vld [vmem:[%s3392_s1 + $0x100] sm:$0xff] }
 0x22c   :  { %v562_v63 = vmul.f32 %v1714_v61, %v560_v60  ;;  %vm544_vm7 = vmor %vm542_vm6, %vm543_vm3  ;;  %v1716_v10 = vpop.eup %1715  ;;  %vm567_vm9 = vweird.f32 %v1714_v61  ;;  %v2727_v60 = vld [vmem:[%s3392_s1 + $0x130] sm:$0xff] }
 0x22d   :  { %v539_v59 = vsub.f32 1.0, %v538_v46  ;;  %v518_v52 = vmul.f32 %v1710_v43, %v517_v49  ;;  %vm568_vm11 = vmor %vm566_vm10, %vm567_vm9  ;;  %v2763_v49 = vld [vmem:[%s3392_s1 + $0xe0] sm:$0xff]  ;;  %v2769_v46 = vld [vmem:[%s3392_s1 + $0xe8] sm:$0xff] }
 0x22e   :  { %v563_v4 = vsub.f32 1.0, %v562_v63  ;;  %v2781_v63 = vld [vmem:[%s3392_s1 + $0xf8] sm:$0xff] }
 0x22f   :  { %v519_v0 = vadd.f32 %v1710_v43, %v518_v52  ;;  %v540_v1 = vmul.f32 %v1712_v38, %v539_v59  ;;  %v2787_v59 = vld [vmem:[%s3392_s1 + $0xc0] sm:$0xff]  ;;  %v2793_v52 = vld [vmem:[%s3392_s1 + $0xc8] sm:$0xff] }
 0x230   :  { %v564_v12 = vmul.f32 %v1714_v61, %v563_v4  ;;  %3588 = vst [vmem:[#allocation7_spill] sm:$0xff] %v2793_v52  ;;  %v2835_v4 = vld [vmem:[%s3392_s1 + $0x80] sm:$0xff] }
 0x231   :  { %v523_v5 = vsel %vm522_vm4, %v1710_v43, %v519_v0  ;;  %v541_v6 = vadd.f32 %v1712_v38, %v540_v1  ;;  %v2733_v43 = vld [vmem:[%s3392_s1 + $0x138] sm:$0xff]  ;;  %v2811_v0 = vld [vmem:[%s3392_s1 + $0xa0] sm:$0xff]  ;;  %v2817_v1 = vld [vmem:[%s3392_s1 + $0xa8] sm:$0xff]  ;;  %3595 = vst [vmem:[#allocation15_spill] sm:$0xff] %v2835_v4 }
 0x232   :  { %v528_v7 = vsel %vm525_vm5, %v527_v3, %v523_v5  ;;  %v565_v16 = vadd.f32 %v1714_v61, %v564_v12  ;;  %3591 = vst [vmem:[#allocation11_spill] sm:$0xff] %v2811_v0  ;;  %v2829_v3 = vld [vmem:[%s3392_s1 + $0xb8] sm:$0xff]  ;;  %v2841_v5 = vld [vmem:[%s3392_s1 + $0x88] sm:$0xff]  ;;  %v2883_v12 = vld [vmem:[%s3392_s1 + $0x40] sm:$0xff] }
 0x233   :  { %v545_v9 = vsel %vm544_vm7, %v1712_v38, %v541_v6  ;;  %v577_v14 = vmul.f32 %v1716_v10, %v528_v7  ;;  %v2745_v38 = vld [vmem:[%s3392_s1 + $0x108] sm:$0xff]  ;;  %3592 = vst [vmem:[#allocation10_spill] sm:$0xff] %v2817_v1  ;;  %v2847_v6 = vld [vmem:[%s3392_s1 + $0x90] sm:$0xff]  ;;  %v2853_v7 = vld [vmem:[%s3392_s1 + $0x98] sm:$0xff] }
 0x234   :  { %v550_v11 = vsel %vm547_vm8, %v549_v8, %v545_v9  ;;  %v569_v19 = vsel %vm568_vm11, %v1714_v61, %v565_v16  ;;  %v2757_v61 = vld [vmem:[%s3392_s1 + $0x118] sm:$0xff]  ;;  %3594 = vst [vmem:[#allocation6_spill] sm:$0xff] %v2829_v3  ;;  %v2859_v8 = vld [vmem:[%s3392_s1 + $0x60] sm:$0xff]  ;;  %v2865_v9 = vld [vmem:[%s3392_s1 + $0x68] sm:$0xff] }
 0x235   :  { %v576_v13 = vmul.f32 %v550_v11, %v2491_v35  ;;  %v574_v22 = vsel %vm571_vm12, %v573_v20, %v569_v19  ;;  %v2571_v35 = vld [vmem:[%s3392_s1 + $0x1e0] sm:$0xff]  ;;  %3596 = vst [vmem:[#allocation14_spill] sm:$0xff] %v2841_v5  ;;  %v2871_v10 = vld [vmem:[%s3392_s1 + $0x70] sm:$0xff]  ;;  %v2877_v11 = vld [vmem:[%s3392_s1 + $0x78] sm:$0xff] }
 0x236   :  { %3597 = vst [vmem:[#allocation8_spill] sm:$0xff] %v2847_v6  ;;  %v2901_v16 = vld [vmem:[%s3392_s1 + $0x58] sm:$0xff]  ;;  %v2919_v19 = vld [vmem:[%s3392_s1 + $0x30] sm:$0xff] }
 0x237   :  { %v2565_v15 = vadd.f32 %v577_v14, %v576_v13  ;;  %3598 = vst [vmem:[#allocation9_spill] sm:$0xff] %v2853_v7  ;;  %v2889_v13 = vld [vmem:[%s3392_s1 + $0x48] sm:$0xff]  ;;  %v2895_v14 = vld [vmem:[%s3392_s1 + $0x50] sm:$0xff]  ;;  %v2925_v20 = vld [vmem:[%s3392_s1 + $0x38] sm:$0xff] }
 0x238   :  { %3599 = vst [vmem:[#allocation19_spill] sm:$0xff] %v2859_v8 }
 0x239   :  { %1717 = vtanh.f32 %v2565_v15  ;;  %3600 = vst [vmem:[#allocation18_spill] sm:$0xff] %v2865_v9 }
 0x23a   :  { %3601 = vst [vmem:[#allocation12_spill] sm:$0xff] %v2871_v10 }
 0x23b   :  { %3602 = vst [vmem:[#allocation13_spill] sm:$0xff] %v2877_v11 }
 0x23c   :  { %3603 = vst [vmem:[#allocation23_spill] sm:$0xff] %v2883_v12 }
 0x23d   :  { %3604 = vst [vmem:[#allocation22_spill] sm:$0xff] %v2889_v13 }
 0x23e   :  { %3605 = vst [vmem:[#allocation16_spill] sm:$0xff] %v2895_v14 }
 0x23f   :  { %v1718_v21 = vpop.eup %1717  ;;  %3606 = vst [vmem:[#allocation17_spill] sm:$0xff] %v2901_v16 }
 0x240   :  { %v580_v23 = vmul.f32 %v1718_v21, %v574_v22  ;;  %3609 = vst [vmem:[#allocation20_spill] sm:$0xff] %v2919_v19  ;;  %v2931_v21 = vld [vmem:[%s3392_s1] sm:$0xff]  ;;  %v2937_v22 = vld [vmem:[%s3392_s1 + $0x8] sm:$0xff] }
 0x241   :  { %3610 = vst [vmem:[#allocation21_spill] sm:$0xff] %v2925_v20 }
 0x242   :  { %582 = vst [vmem:[#allocation2 + $0x4] sm:$0x3] %v580_v23  ;;  %601 = vmatmul.f32.vlgmr.msrb.gmra.mxu0 %v580_v23  ;;  %621 = vmatmul.f32.vlgmr.msrb.gmra.mxu1 %v580_v23 }
 0x243   :  { %641 = vmatmul.f32.vlgmr.msrb.gmra.mxu2 %v580_v23  ;;  %661 = vmatmul.f32.vlgmr.msrb.gmra.mxu3 %v580_v23  ;;  %3611 = vst [vmem:[#allocation29_spill] sm:$0xff] %v2931_v21  ;;  %v2943_v23 = vld [vmem:[%s3392_s1 + $0x10] sm:$0xff] }
 0x244   :  { %917 = vmatpush.msrb.mxu0 %v2571_v35  ;;  %937 = vmatpush.msrb.mxu1 %v2577_v24  ;;  %3612 = vst [vmem:[#allocation28_spill] sm:$0xff] %v2937_v22 }
 0x245   :  { %957 = vmatpush.msrb.mxu2 %v2583_v25  ;;  %977 = vmatpush.msrb.mxu3 %v2589_v26  ;;  %3613 = vst [vmem:[#allocation24_spill] sm:$0xff] %v2943_v23 }
 0x246   :  { %918 = vmatpush.msrb.mxu0 %v2595_v27  ;;  %938 = vmatpush.msrb.mxu1 %v2601_v28 }
 0x247   :  { %958 = vmatpush.msrb.mxu2 %v2607_v29  ;;  %978 = vmatpush.msrb.mxu3 %v2613_v30 }
 0x248   :  { %919 = vmatpush.msrb.mxu0 %v2619_v31  ;;  %939 = vmatpush.msrb.mxu1 %v2625_v32 }
 0x249   :  { %959 = vmatpush.msrb.mxu2 %v2631_v33  ;;  %979 = vmatpush.msrb.mxu3 %v2637_v34 }
 0x24a   :  { %920 = vmatpush.msrb.mxu0 %v2643_v36  ;;  %940 = vmatpush.msrb.mxu1 %v2649_v37 }
 0x24b   :  { %960 = vmatpush.msrb.mxu2 %v2655_v40  ;;  %980 = vmatpush.msrb.mxu3 %v2661_v41 }
 0x24c   :  { %921 = vmatpush.msrb.mxu0 %v2667_v42  ;;  %941 = vmatpush.msrb.mxu1 %v2673_v44 }
 0x24d   :  { %961 = vmatpush.msrb.mxu2 %v2679_v45  ;;  %981 = vmatpush.msrb.mxu3 %v2685_v55 }
 0x24e   :  { %922 = vmatpush.msrb.mxu0 %v2691_v39  ;;  %942 = vmatpush.msrb.mxu1 %v2697_v50 }
 0x24f   :  { %962 = vmatpush.msrb.mxu2 %v2703_v62  ;;  %982 = vmatpush.msrb.mxu3 %v2709_v51 }
 0x250   :  { %923 = vmatpush.msrb.mxu0 %v2715_v56  ;;  %943 = vmatpush.msrb.mxu1 %v2721_v58 }
 0x251   :  { %963 = vmatpush.msrb.mxu2 %v2727_v60  ;;  %983 = vmatpush.msrb.mxu3 %v2733_v43 }
 0x252   :  { %924 = vmatpush.msrb.mxu0 %v2739_v47  ;;  %944 = vmatpush.msrb.mxu1 %v2745_v38 }
 0x253   :  { %964 = vmatpush.msrb.mxu2 %v2751_v57  ;;  %984 = vmatpush.msrb.mxu3 %v2757_v61 }
 0x254   :  { %925 = vmatpush.msrb.mxu0 %v2763_v49  ;;  %945 = vmatpush.msrb.mxu1 %v2769_v46 }
 0x255   :  { %965 = vmatpush.msrb.mxu2 %v2775_v53  ;;  %985 = vmatpush.msrb.mxu3 %v2781_v63 }
 0x256   :  { %926 = vmatpush.msrb.mxu0 %v2787_v59  ;;  %946 = vmatpush.msrb.mxu1 %v2793_v52 }
 0x257   :  { %966 = vmatpush.msrb.mxu2 %v2799_v48  ;;  %986 = vmatpush.msrb.mxu3 %v2805_v54 }
 0x258   :  { %927 = vmatpush.msrb.mxu0 %v2811_v0  ;;  %947 = vmatpush.msrb.mxu1 %v2817_v1 }
 0x259   :  { %967 = vmatpush.msrb.mxu2 %v2823_v2  ;;  %987 = vmatpush.msrb.mxu3 %v2829_v3 }
 0x25a   :  { %928 = vmatpush.msrb.mxu0 %v2835_v4  ;;  %948 = vmatpush.msrb.mxu1 %v2841_v5 }
 0x25b   :  { %968 = vmatpush.msrb.mxu2 %v2847_v6  ;;  %988 = vmatpush.msrb.mxu3 %v2853_v7 }
 0x25c   :  { %929 = vmatpush.msrb.mxu0 %v2859_v8  ;;  %949 = vmatpush.msrb.mxu1 %v2865_v9 }
 0x25d   :  { %969 = vmatpush.msrb.mxu2 %v2871_v10  ;;  %989 = vmatpush.msrb.mxu3 %v2877_v11 }
 0x25e   :  { %930 = vmatpush.msrb.mxu0 %v2883_v12  ;;  %950 = vmatpush.msrb.mxu1 %v2889_v13  ;;  %v1642_v13 = vld [vmem:[%s3393_s0 + $0x18] sm:$0xff] }
 0x25f   :  { %970 = vmatpush.msrb.mxu2 %v2895_v14  ;;  %990 = vmatpush.msrb.mxu3 %v2901_v16 }
 0x260   :  { %931 = vmatpush.msrb.mxu0 %v2907_v17  ;;  %951 = vmatpush.msrb.mxu1 %v2913_v18 }
 0x261   :  { %971 = vmatpush.msrb.mxu2 %v2919_v19  ;;  %991 = vmatpush.msrb.mxu3 %v2925_v20  ;;  %v2949_v20 = vld [vmem:[%s3392_s1 + $0x18] sm:$0xff] }
 0x262   :  { %932 = vmatpush.msrb.mxu0 %v2931_v21  ;;  %952 = vmatpush.msrb.mxu1 %v2937_v22  ;;  %3614 = vst [vmem:[#allocation25_spill] sm:$0xff] %v2949_v20 }
 0x263   :  { %972 = vmatpush.msrb.mxu2 %v2943_v23  ;;  %992 = vmatpush.msrb.mxu3 %v2949_v20 }
 0x2bf   :  { %v622_v21 = vpop.f32.mrf.mxu1  ;;  %v602_v14 = vpop.f32.mrf.mxu0 }
 0x2c0   :  { %v669_v19 = vrot.slane %v622_v21, 6 }
 0x2c2   :  { %v672_v23 = vsel %vm172_vm0, %v602_v14, %v669_v19 }
 0x2c6   :  { %v642_v18 = vpop.f32.mrf.mxu2  ;;  %v662_v17 = vpop.f32.mrf.mxu3 }
 0x2c7   :  { %v670_v16 = vrot.slane %v642_v18, 4  ;;  %v671_v22 = vrot.slane %v662_v17, 2 }
 0x2c9   :  { %v673_v12 = vsel %vm174_vm1, %v670_v16, %v671_v22 }
 0x2ca   :  { %v674_v11 = vsel %vm176_vm2, %v672_v23, %v673_v12 }
 0x2cb   :  { %v676_v10 = vadd.f32 %v1642_v13, %v674_v11 }
 0x2cd   :  { %v1643_v9 = vmul.f32 -1.442695, %v676_v10  ;;  %v697_v20 = vrot.slane %v676_v10, 2  ;;  %v721_v8 = vrot.slane %v676_v10, 6  ;;  %v718_v13 = vrot.slane %v676_v10, 4 }
 0x2cf   :  { %1719 = vpow2.f32 %v1643_v9  ;;  %v1644_v21 = vmul.f32 -1.442695, %v697_v20  ;;  %v1645_v7 = vmul.f32 -1.442695, %v721_v8 }
 0x2d1   :  { %1721 = vpow2.f32 %v1644_v21 }
 0x2d2   :  { %1723 = vpow2.f32 %v1645_v7 }
 0x2d5   :  { %v1720_v17 = vpop.eup %1719 }
 0x2d6   :  { %v680_v18 = vadd.f32 1.0, %v1720_v17 }
 0x2d7   :  { %v1722_v6 = vpop.eup %1721 }
 0x2d8   :  { %v1724_v5 = vpop.eup %1723  ;;  %1725 = vrcp.f32 %v680_v18  ;;  %v702_v4 = vadd.f32 1.0, %v1722_v6  ;;  %v692_v20 = vand.u32 2147483648, %v680_v18  ;;  %v690_v21 = vand.u32 2147483647, %v680_v18 }
 0x2d9   :  { %v726_v14 = vadd.f32 1.0, %v1724_v5  ;;  %vm686_vm14 = vweird.f32 %v680_v18 }
 0x2da   :  { %1727 = vrcp.f32 %v702_v4  ;;  %v714_v17 = vand.u32 2147483648, %v702_v4  ;;  %v712_v3 = vand.u32 2147483647, %v702_v4  ;;  %v693_v2 = vor.u32 1.1754944e-38, %v692_v20 }
 0x2db   :  { %1729 = vrcp.f32 %v726_v14  ;;  %vm691_vm4 = vcmp.eq.f32.partialorder %v690_v21, 8.507059e+37  ;;  %vm708_vm5 = vweird.f32 %v702_v4  ;;  %v738_v20 = vand.u32 2147483648, %v726_v14  ;;  %v3622_v21 = vld [vmem:[#allocation15_spill] sm:$0xff] }
 0x2dc   :  { %1731 = vtanh.f32 %v718_v13  ;;  %vm713_vm7 = vcmp.eq.f32.partialorder %v712_v3, 8.507059e+37  ;;  %vm732_vm9 = vweird.f32 %v726_v14 }
 0x2de   :  { %v1726_v16 = vpop.eup %1725 }
 0x2df   :  { %v682_v12 = vmul.f32 %v1726_v16, %v680_v18  ;;  %vm687_vm13 = vweird.f32 %v1726_v16 }
 0x2e0   :  { %v1728_v11 = vpop.eup %1727  ;;  %vm688_vm3 = vmor %vm686_vm14, %vm687_vm13 }
 0x2e1   :  { %v1730_v19 = vpop.eup %1729  ;;  %v683_v22 = vsub.f32 1.0, %v682_v12  ;;  %v704_v9 = vmul.f32 %v1728_v11, %v702_v4  ;;  %vm709_vm15 = vweird.f32 %v1728_v11  ;;  %v736_v4 = vand.u32 2147483647, %v726_v14 }
 0x2e2   :  { %v728_v8 = vmul.f32 %v1730_v19, %v726_v14  ;;  %vm710_vm6 = vmor %vm708_vm5, %vm709_vm15  ;;  %v1732_v54 = vpop.eup %1731  ;;  %vm733_vm8 = vweird.f32 %v1730_v19  ;;  %v3620_v14 = vld [vmem:[#allocation5_spill] sm:$0xff] }
 0x2e3   :  { %v705_v23 = vsub.f32 1.0, %v704_v9  ;;  %v684_v7 = vmul.f32 %v1726_v16, %v683_v22  ;;  %v715_v9 = vor.u32 1.1754944e-38, %v714_v17  ;;  %vm734_vm10 = vmor %vm732_vm9, %vm733_vm8  ;;  %vm737_vm11 = vcmp.eq.f32.partialorder %v736_v4, 8.507059e+37  ;;  %v3623_v17 = vld [vmem:[#allocation14_spill] sm:$0xff] }
 0x2e4   :  { %v729_v1 = vsub.f32 1.0, %v728_v8  ;;  %v3635_v4 = vld [vmem:[#allocation26_spill] sm:$0xff] }
 0x2e5   :  { %v685_v6 = vadd.f32 %v1726_v16, %v684_v7  ;;  %v706_v5 = vmul.f32 %v1728_v11, %v705_v23 }
 0x2e6   :  { %v730_v18 = vmul.f32 %v1730_v19, %v729_v1  ;;  %v3619_v1 = vld [vmem:[#allocation10_spill] sm:$0xff] }
 0x2e7   :  { %v689_v10 = vsel %vm688_vm3, %v1726_v16, %v685_v6  ;;  %v707_v12 = vadd.f32 %v1728_v11, %v706_v5  ;;  %v739_v16 = vor.u32 1.1754944e-38, %v738_v20  ;;  %v3624_v6 = vld [vmem:[#allocation8_spill] sm:$0xff]  ;;  %v3625_v5 = vld [vmem:[#allocation9_spill] sm:$0xff]  ;;  %v3634_v20 = vld [vmem:[#allocation27_spill] sm:$0xff] }
 0x2e8   :  { %v694_v0 = vsel %vm691_vm4, %v693_v2, %v689_v10  ;;  %v731_v52 = vadd.f32 %v1730_v19, %v730_v18  ;;  %v3626_v10 = vld [vmem:[#allocation19_spill] sm:$0xff]  ;;  %v3631_v18 = vld [vmem:[#allocation22_spill] sm:$0xff] }
 0x2e9   :  { %v711_v22 = vsel %vm710_vm6, %v1728_v11, %v707_v12  ;;  %v743_v23 = vmul.f32 %v1732_v54, %v694_v0  ;;  %v3617_v54 = vld [vmem:[#allocation4_spill] sm:$0xff]  ;;  %v3618_v0 = vld [vmem:[#allocation11_spill] sm:$0xff]  ;;  %v3627_v12 = vld [vmem:[#allocation18_spill] sm:$0xff] }
 0x2ea   :  { %v716_v13 = vsel %vm713_vm7, %v715_v9, %v711_v22  ;;  %v735_v2 = vsel %vm734_vm10, %v1730_v19, %v731_v52  ;;  %v3616_v52 = vld [vmem:[#allocation3_spill] sm:$0xff]  ;;  %v3621_v19 = vld [vmem:[#allocation6_spill] sm:$0xff]  ;;  %v3628_v9 = vld [vmem:[#allocation12_spill] sm:$0xff] }
 0x2eb   :  { %v742_v7 = vmul.f32 %v716_v13, %v2565_v15  ;;  %v740_v11 = vsel %vm737_vm11, %v739_v16, %v735_v2  ;;  %v3615_v15 = vld [vmem:[#allocation7_spill] sm:$0xff]  ;;  %v3629_v22 = vld [vmem:[#allocation13_spill] sm:$0xff]  ;;  %v3636_v2 = vld [vmem:[#allocation20_spill] sm:$0xff] }
 0x2ec   :  { %v3630_v13 = vld [vmem:[#allocation23_spill] sm:$0xff]  ;;  %v3637_v16 = vld [vmem:[#allocation21_spill] sm:$0xff] }
 0x2ed   :  { %v2959_v48 = vadd.f32 %v743_v23, %v742_v7  ;;  %v3632_v7 = vld [vmem:[#allocation16_spill] sm:$0xff]  ;;  %v3633_v23 = vld [vmem:[#allocation17_spill] sm:$0xff] }
 0x2ef   :  { %1733 = vtanh.f32 %v2959_v48 }
 0x2f5   :  { %v1734_v3 = vpop.eup %1733 }
 0x2f6   :  { %v746_v8 = vmul.f32 %v1734_v3, %v740_v11  ;;  %v3638_v3 = vld [vmem:[#allocation29_spill] sm:$0xff]  ;;  %v3639_v11 = vld [vmem:[#allocation28_spill] sm:$0xff] }
 0x2f8   :  { %748 = vst [vmem:[#allocation2 + $0x6] sm:$0x3] %v746_v8  ;;  %767 = vmatmul.f32.vlgmr.msra.gmra.mxu0 %v746_v8  ;;  %787 = vmatmul.f32.vlgmr.msra.gmra.mxu1 %v746_v8 }
 0x2f9   :  { %807 = vmatmul.f32.vlgmr.msra.gmra.mxu2 %v746_v8  ;;  %827 = vmatmul.f32.vlgmr.msra.gmra.mxu3 %v746_v8  ;;  %v3640_v8 = vld [vmem:[#allocation24_spill] sm:$0xff] }
 0x2fa   :  { %1083 = vmatpush.msra.mxu0 %v2571_v35  ;;  %1103 = vmatpush.msra.mxu1 %v2577_v24 }
 0x2fb   :  { %1123 = vmatpush.msra.mxu2 %v2583_v25  ;;  %1143 = vmatpush.msra.mxu3 %v2589_v26 }
 0x2fc   :  { %1084 = vmatpush.msra.mxu0 %v2595_v27  ;;  %1104 = vmatpush.msra.mxu1 %v2601_v28 }
 0x2fd   :  { %1124 = vmatpush.msra.mxu2 %v2607_v29  ;;  %1144 = vmatpush.msra.mxu3 %v2613_v30 }
 0x2fe   :  { %1085 = vmatpush.msra.mxu0 %v2619_v31  ;;  %1105 = vmatpush.msra.mxu1 %v2625_v32 }
 0x2ff   :  { %1125 = vmatpush.msra.mxu2 %v2631_v33  ;;  %1145 = vmatpush.msra.mxu3 %v2637_v34 }
 0x300   :  { %1086 = vmatpush.msra.mxu0 %v2643_v36  ;;  %1106 = vmatpush.msra.mxu1 %v2649_v37 }
 0x301   :  { %1126 = vmatpush.msra.mxu2 %v2655_v40  ;;  %1146 = vmatpush.msra.mxu3 %v2661_v41 }
 0x302   :  { %1087 = vmatpush.msra.mxu0 %v2667_v42  ;;  %1107 = vmatpush.msra.mxu1 %v2673_v44 }
 0x303   :  { %1127 = vmatpush.msra.mxu2 %v2679_v45  ;;  %1147 = vmatpush.msra.mxu3 %v2685_v55 }
 0x304   :  { %1088 = vmatpush.msra.mxu0 %v2691_v39  ;;  %1108 = vmatpush.msra.mxu1 %v2697_v50 }
 0x305   :  { %1128 = vmatpush.msra.mxu2 %v2703_v62  ;;  %1148 = vmatpush.msra.mxu3 %v2709_v51 }
 0x306   :  { %1089 = vmatpush.msra.mxu0 %v2715_v56  ;;  %1109 = vmatpush.msra.mxu1 %v2721_v58 }
 0x307   :  { %1129 = vmatpush.msra.mxu2 %v2727_v60  ;;  %1149 = vmatpush.msra.mxu3 %v2733_v43 }
 0x308   :  { %1090 = vmatpush.msra.mxu0 %v2739_v47  ;;  %1110 = vmatpush.msra.mxu1 %v2745_v38 }
 0x309   :  { %1130 = vmatpush.msra.mxu2 %v2751_v57  ;;  %1150 = vmatpush.msra.mxu3 %v2757_v61 }
 0x30a   :  { %1091 = vmatpush.msra.mxu0 %v2763_v49  ;;  %1111 = vmatpush.msra.mxu1 %v2769_v46 }
 0x30b   :  { %1131 = vmatpush.msra.mxu2 %v2775_v53  ;;  %1151 = vmatpush.msra.mxu3 %v2781_v63 }
 0x30c   :  { %1092 = vmatpush.msra.mxu0 %v2787_v59  ;;  %1112 = vmatpush.msra.mxu1 %v3615_v15 }
 0x30d   :  { %1132 = vmatpush.msra.mxu2 %v3616_v52  ;;  %1152 = vmatpush.msra.mxu3 %v3617_v54 }
 0x30e   :  { %1093 = vmatpush.msra.mxu0 %v3618_v0  ;;  %1113 = vmatpush.msra.mxu1 %v3619_v1 }
 0x30f   :  { %1133 = vmatpush.msra.mxu2 %v3620_v14  ;;  %1153 = vmatpush.msra.mxu3 %v3621_v19 }
 0x310   :  { %1094 = vmatpush.msra.mxu0 %v3622_v21  ;;  %1114 = vmatpush.msra.mxu1 %v3623_v17 }
 0x311   :  { %1134 = vmatpush.msra.mxu2 %v3624_v6  ;;  %1154 = vmatpush.msra.mxu3 %v3625_v5 }
 0x312   :  { %1095 = vmatpush.msra.mxu0 %v3626_v10  ;;  %1115 = vmatpush.msra.mxu1 %v3627_v12 }
 0x313   :  { %1135 = vmatpush.msra.mxu2 %v3628_v9  ;;  %1155 = vmatpush.msra.mxu3 %v3629_v22 }
 0x314   :  { %1096 = vmatpush.msra.mxu0 %v3630_v13  ;;  %1116 = vmatpush.msra.mxu1 %v3631_v18  ;;  %v3641_v13 = vld [vmem:[#allocation25_spill] sm:$0xff] }
 0x315   :  { %1136 = vmatpush.msra.mxu2 %v3632_v7  ;;  %1156 = vmatpush.msra.mxu3 %v3633_v23 }
 0x316   :  { %1097 = vmatpush.msra.mxu0 %v3634_v20  ;;  %1117 = vmatpush.msra.mxu1 %v3635_v4 }
 0x317   :  { %1137 = vmatpush.msra.mxu2 %v3636_v2  ;;  %1157 = vmatpush.msra.mxu3 %v3637_v16  ;;  %v1646_v2 = vld [vmem:[%s3393_s0 + $0x20] sm:$0xff] }
 0x318   :  { %1098 = vmatpush.msra.mxu0 %v3638_v3  ;;  %1118 = vmatpush.msra.mxu1 %v3639_v11 }
 0x319   :  { %1138 = vmatpush.msra.mxu2 %v3640_v8  ;;  %1158 = vmatpush.msra.mxu3 %v3641_v13 }
 0x375   :  { %v788_v18 = vpop.f32.mrf.mxu1  ;;  %v768_v12 = vpop.f32.mrf.mxu0 }
 0x376   :  { %v835_v7 = vrot.slane %v788_v18, 6 }
 0x378   :  { %v838_v16 = vsel %vm172_vm0, %v768_v12, %v835_v7 }
 0x37c   :  { %v808_v22 = vpop.f32.mrf.mxu2  ;;  %v828_v23 = vpop.f32.mrf.mxu3 }
 0x37d   :  { %v836_v9 = vrot.slane %v808_v22, 4  ;;  %v837_v20 = vrot.slane %v828_v23, 2 }
 0x37f   :  { %v839_v3 = vsel %vm174_vm1, %v836_v9, %v837_v20 }
 0x380   :  { %v840_v11 = vsel %vm176_vm2, %v838_v16, %v839_v3 }
 0x381   :  { %v842_v8 = vadd.f32 %v1646_v2, %v840_v11 }
 0x383   :  { %v1647_v4 = vmul.f32 -1.442695, %v842_v8  ;;  %v863_v13 = vrot.slane %v842_v8, 2  ;;  %v887_v10 = vrot.slane %v842_v8, 6  ;;  %v884_v2 = vrot.slane %v842_v8, 4 }
 0x385   :  { %1735 = vpow2.f32 %v1647_v4  ;;  %v1648_v18 = vmul.f32 -1.442695, %v863_v13  ;;  %v1649_v5 = vmul.f32 -1.442695, %v887_v10 }
 0x387   :  { %1737 = vpow2.f32 %v1648_v18 }
 0x388   :  { %1739 = vpow2.f32 %v1649_v5 }
 0x38b   :  { %v1736_v22 = vpop.eup %1735 }
 0x38c   :  { %v846_v23 = vadd.f32 1.0, %v1736_v22 }
 0x38d   :  { %v1738_v6 = vpop.eup %1737 }
 0x38e   :  { %v1740_v17 = vpop.eup %1739  ;;  %1741 = vrcp.f32 %v846_v23  ;;  %v868_v21 = vadd.f32 1.0, %v1738_v6  ;;  %v858_v13 = vand.u32 2147483648, %v846_v23  ;;  %v856_v18 = vand.u32 2147483647, %v846_v23 }
 0x38f   :  { %v892_v12 = vadd.f32 1.0, %v1740_v17  ;;  %vm852_vm13 = vweird.f32 %v846_v23 }
 0x390   :  { %1743 = vrcp.f32 %v868_v21  ;;  %v880_v22 = vand.u32 2147483648, %v868_v21  ;;  %v878_v19 = vand.u32 2147483647, %v868_v21  ;;  %v859_v14 = vor.u32 1.1754944e-38, %v858_v13 }
 0x391   :  { %1745 = vrcp.f32 %v892_v12  ;;  %vm857_vm3 = vcmp.eq.f32.partialorder %v856_v18, 8.507059e+37  ;;  %vm874_vm4 = vweird.f32 %v868_v21  ;;  %v904_v13 = vand.u32 2147483648, %v892_v12 }
 0x392   :  { %1747 = vtanh.f32 %v884_v2  ;;  %vm879_vm6 = vcmp.eq.f32.partialorder %v878_v19, 8.507059e+37  ;;  %vm898_vm8 = vweird.f32 %v892_v12 }
 0x394   :  { %v1742_v9 = vpop.eup %1741 }
 0x395   :  { %v848_v7 = vmul.f32 %v1742_v9, %v846_v23  ;;  %vm853_vm12 = vweird.f32 %v1742_v9 }
 0x396   :  { %v1744_v20 = vpop.eup %1743  ;;  %vm854_vm15 = vmor %vm852_vm13, %vm853_vm12 }
 0x397   :  { %v1746_v16 = vpop.eup %1745  ;;  %v849_v3 = vsub.f32 1.0, %v848_v7  ;;  %v870_v4 = vmul.f32 %v1744_v20, %v868_v21  ;;  %vm875_vm14 = vweird.f32 %v1744_v20  ;;  %v902_v21 = vand.u32 2147483647, %v892_v12 }
 0x398   :  { %v894_v10 = vmul.f32 %v1746_v16, %v892_v12  ;;  %vm876_vm5 = vmor %vm874_vm4, %vm875_vm14  ;;  %v1748_v54 = vpop.eup %1747  ;;  %vm899_vm7 = vweird.f32 %v1746_v16 }
 0x399   :  { %v871_v11 = vsub.f32 1.0, %v870_v4  ;;  %v850_v5 = vmul.f32 %v1742_v9, %v849_v3  ;;  %v881_v4 = vor.u32 1.1754944e-38, %v880_v22  ;;  %vm900_vm9 = vmor %vm898_vm8, %vm899_vm7  ;;  %vm903_vm10 = vcmp.eq.f32.partialorder %v902_v21, 8.507059e+37 }
 0x39a   :  { %v895_v1 = vsub.f32 1.0, %v894_v10 }
 0x39b   :  { %v851_v6 = vadd.f32 %v1742_v9, %v850_v5  ;;  %v872_v17 = vmul.f32 %v1744_v20, %v871_v11 }
 0x39c   :  { %v896_v23 = vmul.f32 %v1746_v16, %v895_v1 }
 0x39d   :  { %v855_v8 = vsel %vm854_vm15, %v1742_v9, %v851_v6  ;;  %v873_v7 = vadd.f32 %v1744_v20, %v872_v17  ;;  %v905_v9 = vor.u32 1.1754944e-38, %v904_v13 }
 0x39e   :  { %v860_v0 = vsel %vm857_vm3, %v859_v14, %v855_v8  ;;  %v897_v15 = vadd.f32 %v1746_v16, %v896_v23 }
 0x39f   :  { %v877_v3 = vsel %vm876_vm5, %v1744_v20, %v873_v7  ;;  %v909_v11 = vmul.f32 %v1748_v54, %v860_v0 }
 0x3a0   :  { %v882_v2 = vsel %vm879_vm6, %v881_v4, %v877_v3  ;;  %v901_v14 = vsel %vm900_vm9, %v1746_v16, %v897_v15 }
 0x3a1   :  { %v908_v5 = vmul.f32 %v882_v2, %v2959_v48  ;;  %v906_v20 = vsel %vm903_vm10, %v905_v9, %v901_v14 }
 0x3a3   :  { %v3033_v52 = vadd.f32 %v909_v11, %v908_v5 }
 0x3a5   :  { %1749 = vtanh.f32 %v3033_v52 }
 0x3ab   :  { %v1750_v19 = vpop.eup %1749 }
 0x3ac   :  { %v912_v10 = vmul.f32 %v1750_v19, %v906_v20 }
 0x3ae   :  { %914 = vst [vmem:[#allocation2 + $0x8] sm:$0x3] %v912_v10  ;;  %933 = vmatmul.f32.vlgmr.msrb.gmra.mxu0 %v912_v10  ;;  %953 = vmatmul.f32.vlgmr.msrb.gmra.mxu1 %v912_v10 }
 0x3af   :  { %973 = vmatmul.f32.vlgmr.msrb.gmra.mxu2 %v912_v10  ;;  %993 = vmatmul.f32.vlgmr.msrb.gmra.mxu3 %v912_v10 }
 0x3b0   :  { %1249 = vmatpush.msrb.mxu0 %v2571_v35  ;;  %1269 = vmatpush.msrb.mxu1 %v2577_v24  ;;  %v3642_v35 = vld [vmem:[#allocation7_spill] sm:$0xff] }
 0x3b1   :  { %1289 = vmatpush.msrb.mxu2 %v2583_v25  ;;  %1309 = vmatpush.msrb.mxu3 %v2589_v26  ;;  %v3643_v24 = vld [vmem:[#allocation3_spill] sm:$0xff]  ;;  %v3644_v25 = vld [vmem:[#allocation4_spill] sm:$0xff] }
 0x3b2   :  { %1250 = vmatpush.msrb.mxu0 %v2595_v27  ;;  %1270 = vmatpush.msrb.mxu1 %v2601_v28  ;;  %v3645_v26 = vld [vmem:[#allocation11_spill] sm:$0xff]  ;;  %v3646_v27 = vld [vmem:[#allocation10_spill] sm:$0xff]  ;;  %v3647_v28 = vld [vmem:[#allocation5_spill] sm:$0xff] }
 0x3b3   :  { %1290 = vmatpush.msrb.mxu2 %v2607_v29  ;;  %1310 = vmatpush.msrb.mxu3 %v2613_v30  ;;  %v3648_v29 = vld [vmem:[#allocation6_spill] sm:$0xff]  ;;  %v3649_v30 = vld [vmem:[#allocation15_spill] sm:$0xff] }
 0x3b4   :  { %1251 = vmatpush.msrb.mxu0 %v2619_v31  ;;  %1271 = vmatpush.msrb.mxu1 %v2625_v32  ;;  %v3650_v31 = vld [vmem:[#allocation14_spill] sm:$0xff]  ;;  %v3651_v32 = vld [vmem:[#allocation8_spill] sm:$0xff] }
 0x3b5   :  { %1291 = vmatpush.msrb.mxu2 %v2631_v33  ;;  %1311 = vmatpush.msrb.mxu3 %v2637_v34  ;;  %v3652_v33 = vld [vmem:[#allocation9_spill] sm:$0xff]  ;;  %v3653_v34 = vld [vmem:[#allocation19_spill] sm:$0xff] }
 0x3b6   :  { %1252 = vmatpush.msrb.mxu0 %v2643_v36  ;;  %1272 = vmatpush.msrb.mxu1 %v2649_v37  ;;  %v3654_v36 = vld [vmem:[#allocation18_spill] sm:$0xff]  ;;  %v3655_v37 = vld [vmem:[#allocation12_spill] sm:$0xff] }
 0x3b7   :  { %1292 = vmatpush.msrb.mxu2 %v2655_v40  ;;  %1312 = vmatpush.msrb.mxu3 %v2661_v41  ;;  %v3656_v40 = vld [vmem:[#allocation13_spill] sm:$0xff]  ;;  %v3657_v41 = vld [vmem:[#allocation23_spill] sm:$0xff] }
 0x3b8   :  { %1253 = vmatpush.msrb.mxu0 %v2667_v42  ;;  %1273 = vmatpush.msrb.mxu1 %v2673_v44  ;;  %v3658_v42 = vld [vmem:[#allocation22_spill] sm:$0xff]  ;;  %v3659_v44 = vld [vmem:[#allocation16_spill] sm:$0xff] }
 0x3b9   :  { %1293 = vmatpush.msrb.mxu2 %v2679_v45  ;;  %1313 = vmatpush.msrb.mxu3 %v2685_v55  ;;  %v3660_v45 = vld [vmem:[#allocation17_spill] sm:$0xff]  ;;  %v3661_v55 = vld [vmem:[#allocation27_spill] sm:$0xff] }
 0x3ba   :  { %1254 = vmatpush.msrb.mxu0 %v2691_v39  ;;  %1274 = vmatpush.msrb.mxu1 %v2697_v50  ;;  %v3662_v39 = vld [vmem:[#allocation26_spill] sm:$0xff]  ;;  %v3663_v50 = vld [vmem:[#allocation20_spill] sm:$0xff] }
 0x3bb   :  { %1294 = vmatpush.msrb.mxu2 %v2703_v62  ;;  %1314 = vmatpush.msrb.mxu3 %v2709_v51  ;;  %v3664_v62 = vld [vmem:[#allocation21_spill] sm:$0xff] }
 0x3bc   :  { %1255 = vmatpush.msrb.mxu0 %v2715_v56  ;;  %1275 = vmatpush.msrb.mxu1 %v2721_v58  ;;  %v3665_v51 = vld [vmem:[#allocation29_spill] sm:$0xff]  ;;  %v3666_v56 = vld [vmem:[#allocation28_spill] sm:$0xff] }
 0x3bd   :  { %1295 = vmatpush.msrb.mxu2 %v2727_v60  ;;  %1315 = vmatpush.msrb.mxu3 %v2733_v43  ;;  %v3667_v58 = vld [vmem:[#allocation24_spill] sm:$0xff]  ;;  %v3668_v60 = vld [vmem:[#allocation25_spill] sm:$0xff] }
 0x3be   :  { %1256 = vmatpush.msrb.mxu0 %v2739_v47  ;;  %1276 = vmatpush.msrb.mxu1 %v2745_v38 }
 0x3bf   :  { %1296 = vmatpush.msrb.mxu2 %v2751_v57  ;;  %1316 = vmatpush.msrb.mxu3 %v2757_v61 }
 0x3c0   :  { %1257 = vmatpush.msrb.mxu0 %v2763_v49  ;;  %1277 = vmatpush.msrb.mxu1 %v2769_v46 }
 0x3c1   :  { %1297 = vmatpush.msrb.mxu2 %v2775_v53  ;;  %1317 = vmatpush.msrb.mxu3 %v2781_v63  ;;  %v1650_v53 = vld [vmem:[%s3393_s0 + $0x28] sm:$0xff] }
 0x3c2   :  { %1258 = vmatpush.msrb.mxu0 %v2787_v59  ;;  %1278 = vmatpush.msrb.mxu1 %v3642_v35 }
 0x3c3   :  { %1298 = vmatpush.msrb.mxu2 %v3643_v24  ;;  %1318 = vmatpush.msrb.mxu3 %v3644_v25 }
 0x3c4   :  { %1259 = vmatpush.msrb.mxu0 %v3645_v26  ;;  %1279 = vmatpush.msrb.mxu1 %v3646_v27 }
 0x3c5   :  { %1299 = vmatpush.msrb.mxu2 %v3647_v28  ;;  %1319 = vmatpush.msrb.mxu3 %v3648_v29 }
 0x3c6   :  { %1260 = vmatpush.msrb.mxu0 %v3649_v30  ;;  %1280 = vmatpush.msrb.mxu1 %v3650_v31 }
 0x3c7   :  { %1300 = vmatpush.msrb.mxu2 %v3651_v32  ;;  %1320 = vmatpush.msrb.mxu3 %v3652_v33 }
 0x3c8   :  { %1261 = vmatpush.msrb.mxu0 %v3653_v34  ;;  %1281 = vmatpush.msrb.mxu1 %v3654_v36 }
 0x3c9   :  { %1301 = vmatpush.msrb.mxu2 %v3655_v37  ;;  %1321 = vmatpush.msrb.mxu3 %v3656_v40 }
 0x3ca   :  { %1262 = vmatpush.msrb.mxu0 %v3657_v41  ;;  %1282 = vmatpush.msrb.mxu1 %v3658_v42 }
 0x3cb   :  { %1302 = vmatpush.msrb.mxu2 %v3659_v44  ;;  %1322 = vmatpush.msrb.mxu3 %v3660_v45 }
 0x3cc   :  { %1263 = vmatpush.msrb.mxu0 %v3661_v55  ;;  %1283 = vmatpush.msrb.mxu1 %v3662_v39 }
 0x3cd   :  { %1303 = vmatpush.msrb.mxu2 %v3663_v50  ;;  %1323 = vmatpush.msrb.mxu3 %v3664_v62 }
 0x3ce   :  { %1264 = vmatpush.msrb.mxu0 %v3665_v51  ;;  %1284 = vmatpush.msrb.mxu1 %v3666_v56  ;;  %v3121_v56 = vld [vmem:[%s3394_s2 + $0x70] sm:$0xff] }
 0x3cf   :  { %1304 = vmatpush.msrb.mxu2 %v3667_v58  ;;  %1324 = vmatpush.msrb.mxu3 %v3668_v60  ;;  %v3130_v58 = vld [vmem:[%s3394_s2 + $0x68] sm:$0xff]  ;;  %v3139_v60 = vld [vmem:[%s3394_s2 + $0x60] sm:$0xff] }
 0x42b   :  { %v954_v43 = vpop.f32.mrf.mxu1  ;;  %v934_v46 = vpop.f32.mrf.mxu0 }
 0x42c   :  { %v1001_v47 = vrot.slane %v954_v43, 6  ;;  %v3148_v43 = vld [vmem:[%s3394_s2 + $0x58] sm:$0xff] }
 0x42e   :  { %v1004_v63 = vsel %vm172_vm0, %v934_v46, %v1001_v47 }
 0x432   :  { %v974_v38 = vpop.f32.mrf.mxu2  ;;  %v994_v57 = vpop.f32.mrf.mxu3 }
 0x433   :  { %v1002_v61 = vrot.slane %v974_v38, 4  ;;  %v1003_v49 = vrot.slane %v994_v57, 2  ;;  %v3157_v38 = vld [vmem:[%s3394_s2 + $0x50] sm:$0xff]  ;;  %v3162_v57 = vld [vmem:[%s3394_s2 + $0x48] sm:$0xff] }
 0x435   :  { %v1005_v59 = vsel %vm174_vm1, %v1002_v61, %v1003_v49  ;;  %v3171_v49 = vld [vmem:[%s3394_s2 + $0x40] sm:$0xff] }
 0x436   :  { %v1006_v48 = vsel %vm176_vm2, %v1004_v63, %v1005_v59 }
 0x437   :  { %v1008_v15 = vadd.f32 %v1650_v53, %v1006_v48  ;;  %v3180_v48 = vld [vmem:[%s3394_s2 + $0x38] sm:$0xff] }
 0x439   :  { %v1651_v54 = vmul.f32 -1.442695, %v1008_v15  ;;  %v1029_v0 = vrot.slane %v1008_v15, 2  ;;  %v1053_v1 = vrot.slane %v1008_v15, 6  ;;  %v1050_v23 = vrot.slane %v1008_v15, 4 }
 0x43b   :  { %1751 = vpow2.f32 %v1651_v54  ;;  %v1652_v12 = vmul.f32 -1.442695, %v1029_v0  ;;  %v1653_v16 = vmul.f32 -1.442695, %v1053_v1  ;;  %v1654_v54 = vld [vmem:[%s3393_s0 + $0x30] sm:$0xff] }
 0x43d   :  { %1753 = vpow2.f32 %v1652_v12  ;;  %v3194_v12 = vld [vmem:[%s3394_s2 + $0x30] sm:$0xff] }
 0x43e   :  { %1755 = vpow2.f32 %v1653_v16 }
 0x441   :  { %v1752_v18 = vpop.eup %1751 }
 0x442   :  { %v1012_v22 = vadd.f32 1.0, %v1752_v18 }
 0x443   :  { %v1754_v6 = vpop.eup %1753 }
 0x444   :  { %v1756_v17 = vpop.eup %1755  ;;  %1757 = vrcp.f32 %v1012_v22  ;;  %v1034_v8 = vadd.f32 1.0, %v1754_v6  ;;  %v1024_v21 = vand.u32 2147483648, %v1012_v22  ;;  %v1022_v20 = vand.u32 2147483647, %v1012_v22 }
 0x445   :  { %v1058_v7 = vadd.f32 1.0, %v1756_v17  ;;  %vm1018_vm12 = vweird.f32 %v1012_v22 }
 0x446   :  { %1759 = vrcp.f32 %v1034_v8  ;;  %v1046_v10 = vand.u32 2147483648, %v1034_v8  ;;  %v1044_v25 = vand.u32 2147483647, %v1034_v8  ;;  %v1025_v26 = vor.u32 1.1754944e-38, %v1024_v21 }
 0x447   :  { %1761 = vrcp.f32 %v1058_v7  ;;  %vm1023_vm15 = vcmp.eq.f32.partialorder %v1022_v20, 8.507059e+37  ;;  %vm1040_vm3 = vweird.f32 %v1034_v8  ;;  %v1070_v44 = vand.u32 2147483648, %v1058_v7 }
 0x448   :  { %1763 = vtanh.f32 %v1050_v23  ;;  %v1047_v31 = vor.u32 1.1754944e-38, %v1046_v10  ;;  %vm1045_vm5 = vcmp.eq.f32.partialorder %v1044_v25, 8.507059e+37  ;;  %vm1064_vm7 = vweird.f32 %v1058_v7  ;;  %v3236_v23 = vld [vmem:[%s3394_s2 + $0x10] sm:$0xff] }
 0x449   :  { %v1068_v45 = vand.u32 2147483647, %v1058_v7  ;;  %v1071_v39 = vor.u32 1.1754944e-38, %v1070_v44 }
 0x44a   :  { %v1758_v4 = vpop.eup %1757 }
 0x44b   :  { %v1014_v3 = vmul.f32 %v1758_v4, %v1012_v22  ;;  %vm1019_vm11 = vweird.f32 %v1758_v4  ;;  %vm1069_vm9 = vcmp.eq.f32.partialorder %v1068_v45, 8.507059e+37  ;;  %v3206_v22 = vld [vmem:[%s3394_s2 + $0x28] sm:$0xff] }
 0x44c   :  { %v1760_v2 = vpop.eup %1759  ;;  %vm1020_vm14 = vmor %vm1018_vm12, %vm1019_vm11 }
 0x44d   :  { %v1762_v5 = vpop.eup %1761  ;;  %v1015_v11 = vsub.f32 1.0, %v1014_v3  ;;  %v1036_v13 = vmul.f32 %v1760_v2, %v1034_v8  ;;  %vm1041_vm13 = vweird.f32 %v1760_v2 }
 0x44e   :  { %v1060_v14 = vmul.f32 %v1762_v5, %v1058_v7  ;;  %vm1042_vm4 = vmor %vm1040_vm3, %vm1041_vm13  ;;  %v1764_v33 = vpop.eup %1763  ;;  %vm1065_vm6 = vweird.f32 %v1762_v5  ;;  %v3218_v7 = vld [vmem:[%s3394_s2 + $0x20] sm:$0xff] }
 0x44f   :  { %v1037_v9 = vsub.f32 1.0, %v1036_v13  ;;  %v1016_v19 = vmul.f32 %v1758_v4, %v1015_v11  ;;  %vm1066_vm8 = vmor %vm1064_vm7, %vm1065_vm6  ;;  %v3254_v13 = vld [vmem:[%s3394_s2] sm:$0xff] }
 0x450   :  { %v1061_v27 = vsub.f32 1.0, %v1060_v14 }
 0x451   :  { %v1017_v35 = vadd.f32 %v1758_v4, %v1016_v19  ;;  %v1038_v24 = vmul.f32 %v1760_v2, %v1037_v9 }
 0x452   :  { %v1062_v36 = vmul.f32 %v1762_v5, %v1061_v27 }
 0x453   :  { %v1021_v28 = vsel %vm1020_vm14, %v1758_v4, %v1017_v35  ;;  %v1039_v29 = vadd.f32 %v1760_v2, %v1038_v24 }
 0x454   :  { %v1026_v30 = vsel %vm1023_vm15, %v1025_v26, %v1021_v28  ;;  %v1063_v42 = vadd.f32 %v1762_v5, %v1062_v36 }
 0x455   :  { %v1043_v32 = vsel %vm1042_vm4, %v1760_v2, %v1039_v29  ;;  %v1075_v40 = vmul.f32 %v1764_v33, %v1026_v30  ;;  %v3227_v2 = vld [vmem:[%s3394_s2 + $0x18] sm:$0xff] }
 0x456   :  { %v1048_v34 = vsel %vm1045_vm5, %v1047_v31, %v1043_v32  ;;  %v1067_v55 = vsel %vm1066_vm8, %v1762_v5, %v1063_v42  ;;  %v3245_v5 = vld [vmem:[%s3394_s2 + $0x8] sm:$0xff] }
 0x457   :  { %v1074_v37 = vmul.f32 %v1048_v34, %v3033_v52  ;;  %v1072_v62 = vsel %vm1069_vm9, %v1071_v39, %v1067_v55  ;;  %v3113_v52 = vld [vmem:[%s3394_s2 + $0x78] sm:$0xff]  ;;  %vm1456_vm9 = vcmask 25600  }
 0x459   :  { %v3107_v41 = vadd.f32 %v1075_v40, %v1074_v37 }
 0x45b   :  { %1765 = vtanh.f32 %v3107_v41 }
 0x461   :  { %v1766_v50 = vpop.eup %1765 }
 0x462   :  { %v1078_v51 = vmul.f32 %v1766_v50, %v1072_v62 }
 0x464   :  { %1080 = vst [vmem:[#allocation2 + $0xa] sm:$0x3] %v1078_v51  ;;  %1099 = vmatmul.f32.vlgmr.msra.gmra.mxu0 %v1078_v51  ;;  %1119 = vmatmul.f32.vlgmr.msra.gmra.mxu1 %v1078_v51 }
 0x465   :  { %1139 = vmatmul.f32.vlgmr.msra.gmra.mxu2 %v1078_v51  ;;  %1159 = vmatmul.f32.vlgmr.msra.gmra.mxu3 %v1078_v51 }
 0x466   :  { %1436 = vmatpush.msra.mxu0 %v3113_v52  ;;  %1459 = vmatpush.msra.mxu1 %v3113_v52 }
 0x467   :  { %1482 = vmatpush.msra.mxu2 %v3113_v52  ;;  %1505 = vmatpush.msra.mxu3 %v3113_v52 }
 0x468   :  { %1437 = vmatpush.msra.mxu0 %v3121_v56  ;;  %1460 = vmatpush.msra.mxu1 %v3121_v56 }
 0x469   :  { %1483 = vmatpush.msra.mxu2 %v3121_v56  ;;  %1506 = vmatpush.msra.mxu3 %v3121_v56 }
 0x46a   :  { %1438 = vmatpush.msra.mxu0 %v3130_v58  ;;  %1461 = vmatpush.msra.mxu1 %v3130_v58 }
 0x46b   :  { %1484 = vmatpush.msra.mxu2 %v3130_v58  ;;  %1507 = vmatpush.msra.mxu3 %v3130_v58 }
 0x46c   :  { %1439 = vmatpush.msra.mxu0 %v3139_v60  ;;  %1462 = vmatpush.msra.mxu1 %v3139_v60 }
 0x46d   :  { %1485 = vmatpush.msra.mxu2 %v3139_v60  ;;  %1508 = vmatpush.msra.mxu3 %v3139_v60 }
 0x46e   :  { %1440 = vmatpush.msra.mxu0 %v3148_v43  ;;  %1463 = vmatpush.msra.mxu1 %v3148_v43 }
 0x46f   :  { %1486 = vmatpush.msra.mxu2 %v3148_v43  ;;  %1509 = vmatpush.msra.mxu3 %v3148_v43 }
 0x470   :  { %1441 = vmatpush.msra.mxu0 %v3157_v38  ;;  %1464 = vmatpush.msra.mxu1 %v3157_v38 }
 0x471   :  { %1487 = vmatpush.msra.mxu2 %v3157_v38  ;;  %1510 = vmatpush.msra.mxu3 %v3157_v38 }
 0x472   :  { %1442 = vmatpush.msra.mxu0 %v3162_v57  ;;  %1465 = vmatpush.msra.mxu1 %v3162_v57 }
 0x473   :  { %1488 = vmatpush.msra.mxu2 %v3162_v57  ;;  %1511 = vmatpush.msra.mxu3 %v3162_v57 }
 0x474   :  { %1443 = vmatpush.msra.mxu0 %v3171_v49  ;;  %1466 = vmatpush.msra.mxu1 %v3171_v49 }
 0x475   :  { %1489 = vmatpush.msra.mxu2 %v3171_v49  ;;  %1512 = vmatpush.msra.mxu3 %v3171_v49 }
 0x476   :  { %1444 = vmatpush.msra.mxu0 %v3180_v48  ;;  %1467 = vmatpush.msra.mxu1 %v3180_v48 }
 0x477   :  { %1490 = vmatpush.msra.mxu2 %v3180_v48  ;;  %1513 = vmatpush.msra.mxu3 %v3180_v48 }
 0x478   :  { %1445 = vmatpush.msra.mxu0 %v3194_v12  ;;  %1468 = vmatpush.msra.mxu1 %v3194_v12 }
 0x479   :  { %1491 = vmatpush.msra.mxu2 %v3194_v12  ;;  %1514 = vmatpush.msra.mxu3 %v3194_v12 }
 0x47a   :  { %1446 = vmatpush.msra.mxu0 %v3206_v22  ;;  %1469 = vmatpush.msra.mxu1 %v3206_v22 }
 0x47b   :  { %1492 = vmatpush.msra.mxu2 %v3206_v22  ;;  %1515 = vmatpush.msra.mxu3 %v3206_v22 }
 0x47c   :  { %1447 = vmatpush.msra.mxu0 %v3218_v7  ;;  %1470 = vmatpush.msra.mxu1 %v3218_v7 }
 0x47d   :  { %1493 = vmatpush.msra.mxu2 %v3218_v7  ;;  %1516 = vmatpush.msra.mxu3 %v3218_v7 }
 0x47e   :  { %1448 = vmatpush.msra.mxu0 %v3227_v2  ;;  %1471 = vmatpush.msra.mxu1 %v3227_v2 }
 0x47f   :  { %1494 = vmatpush.msra.mxu2 %v3227_v2  ;;  %1517 = vmatpush.msra.mxu3 %v3227_v2 }
 0x480   :  { %1449 = vmatpush.msra.mxu0 %v3236_v23  ;;  %1472 = vmatpush.msra.mxu1 %v3236_v23 }
 0x481   :  { %1495 = vmatpush.msra.mxu2 %v3236_v23  ;;  %1518 = vmatpush.msra.mxu3 %v3236_v23 }
 0x482   :  { %1450 = vmatpush.msra.mxu0 %v3245_v5  ;;  %1473 = vmatpush.msra.mxu1 %v3245_v5 }
 0x483   :  { %1496 = vmatpush.msra.mxu2 %v3245_v5  ;;  %1519 = vmatpush.msra.mxu3 %v3245_v5 }
 0x484   :  { %1451 = vmatpush.msra.mxu0 %v3254_v13  ;;  %1474 = vmatpush.msra.mxu1 %v3254_v13 }
 0x485   :  { %1497 = vmatpush.msra.mxu2 %v3254_v13  ;;  %1520 = vmatpush.msra.mxu3 %v3254_v13 }
 0x4e1   :  { %v1120_v47 = vpop.f32.mrf.mxu1  ;;  %v1100_v15 = vpop.f32.mrf.mxu0 }
 0x4e2   :  { %v1167_v61 = vrot.slane %v1120_v47, 6 }
 0x4e4   :  { %v1170_v0 = vsel %vm172_vm0, %v1100_v15, %v1167_v61 }
 0x4e8   :  { %v1140_v46 = vpop.f32.mrf.mxu2  ;;  %v1160_v53 = vpop.f32.mrf.mxu3 }
 0x4e9   :  { %v1168_v63 = vrot.slane %v1140_v46, 4  ;;  %v1169_v59 = vrot.slane %v1160_v53, 2 }
 0x4eb   :  { %v1171_v1 = vsel %vm174_vm1, %v1168_v63, %v1169_v59 }
 0x4ec   :  { %v1172_v16 = vsel %vm176_vm2, %v1170_v0, %v1171_v1 }
 0x4ed   :  { %v3200_v18 = vadd.f32 %v1654_v54, %v1172_v16 }
 0x4ef   :  { %v1655_v6 = vmul.f32 -1.442695, %v3200_v18  ;;  %v1195_v17 = vrot.slane %v3200_v18, 2  ;;  %v1219_v8 = vrot.slane %v3200_v18, 6  ;;  %v1216_v25 = vrot.slane %v3200_v18, 4 }
 0x4f1   :  { %1767 = vpow2.f32 %v1655_v6  ;;  %v1656_v4 = vmul.f32 -1.442695, %v1195_v17  ;;  %v1657_v3 = vmul.f32 -1.442695, %v1219_v8  ;;  %v1481_v17 = vld [vmem:[#allocation2 + $0x4] sm:$0x3] }
 0x4f3   :  { %1769 = vpow2.f32 %v1656_v4  ;;  %v1658_v4 = vld [vmem:[%s3393_s0 + $0x38] sm:$0xff] }
 0x4f4   :  { %1771 = vpow2.f32 %v1657_v3 }
 0x4f7   :  { %v1768_v11 = vpop.eup %1767 }
 0x4f8   :  { %v1178_v21 = vadd.f32 1.0, %v1768_v11 }
 0x4f9   :  { %v1770_v14 = vpop.eup %1769 }
 0x4fa   :  { %v1772_v9 = vpop.eup %1771  ;;  %1773 = vrcp.f32 %v1178_v21  ;;  %v1200_v19 = vadd.f32 1.0, %v1770_v14  ;;  %v1190_v29 = vand.u32 2147483648, %v1178_v21  ;;  %v1188_v33 = vand.u32 2147483647, %v1178_v21 }
 0x4fb   :  { %v1224_v20 = vadd.f32 1.0, %v1772_v9  ;;  %vm1184_vm11 = vweird.f32 %v1178_v21 }
 0x4fc   :  { %1775 = vrcp.f32 %v1200_v19  ;;  %v1212_v34 = vand.u32 2147483648, %v1200_v19  ;;  %v1210_v40 = vand.u32 2147483647, %v1200_v19  ;;  %v1191_v42 = vor.u32 1.1754944e-38, %v1190_v29 }
 0x4fd   :  { %1777 = vrcp.f32 %v1224_v20  ;;  %vm1189_vm14 = vcmp.eq.f32.partialorder %v1188_v33, 8.507059e+37  ;;  %vm1206_vm15 = vweird.f32 %v1200_v19  ;;  %v1236_v15 = vand.u32 2147483648, %v1224_v20 }
 0x4fe   :  { %1779 = vtanh.f32 %v1216_v25  ;;  %v1213_v50 = vor.u32 1.1754944e-38, %v1212_v34  ;;  %vm1211_vm4 = vcmp.eq.f32.partialorder %v1210_v40, 8.507059e+37  ;;  %vm1230_vm6 = vweird.f32 %v1224_v20 }
 0x4ff   :  { %v1234_v54 = vand.u32 2147483647, %v1224_v20  ;;  %v1237_v1 = vor.u32 1.1754944e-38, %v1236_v15 }
 0x500   :  { %v1774_v10 = vpop.eup %1773 }
 0x501   :  { %v1180_v35 = vmul.f32 %v1774_v10, %v1178_v21  ;;  %vm1185_vm10 = vweird.f32 %v1774_v10  ;;  %vm1235_vm8 = vcmp.eq.f32.partialorder %v1234_v54, 8.507059e+37 }
 0x502   :  { %v1776_v24 = vpop.eup %1775  ;;  %vm1186_vm13 = vmor %vm1184_vm11, %vm1185_vm10 }
 0x503   :  { %v1778_v26 = vpop.eup %1777  ;;  %v1181_v27 = vsub.f32 1.0, %v1180_v35  ;;  %v1202_v28 = vmul.f32 %v1776_v24, %v1200_v19  ;;  %vm1207_vm12 = vweird.f32 %v1776_v24 }
 0x504   :  { %v1226_v30 = vmul.f32 %v1778_v26, %v1224_v20  ;;  %vm1208_vm3 = vmor %vm1206_vm15, %vm1207_vm12  ;;  %v1780_v51 = vpop.eup %1779  ;;  %vm1231_vm5 = vweird.f32 %v1778_v26 }
 0x505   :  { %v1203_v31 = vsub.f32 1.0, %v1202_v28  ;;  %v1182_v32 = vmul.f32 %v1774_v10, %v1181_v27  ;;  %vm1232_vm7 = vmor %vm1230_vm6, %vm1231_vm5 }
 0x506   :  { %v1227_v44 = vsub.f32 1.0, %v1226_v30 }
 0x507   :  { %v1183_v36 = vadd.f32 %v1774_v10, %v1182_v32  ;;  %v1204_v37 = vmul.f32 %v1776_v24, %v1203_v31 }
 0x508   :  { %v1228_v61 = vmul.f32 %v1778_v26, %v1227_v44 }
 0x509   :  { %v1187_v45 = vsel %vm1186_vm13, %v1774_v10, %v1183_v36  ;;  %v1205_v55 = vadd.f32 %v1776_v24, %v1204_v37 }
 0x50a   :  { %v1192_v39 = vsel %vm1189_vm14, %v1191_v42, %v1187_v45  ;;  %v1229_v59 = vadd.f32 %v1778_v26, %v1228_v61 }
 0x50b   :  { %v1209_v62 = vsel %vm1208_vm3, %v1776_v24, %v1205_v55  ;;  %v1241_v53 = vmul.f32 %v1780_v51, %v1192_v39 }
 0x50c   :  { %v1214_v47 = vsel %vm1211_vm4, %v1213_v50, %v1209_v62  ;;  %v1233_v0 = vsel %vm1232_vm7, %v1778_v26, %v1229_v59 }
 0x50d   :  { %v1240_v46 = vmul.f32 %v1214_v47, %v3107_v41  ;;  %v1238_v18 = vsel %vm1235_vm8, %v1237_v1, %v1233_v0  ;;  %v1432_v41 = vld [vmem:[#allocation2] sm:$0x3] }
 0x50f   :  { %v3267_v63 = vadd.f32 %v1241_v53, %v1240_v46 }
 0x511   :  { %1781 = vtanh.f32 %v3267_v63 }
 0x517   :  { %v1782_v16 = vpop.eup %1781 }
 0x518   :  { %v1244_v6 = vmul.f32 %v1782_v16, %v1238_v18 }
 0x51a   :  { %1246 = vst [vmem:[#allocation2 + $0xc] sm:$0x3] %v1244_v6  ;;  %1265 = vmatmul.f32.vlgmr.msrb.gmra.mxu0 %v1244_v6  ;;  %1285 = vmatmul.f32.vlgmr.msrb.gmra.mxu1 %v1244_v6 }
 0x51b   :  { %1305 = vmatmul.f32.vlgmr.msrb.gmra.mxu2 %v1244_v6  ;;  %1325 = vmatmul.f32.vlgmr.msrb.gmra.mxu3 %v1244_v6 }
 0x51c   :  { %1528 = vmatpush.msrb.mxu0 %v3113_v52  ;;  %1551 = vmatpush.msrb.mxu1 %v3113_v52 }
 0x51d   :  { %1574 = vmatpush.msrb.mxu2 %v3113_v52  ;;  %1597 = vmatpush.msrb.mxu3 %v3113_v52  ;;  %v1458_v52 = vld [vmem:[#allocation2 + $0x2] sm:$0x3] }
 0x51e   :  { %1529 = vmatpush.msrb.mxu0 %v3121_v56  ;;  %1552 = vmatpush.msrb.mxu1 %v3121_v56 }
 0x51f   :  { %1575 = vmatpush.msrb.mxu2 %v3121_v56  ;;  %1598 = vmatpush.msrb.mxu3 %v3121_v56  ;;  %v1504_v56 = vld [vmem:[#allocation2 + $0x6] sm:$0x3] }
 0x520   :  { %1530 = vmatpush.msrb.mxu0 %v3130_v58  ;;  %1553 = vmatpush.msrb.mxu1 %v3130_v58 }
 0x521   :  { %1576 = vmatpush.msrb.mxu2 %v3130_v58  ;;  %1599 = vmatpush.msrb.mxu3 %v3130_v58  ;;  %v1527_v58 = vld [vmem:[#allocation2 + $0x8] sm:$0x3] }
 0x522   :  { %1531 = vmatpush.msrb.mxu0 %v3139_v60  ;;  %1554 = vmatpush.msrb.mxu1 %v3139_v60 }
 0x523   :  { %1577 = vmatpush.msrb.mxu2 %v3139_v60  ;;  %1452 = vmatmul.f32.vlgmr.msra.gmra.mxu0 %v1432_v41 }
 0x524   :  { %1475 = vmatmul.f32.vlgmr.msra.gmra.mxu1 %v1458_v52  ;;  %1498 = vmatmul.f32.vlgmr.msra.gmra.mxu2 %v1481_v17 }
 0x525   :  { %1521 = vmatmul.f32.vlgmr.msra.gmra.mxu3 %v1504_v56  ;;  %1532 = vmatpush.msrb.mxu0 %v3148_v43 }
 0x526   :  { %1555 = vmatpush.msrb.mxu1 %v3148_v43  ;;  %1578 = vmatpush.msrb.mxu2 %v3148_v43 }
 0x527   :  { %1533 = vmatpush.msrb.mxu0 %v3157_v38  ;;  %1600 = vmatpush.msrb.mxu3 %v3139_v60  ;;  %v1550_v60 = vld [vmem:[#allocation2 + $0xa] sm:$0x3] }
 0x528   :  { %1556 = vmatpush.msrb.mxu1 %v3157_v38  ;;  %1579 = vmatpush.msrb.mxu2 %v3157_v38 }
 0x529   :  { %1534 = vmatpush.msrb.mxu0 %v3162_v57  ;;  %1601 = vmatpush.msrb.mxu3 %v3148_v43  ;;  %v1573_v43 = vld [vmem:[#allocation2 + $0xc] sm:$0x3] }
 0x52a   :  { %1557 = vmatpush.msrb.mxu1 %v3162_v57  ;;  %1580 = vmatpush.msrb.mxu2 %v3162_v57 }
 0x52b   :  { %1535 = vmatpush.msrb.mxu0 %v3171_v49  ;;  %1602 = vmatpush.msrb.mxu3 %v3157_v38 }
 0x52c   :  { %1558 = vmatpush.msrb.mxu1 %v3171_v49  ;;  %1581 = vmatpush.msrb.mxu2 %v3171_v49 }
 0x52d   :  { %1536 = vmatpush.msrb.mxu0 %v3180_v48  ;;  %1603 = vmatpush.msrb.mxu3 %v3162_v57 }
 0x52e   :  { %1559 = vmatpush.msrb.mxu1 %v3180_v48  ;;  %1582 = vmatpush.msrb.mxu2 %v3180_v48 }
 0x52f   :  { %1537 = vmatpush.msrb.mxu0 %v3194_v12  ;;  %1604 = vmatpush.msrb.mxu3 %v3171_v49 }
 0x530   :  { %1560 = vmatpush.msrb.mxu1 %v3194_v12  ;;  %1583 = vmatpush.msrb.mxu2 %v3194_v12 }
 0x531   :  { %1538 = vmatpush.msrb.mxu0 %v3206_v22  ;;  %1605 = vmatpush.msrb.mxu3 %v3180_v48  ;;  %v3337_v48 = vld [vmem:[%s3395_s3] ss:$0 sm:$0xff] }
 0x532   :  { %1561 = vmatpush.msrb.mxu1 %v3206_v22  ;;  %1584 = vmatpush.msrb.mxu2 %v3206_v22 }
 0x533   :  { %1539 = vmatpush.msrb.mxu0 %v3218_v7  ;;  %1606 = vmatpush.msrb.mxu3 %v3194_v12 }
 0x534   :  { %1562 = vmatpush.msrb.mxu1 %v3218_v7  ;;  %1585 = vmatpush.msrb.mxu2 %v3218_v7 }
 0x535   :  { %1540 = vmatpush.msrb.mxu0 %v3227_v2  ;;  %1607 = vmatpush.msrb.mxu3 %v3206_v22 }
 0x536   :  { %1563 = vmatpush.msrb.mxu1 %v3227_v2  ;;  %1586 = vmatpush.msrb.mxu2 %v3227_v2 }
 0x537   :  { %1541 = vmatpush.msrb.mxu0 %v3236_v23  ;;  %1608 = vmatpush.msrb.mxu3 %v3218_v7 }
 0x538   :  { %1564 = vmatpush.msrb.mxu1 %v3236_v23  ;;  %1587 = vmatpush.msrb.mxu2 %v3236_v23 }
 0x539   :  { %1542 = vmatpush.msrb.mxu0 %v3245_v5  ;;  %1609 = vmatpush.msrb.mxu3 %v3227_v2 }
 0x53a   :  { %1565 = vmatpush.msrb.mxu1 %v3245_v5  ;;  %1588 = vmatpush.msrb.mxu2 %v3245_v5 }
 0x53b   :  { %1543 = vmatpush.msrb.mxu0 %v3254_v13  ;;  %1610 = vmatpush.msrb.mxu3 %v3236_v23 }
 0x53c   :  { %1566 = vmatpush.msrb.mxu1 %v3254_v13  ;;  %1589 = vmatpush.msrb.mxu2 %v3254_v13 }
 0x53d   :  { %1544 = vmatmul.f32.vlgmr.msrb.gmra.mxu0 %v1527_v58  ;;  %1567 = vmatmul.f32.vlgmr.msrb.gmra.mxu1 %v1550_v60 }
 0x53e   :  { %1590 = vmatmul.f32.vlgmr.msrb.gmra.mxu2 %v1573_v43  ;;  %1611 = vmatpush.msrb.mxu3 %v3245_v5 }
 0x540   :  { %1612 = vmatpush.msrb.mxu3 %v3254_v13 }
 0x597   :  { %v1266_v38 = vpop.f32.mrf.mxu0  ;;  %v1286_v57 = vpop.f32.mrf.mxu1 }
 0x598   :  { %v1333_v49 = vrot.slane %v1286_v57, 6 }
 0x59a   :  { %v1336_v2 = vsel %vm172_vm0, %v1266_v38, %v1333_v49 }
 0x59e   :  { %v1306_v12 = vpop.f32.mrf.mxu2  ;;  %v1326_v22 = vpop.f32.mrf.mxu3 }
 0x59f   :  { %v1334_v8 = vrot.slane %v1306_v12, 4  ;;  %v1335_v7 = vrot.slane %v1326_v22, 2 }
 0x5a0   :  { %v1453_v3 = vpop.f32.mrf.mxu0 }
 0x5a1   :  { %v1337_v23 = vsel %vm174_vm1, %v1334_v8, %v1335_v7  ;;  %v1454_v5 = vadd.f32 %v3337_v48, %v1453_v3  ;;  %v1476_v11 = vpop.f32.mrf.mxu1 }
 0x5a2   :  { %v1338_v13 = vsel %vm176_vm2, %v1336_v2, %v1337_v23  ;;  %v1477_v21 = vadd.f32 %v3337_v48, %v1476_v11 }
 0x5a3   :  { %v1340_v14 = vadd.f32 %v1658_v4, %v1338_v13  ;;  %1457 = vst.msk [vmem:[%s3396_s4] sm:$0x3] %vm1456_vm9, %v1454_v5 }
 0x5a4   :  { %1662 = vst.msk [vmem:[%s3396_s4 + $0x2] sm:$0x3] %vm1456_vm9, %v1477_v21 }
 0x5a5   :  { %v1659_v9 = vmul.f32 -1.442695, %v1340_v14  ;;  %v1361_v19 = vrot.slane %v1340_v14, 2  ;;  %v1385_v20 = vrot.slane %v1340_v14, 6  ;;  %v1382_v42 = vrot.slane %v1340_v14, 4 }
 0x5a7   :  { %1783 = vpow2.f32 %v1659_v9  ;;  %v1660_v10 = vmul.f32 -1.442695, %v1361_v19  ;;  %v1661_v35 = vmul.f32 -1.442695, %v1385_v20  ;;  %v1499_v24 = vpop.f32.mrf.mxu2 }
 0x5a8   :  { %v1500_v25 = vadd.f32 %v3337_v48, %v1499_v24  ;;  %v1522_v26 = vpop.f32.mrf.mxu3 }
 0x5a9   :  { %1785 = vpow2.f32 %v1660_v10  ;;  %v1523_v27 = vadd.f32 %v3337_v48, %v1522_v26 }
 0x5aa   :  { %1787 = vpow2.f32 %v1661_v35  ;;  %1663 = vst.msk [vmem:[%s3396_s4 + $0x4] sm:$0x3] %vm1456_vm9, %v1500_v25 }
 0x5ab   :  { %1664 = vst.msk [vmem:[%s3396_s4 + $0x6] sm:$0x3] %vm1456_vm9, %v1523_v27 }
 0x5ad   :  { %v1784_v28 = vpop.eup %1783 }
 0x5ae   :  { %v1344_v29 = vadd.f32 1.0, %v1784_v28 }
 0x5af   :  { %v1786_v30 = vpop.eup %1785 }
 0x5b0   :  { %v1788_v31 = vpop.eup %1787  ;;  %1789 = vrcp.f32 %v1344_v29  ;;  %v1366_v32 = vadd.f32 1.0, %v1786_v30  ;;  %v1356_v45 = vand.u32 2147483648, %v1344_v29  ;;  %v1354_v61 = vand.u32 2147483647, %v1344_v29 }
 0x5b1   :  { %v1390_v33 = vadd.f32 1.0, %v1788_v31  ;;  %vm1350_vm1 = vweird.f32 %v1344_v29 }
 0x5b2   :  { %1791 = vrcp.f32 %v1366_v32  ;;  %v1378_v15 = vand.u32 2147483648, %v1366_v32  ;;  %v1376_v0 = vand.u32 2147483647, %v1366_v32  ;;  %v1357_v16 = vor.u32 1.1754944e-38, %v1356_v45 }
 0x5b3   :  { %1793 = vrcp.f32 %v1390_v33  ;;  %vm1355_vm11 = vcmp.eq.f32.partialorder %v1354_v61, 8.507059e+37  ;;  %vm1372_vm12 = vweird.f32 %v1366_v32  ;;  %v1402_v8 = vand.u32 2147483648, %v1390_v33 }
 0x5b4   :  { %1795 = vtanh.f32 %v1382_v42  ;;  %v1379_v52 = vor.u32 1.1754944e-38, %v1378_v15  ;;  %vm1377_vm14 = vcmp.eq.f32.partialorder %v1376_v0, 8.507059e+37  ;;  %vm1396_vm3 = vweird.f32 %v1390_v33 }
 0x5b5   :  { %v1400_v7 = vand.u32 2147483647, %v1390_v33 }
 0x5b6   :  { %v1790_v34 = vpop.eup %1789 }
 0x5b7   :  { %v1346_v36 = vmul.f32 %v1790_v34, %v1344_v29  ;;  %vm1351_vm0 = vweird.f32 %v1790_v34  ;;  %vm1401_vm5 = vcmp.eq.f32.partialorder %v1400_v7, 8.507059e+37 }
 0x5b8   :  { %v1792_v37 = vpop.eup %1791  ;;  %vm1352_vm2 = vmor %vm1350_vm1, %vm1351_vm0 }
 0x5b9   :  { %v1347_v40 = vsub.f32 1.0, %v1346_v36  ;;  %v1794_v44 = vpop.eup %1793  ;;  %v1368_v55 = vmul.f32 %v1792_v37, %v1366_v32  ;;  %vm1373_vm10 = vweird.f32 %v1792_v37 }
 0x5ba   :  { %v1545_v39 = vpop.f32.mrf.mxu0  ;;  %v1568_v50 = vpop.f32.mrf.mxu1  ;;  %v1392_v51 = vmul.f32 %v1794_v44, %v1390_v33  ;;  %vm1374_vm13 = vmor %vm1372_vm12, %vm1373_vm10  ;;  %vm1397_vm15 = vweird.f32 %v1794_v44 }
 0x5bb   :  { %v1348_v62 = vmul.f32 %v1790_v34, %v1347_v40  ;;  %v1546_v47 = vadd.f32 %v3337_v48, %v1545_v39  ;;  %v1369_v46 = vsub.f32 1.0, %v1368_v55  ;;  %v1569_v53 = vadd.f32 %v3337_v48, %v1568_v50  ;;  %v1796_v60 = vpop.eup %1795  ;;  %vm1398_vm4 = vmor %vm1396_vm3, %vm1397_vm15 }
 0x5bc   :  { %v1393_v18 = vsub.f32 1.0, %v1392_v51 }
 0x5bd   :  { %v1349_v59 = vadd.f32 %v1790_v34, %v1348_v62  ;;  %1665 = vst.msk [vmem:[%s3396_s4 + $0x8] sm:$0x3] %vm1456_vm9, %v1546_v47  ;;  %v1370_v54 = vmul.f32 %v1792_v37, %v1369_v46 }
 0x5be   :  { %1666 = vst.msk [vmem:[%s3396_s4 + $0xa] sm:$0x3] %vm1456_vm9, %v1569_v53  ;;  %v1394_v38 = vmul.f32 %v1794_v44, %v1393_v18 }
 0x5bf   :  { %v1353_v1 = vsel %vm1352_vm2, %v1790_v34, %v1349_v59  ;;  %v1371_v6 = vadd.f32 %v1792_v37, %v1370_v54 }
 0x5c0   :  { %v1358_v41 = vsel %vm1355_vm11, %v1357_v16, %v1353_v1  ;;  %v1395_v22 = vadd.f32 %v1794_v44, %v1394_v38 }
 0x5c1   :  { %v1591_v17 = vpop.f32.mrf.mxu2  ;;  %v1375_v56 = vsel %vm1374_vm13, %v1792_v37, %v1371_v6  ;;  %v1407_v49 = vmul.f32 %v1796_v60, %v1358_v41 }
 0x5c2   :  { %v1592_v58 = vadd.f32 %v3337_v48, %v1591_v17  ;;  %v1380_v43 = vsel %vm1377_vm14, %v1379_v52, %v1375_v56  ;;  %v1399_v4 = vsel %vm1398_vm4, %v1794_v44, %v1395_v22 }
 0x5c3   :  { %v1406_v57 = vmul.f32 %v1380_v43, %v3267_v63  ;;  %v1403_v63 = vor.u32 1.1754944e-38, %v1402_v8 }
 0x5c4   :  { %1667 = vst.msk [vmem:[%s3396_s4 + $0xc] sm:$0x3] %vm1456_vm9, %v1592_v58 }
 0x5c5   :  { %v1408_v12 = vadd.f32 %v1407_v49, %v1406_v57  ;;  %v1404_v2 = vsel %vm1401_vm5, %v1403_v63, %v1399_v4 }
 0x5c7   :  { %1797 = vtanh.f32 %v1408_v12  ;;  %1414 = vst [vmem:[%s3397_s6] sm:$0x3] %v1408_v12 }
 0x5cd   :  { %v1798_v3 = vpop.eup %1797 }
 0x5ce   :  { %v1410_v23 = vmul.f32 %v1798_v3, %v1404_v2 }
 0x5d0   :  { %1413 = vst [vmem:[%s3398_s5] sm:$0x3] %v1410_v23 }
 0x5d1   :  { %1412 = vst [vmem:[#allocation2 + $0xe] sm:$0x3] %v1410_v23 }
 0x5d8   :  { %v1596_v5 = vld [vmem:[#allocation2 + $0xe] sm:$0x3] }
 0x5d9   :  { %1613 = vmatmul.f32.vlgmr.msrb.gmra.mxu3 %v1596_v5 }
 0x65c   :  { %v1614_v11 = vpop.f32.mrf.mxu3 }
 0x65d   :  { %v1615_v13 = vadd.f32 %v3337_v48, %v1614_v11 }
 0x65f   :  { %1668 = vst.msk [vmem:[%s3396_s4 + $0xe] sm:$0x3] %vm1456_vm9, %v1615_v13 }

</bundles_post_ra>
